<compile_context>
chip_gen: v7x
topology: tpu7x:2x2x1
jax: 0.10.0
libtpu: 0.0.40
codegen_flags: <defaults>
</compile_context>

<pallas_src>
import math

import jax
import jax.numpy as jnp
from jax.experimental import pallas as pl
from jax.experimental.pallas import tpu as pltpu

D_MODEL = 512
D_K = 64
D_V = 64
N_HEADS = 8
EPS = 1e-5


def mha_kernel(xq_ref, xk_ref, xv_ref, mask_ref,
               wq_ref, wk_ref, wv_ref, wfc_ref,
               out_ref, attn_ref):
    # One batch element per grid step.
    xq_f32 = xq_ref[0].astype(jnp.float32)          # residual path (f32)
    xq = xq_f32.astype(jnp.bfloat16)                # MXU operands in bf16
    xk = xk_ref[0].astype(jnp.bfloat16)
    xv = xv_ref[0].astype(jnp.bfloat16)
    mask = mask_ref[0]                              # [L, L]

    # Fused full-width projections: one 512-wide matmul each (fills the MXU)
    # instead of 8 thin N=64 per-head matmuls.  bf16 operands, f32 accumulate.
    q_all = jnp.dot(xq, wq_ref[...], preferred_element_type=jnp.float32)  # [L, 512]
    k_all = jnp.dot(xk, wk_ref[...], preferred_element_type=jnp.float32)  # [L, 512]
    v_all = jnp.dot(xv, wv_ref[...], preferred_element_type=jnp.float32)  # [L, 512]

    # Hoisted mask handling: one compare+select, reused additively per head.
    neg_bias = jnp.where(mask == 0, jnp.float32(-1.0e9), jnp.float32(0.0))

    scale = jnp.float32(1.0 / math.sqrt(D_K))
    dn = (((1,), (1,)), ((), ()))                   # contract last dims: q @ k^T

    ctx_parts = []
    attn_parts = []
    for h in range(N_HEADS):                        # unrolled, N_HEADS = 8
        col = slice(h * D_K, (h + 1) * D_K)
        qh = q_all[:, col].astype(jnp.bfloat16)     # [L, d_k]
        kh = k_all[:, col].astype(jnp.bfloat16)     # [L, d_k]
        vh = v_all[:, col].astype(jnp.bfloat16)     # [L, d_v]

        scores = jax.lax.dot_general(
            qh, kh, dn, preferred_element_type=jnp.float32) * scale       # [L, L]
        scores = scores + neg_bias

        # Softmax over last axis (f32 on the VPU; divide goes to EUP recip).
        m = jnp.max(scores, axis=-1, keepdims=True)
        e = jnp.exp(scores - m)
        l = jnp.sum(e, axis=-1, keepdims=True)
        # NOTE: a fully-masked query row gives l == 0 -> NaN, matching the
        # PyTorch reference behaviour.
        attn = e * pl.reciprocal(l, approx=True)
        attn_parts.append(attn)

        ctx_parts.append(jnp.dot(attn.astype(jnp.bfloat16), vh,
                                 preferred_element_type=jnp.float32))      # [L, d_v]

    # Lane-dense single store of all heads' attention probs: [L, n_heads*L].
    attn_ref[0] = jnp.concatenate(attn_parts, axis=-1).astype(attn_ref.dtype)

    # Fused output projection: single K=512 matmul instead of 8 K=64 partials.
    ctx = jnp.concatenate(ctx_parts, axis=-1).astype(jnp.bfloat16)          # [L, 512]
    proj = jnp.dot(ctx, wfc_ref[...], preferred_element_type=jnp.float32)   # [L, 512]

    # Residual + LayerNorm(d_model), default gamma=1, beta=0, eps=1e-5 (f32).
    resid = proj + xq_f32
    mean = jnp.mean(resid, axis=-1, keepdims=True)
    var = jnp.mean((resid - mean) ** 2, axis=-1, keepdims=True)
    out_ref[0] = ((resid - mean) * jax.lax.rsqrt(var + EPS)).astype(out_ref.dtype)


def multi_head_attention(input_Q, input_K, input_V, attn_mask,
                         W_Q, W_K, W_V, W_fc):
    """
    input_Q/K/V: [B, L, d_model]   attn_mask: [B, L, L] (1 = keep, 0 = masked)
    W_Q/W_K/W_V/W_fc: PyTorch nn.Linear weights with shape [out, in]
    Returns (output [B, L, d_model], attn [B, n_heads, L, L])
    """
    B, L, _ = input_Q.shape

    # nn.Linear computes y = x @ W.T ; pre-transpose to [in, out] and cast to
    # bf16 so the kernel runs bf16 MXU matmuls with f32 accumulation.
    wq_t = W_Q.T.astype(jnp.bfloat16)
    wk_t = W_K.T.astype(jnp.bfloat16)
    wv_t = W_V.T.astype(jnp.bfloat16)
    wfc_t = W_fc.T.astype(jnp.bfloat16)

    act_spec = pl.BlockSpec((1, L, D_MODEL), lambda b: (b, 0, 0))
    mask_spec = pl.BlockSpec((1, L, L), lambda b: (b, 0, 0))
    # Weight block index is constant across the grid -> fetched once, kept
    # resident in VMEM for all batch steps.
    w_spec = pl.BlockSpec((D_MODEL, D_MODEL), lambda b: (0, 0))

    out_shape = (
        jax.ShapeDtypeStruct((B, L, D_MODEL), input_Q.dtype),
        # attn emitted lane-dense as [B, L, n_heads*L]; reshaped below.
        jax.ShapeDtypeStruct((B, L, N_HEADS * L), jnp.float32),
    )
    out_specs = (
        pl.BlockSpec((1, L, D_MODEL), lambda b: (b, 0, 0)),
        pl.BlockSpec((1, L, N_HEADS * L), lambda b: (b, 0, 0)),
    )

    out, attn_flat = pl.pallas_call(
        mha_kernel,
        out_shape=out_shape,
        grid_spec=pltpu.PrefetchScalarGridSpec(
            num_scalar_prefetch=0,
            grid=(B,),
            in_specs=[act_spec, act_spec, act_spec, mask_spec,
                      w_spec, w_spec, w_spec, w_spec],
            out_specs=out_specs,
        ),
        compiler_params=pltpu.CompilerParams(
            dimension_semantics=("parallel",),
            vmem_limit_bytes=48 << 20,
        ),
    )(input_Q, input_K, input_V, attn_mask, wq_t, wk_t, wv_t, wfc_t)

    # TODO(synk): for long sequences, tile the query dim (grid=(B, L//TQ)) and
    # run online softmax over key tiles; not needed at these small shapes.
    attn = attn_flat.reshape(B, L, N_HEADS, L).transpose(0, 2, 1, 3)
    return out, attn


def _reference(input_Q, input_K, input_V, attn_mask, W_Q, W_K, W_V, W_fc):
    B, L, _ = input_Q.shape
    Q = (input_Q @ W_Q.T).reshape(B, L, N_HEADS, D_K).transpose(0, 2, 1, 3)
    K = (input_K @ W_K.T).reshape(B, L, N_HEADS, D_K).transpose(0, 2, 1, 3)
    V = (input_V @ W_V.T).reshape(B, L, N_HEADS, D_V).transpose(0, 2, 1, 3)
    scores = jnp.einsum("bhqd,bhkd->bhqk", Q, K) / math.sqrt(D_K)
    scores = jnp.where(attn_mask[:, None, :, :] == 0, -1.0e9, scores)
    attn = jax.nn.softmax(scores, axis=-1)
    ctx = jnp.einsum("bhqk,bhkd->bhqd", attn, V)
    ctx = ctx.transpose(0, 2, 1, 3).reshape(B, L, N_HEADS * D_V)
    out = ctx @ W_fc.T + input_Q
    mean = out.mean(-1, keepdims=True)
    var = ((out - mean) ** 2).mean(-1, keepdims=True)
    return (out - mean) * jax.lax.rsqrt(var + EPS), attn


if __name__ == "__main__":
    key = jax.random.PRNGKey(0)
    B, L = 2, 16
    ks = jax.random.split(key, 8)

    input_Q = jax.random.normal(ks[0], (B, L, D_MODEL), jnp.float32)
    input_K = jax.random.normal(ks[1], (B, L, D_MODEL), jnp.float32)
    input_V = jax.random.normal(ks[2], (B, L, D_MODEL), jnp.float32)
    # pad-style mask: 1 = keep, 0 = masked (last two key positions masked)
    attn_mask = jnp.ones((B, L, L), jnp.float32).at[:, :, -2:].set(0.0)

    init = 1.0 / math.sqrt(D_MODEL)
    W_Q = jax.random.uniform(ks[3], (N_HEADS * D_K, D_MODEL), jnp.float32, -init, init)
    W_K = jax.random.uniform(ks[4], (N_HEADS * D_K, D_MODEL), jnp.float32, -init, init)
    W_V = jax.random.uniform(ks[5], (N_HEADS * D_V, D_MODEL), jnp.float32, -init, init)
    W_fc = jax.random.uniform(ks[6], (D_MODEL, N_HEADS * D_V), jnp.float32, -init, init)

    out, attn = multi_head_attention(input_Q, input_K, input_V, attn_mask,
                                     W_Q, W_K, W_V, W_fc)
    jax.block_until_ready((out, attn))

    ref_out, ref_attn = _reference(input_Q, input_K, input_V, attn_mask,
                                   W_Q, W_K, W_V, W_fc)
    # bf16 MXU operands (f32 accumulation) => slightly looser tolerances.
    assert jnp.allclose(out, ref_out, atol=2e-2, rtol=2e-2)
    assert jnp.allclose(attn, ref_attn, atol=1e-2, rtol=1e-2)
    print("KERNEL_OK")
</pallas_src>

<mosaic_0001>
module attributes {stable_mosaic.version = 11 : i64} {
  func.func @mha_kernel(%arg0: i32, %arg1: memref<1x16x512xf32, #tpu.memory_space<vmem>>, %arg2: memref<1x16x512xf32, #tpu.memory_space<vmem>>, %arg3: memref<1x16x512xf32, #tpu.memory_space<vmem>>, %arg4: memref<1x16x16xf32, #tpu.memory_space<vmem>>, %arg5: memref<512x512xbf16, #tpu.memory_space<vmem>>, %arg6: memref<512x512xbf16, #tpu.memory_space<vmem>>, %arg7: memref<512x512xbf16, #tpu.memory_space<vmem>>, %arg8: memref<512x512xbf16, #tpu.memory_space<vmem>>, %arg9: memref<1x16x512xf32, #tpu.memory_space<vmem>>, %arg10: memref<1x16x128xf32, #tpu.memory_space<vmem>>) attributes {dimension_semantics = [#tpu.dimension_semantics<parallel>], iteration_bounds = array<i64: 2>, scalar_prefetch = 0 : i64, scratch_operands = 0 : i64, tpu.core_type = #tpu.core_type<tc>, window_params = [{transform_indices = @transform_0, window_bounds = array<i64: 1, 16, 512>}, {transform_indices = @transform_1, window_bounds = array<i64: 1, 16, 512>}, {transform_indices = @transform_2, window_bounds = array<i64: 1, 16, 512>}, {transform_indices = @transform_3, window_bounds = array<i64: 1, 16, 16>}, {pipeline_mode = #tpu.pipeline_mode<synchronous>, transform_indices = @transform_4, window_bounds = array<i64: 512, 512>}, {pipeline_mode = #tpu.pipeline_mode<synchronous>, transform_indices = @transform_5, window_bounds = array<i64: 512, 512>}, {pipeline_mode = #tpu.pipeline_mode<synchronous>, transform_indices = @transform_6, window_bounds = array<i64: 512, 512>}, {pipeline_mode = #tpu.pipeline_mode<synchronous>, transform_indices = @transform_7, window_bounds = array<i64: 512, 512>}, {transform_indices = @transform_8, window_bounds = array<i64: 1, 16, 512>}, {transform_indices = @transform_9, window_bounds = array<i64: 1, 16, 128>}]} {
    %c0 = arith.constant 0 : index
    %c0_0 = arith.constant 0 : index
    %c0_1 = arith.constant 0 : index
    %0 = vector.load %arg1[%c0, %c0_0, %c0_1] : memref<1x16x512xf32, #tpu.memory_space<vmem>>, vector<1x16x512xf32>
    %1 = vector.shape_cast %0 : vector<1x16x512xf32> to vector<16x512xf32>
    %2 = arith.truncf %1 : vector<16x512xf32> to vector<16x512xbf16>
    %c0_2 = arith.constant 0 : index
    %c0_3 = arith.constant 0 : index
    %c0_4 = arith.constant 0 : index
    %3 = vector.load %arg2[%c0_2, %c0_3, %c0_4] : memref<1x16x512xf32, #tpu.memory_space<vmem>>, vector<1x16x512xf32>
    %4 = vector.shape_cast %3 : vector<1x16x512xf32> to vector<16x512xf32>
    %5 = arith.truncf %4 : vector<16x512xf32> to vector<16x512xbf16>
    %c0_5 = arith.constant 0 : index
    %c0_6 = arith.constant 0 : index
    %c0_7 = arith.constant 0 : index
    %6 = vector.load %arg3[%c0_5, %c0_6, %c0_7] : memref<1x16x512xf32, #tpu.memory_space<vmem>>, vector<1x16x512xf32>
    %7 = vector.shape_cast %6 : vector<1x16x512xf32> to vector<16x512xf32>
    %8 = arith.truncf %7 : vector<16x512xf32> to vector<16x512xbf16>
    %c0_8 = arith.constant 0 : index
    %c0_9 = arith.constant 0 : index
    %c0_10 = arith.constant 0 : index
    %9 = vector.load %arg4[%c0_8, %c0_9, %c0_10] : memref<1x16x16xf32, #tpu.memory_space<vmem>>, vector<1x16x16xf32>
    %10 = vector.shape_cast %9 : vector<1x16x16xf32> to vector<16x16xf32>
    %c0_11 = arith.constant 0 : index
    %c0_12 = arith.constant 0 : index
    %11 = vector.load %arg5[%c0_11, %c0_12] : memref<512x512xbf16, #tpu.memory_space<vmem>>, vector<512x512xbf16>
    %cst = arith.constant dense<0.000000e+00> : vector<16x512xf32>
    %12 = tpu.matmul %2, %11, %cst {dimension_numbers = #tpu.dot_dimension_numbers<[1], [0], [0], [1], [0, 0, 1, 1], [], []>} : vector<16x512xbf16>, vector<512x512xbf16>, vector<16x512xf32> -> vector<16x512xf32>
    %c0_13 = arith.constant 0 : index
    %c0_14 = arith.constant 0 : index
    %13 = vector.load %arg6[%c0_13, %c0_14] : memref<512x512xbf16, #tpu.memory_space<vmem>>, vector<512x512xbf16>
    %cst_15 = arith.constant dense<0.000000e+00> : vector<16x512xf32>
    %14 = tpu.matmul %5, %13, %cst_15 {dimension_numbers = #tpu.dot_dimension_numbers<[1], [0], [0], [1], [0, 0, 1, 1], [], []>} : vector<16x512xbf16>, vector<512x512xbf16>, vector<16x512xf32> -> vector<16x512xf32>
    %c0_16 = arith.constant 0 : index
    %c0_17 = arith.constant 0 : index
    %15 = vector.load %arg7[%c0_16, %c0_17] : memref<512x512xbf16, #tpu.memory_space<vmem>>, vector<512x512xbf16>
    %cst_18 = arith.constant dense<0.000000e+00> : vector<16x512xf32>
    %16 = tpu.matmul %8, %15, %cst_18 {dimension_numbers = #tpu.dot_dimension_numbers<[1], [0], [0], [1], [0, 0, 1, 1], [], []>} : vector<16x512xbf16>, vector<512x512xbf16>, vector<16x512xf32> -> vector<16x512xf32>
    %cst_19 = arith.constant 0.000000e+00 : f32
    %17 = vector.broadcast %cst_19 : f32 to vector<16x16xf32>
    %18 = arith.cmpf oeq, %10, %17 : vector<16x16xf32>
    %cst_20 = arith.constant -1.000000e+09 : f32
    %cst_21 = arith.constant 0.000000e+00 : f32
    %19 = vector.broadcast %cst_20 : f32 to vector<16x16xf32>
    %20 = vector.broadcast %cst_21 : f32 to vector<16x16xf32>
    %21 = arith.select %18, %19, %20 : vector<16x16xi1>, vector<16x16xf32>
    %22 = vector.extract_strided_slice %12 {offsets = [0, 0], sizes = [16, 64], strides = [1, 1]} : vector<16x512xf32> to vector<16x64xf32>
    %23 = arith.truncf %22 : vector<16x64xf32> to vector<16x64xbf16>
    %24 = vector.extract_strided_slice %14 {offsets = [0, 0], sizes = [16, 64], strides = [1, 1]} : vector<16x512xf32> to vector<16x64xf32>
    %25 = arith.truncf %24 : vector<16x64xf32> to vector<16x64xbf16>
    %26 = vector.extract_strided_slice %16 {offsets = [0, 0], sizes = [16, 64], strides = [1, 1]} : vector<16x512xf32> to vector<16x64xf32>
    %27 = arith.truncf %26 : vector<16x64xf32> to vector<16x64xbf16>
    %cst_22 = arith.constant dense<0.000000e+00> : vector<16x16xf32>
    %28 = tpu.matmul %23, %25, %cst_22 {dimension_numbers = #tpu.dot_dimension_numbers<[1], [1], [0], [0], [0, 0, 1, 0], [], []>} : vector<16x64xbf16>, vector<16x64xbf16>, vector<16x16xf32> -> vector<16x16xf32>
    %cst_23 = arith.constant 1.250000e-01 : f32
    %29 = vector.broadcast %cst_23 : f32 to vector<16x16xf32>
    %30 = arith.mulf %28, %29 : vector<16x16xf32>
    %31 = arith.addf %30, %21 : vector<16x16xf32>
    %cst_24 = arith.constant dense<0xFF800000> : vector<16xf32>
    %32 = vector.multi_reduction <maximumf>, %31, %cst_24 [1] : vector<16x16xf32> to vector<16xf32>
    %33 = vector.shape_cast %32 : vector<16xf32> to vector<16x1xf32>
    %34 = vector.broadcast %33 : vector<16x1xf32> to vector<16x16xf32>
    %35 = arith.subf %31, %34 : vector<16x16xf32>
    %36 = math.exp %35 : vector<16x16xf32>
    %cst_25 = arith.constant dense<0.000000e+00> : vector<16xf32>
    %37 = vector.multi_reduction <add>, %36, %cst_25 [1] : vector<16x16xf32> to vector<16xf32>
    %38 = vector.shape_cast %37 : vector<16xf32> to vector<16x1xf32>
    %39 = tpu.reciprocal %38 {approx = true} : vector<16x1xf32> -> vector<16x1xf32>
    %40 = vector.broadcast %39 : vector<16x1xf32> to vector<16x16xf32>
    %41 = arith.mulf %36, %40 : vector<16x16xf32>
    %42 = arith.truncf %41 : vector<16x16xf32> to vector<16x16xbf16>
    %cst_26 = arith.constant dense<0.000000e+00> : vector<16x64xf32>
    %43 = tpu.matmul %42, %27, %cst_26 {dimension_numbers = #tpu.dot_dimension_numbers<[1], [0], [0], [1], [0, 0, 1, 1], [], []>} : vector<16x16xbf16>, vector<16x64xbf16>, vector<16x64xf32> -> vector<16x64xf32>
    %44 = vector.extract_strided_slice %12 {offsets = [0, 64], sizes = [16, 64], strides = [1, 1]} : vector<16x512xf32> to vector<16x64xf32>
    %45 = arith.truncf %44 : vector<16x64xf32> to vector<16x64xbf16>
    %46 = vector.extract_strided_slice %14 {offsets = [0, 64], sizes = [16, 64], strides = [1, 1]} : vector<16x512xf32> to vector<16x64xf32>
    %47 = arith.truncf %46 : vector<16x64xf32> to vector<16x64xbf16>
    %48 = vector.extract_strided_slice %16 {offsets = [0, 64], sizes = [16, 64], strides = [1, 1]} : vector<16x512xf32> to vector<16x64xf32>
    %49 = arith.truncf %48 : vector<16x64xf32> to vector<16x64xbf16>
    %cst_27 = arith.constant dense<0.000000e+00> : vector<16x16xf32>
    %50 = tpu.matmul %45, %47, %cst_27 {dimension_numbers = #tpu.dot_dimension_numbers<[1], [1], [0], [0], [0, 0, 1, 0], [], []>} : vector<16x64xbf16>, vector<16x64xbf16>, vector<16x16xf32> -> vector<16x16xf32>
    %cst_28 = arith.constant 1.250000e-01 : f32
    %51 = vector.broadcast %cst_28 : f32 to vector<16x16xf32>
    %52 = arith.mulf %50, %51 : vector<16x16xf32>
    %53 = arith.addf %52, %21 : vector<16x16xf32>
    %cst_29 = arith.constant dense<0xFF800000> : vector<16xf32>
    %54 = vector.multi_reduction <maximumf>, %53, %cst_29 [1] : vector<16x16xf32> to vector<16xf32>
    %55 = vector.shape_cast %54 : vector<16xf32> to vector<16x1xf32>
    %56 = vector.broadcast %55 : vector<16x1xf32> to vector<16x16xf32>
    %57 = arith.subf %53, %56 : vector<16x16xf32>
    %58 = math.exp %57 : vector<16x16xf32>
    %cst_30 = arith.constant dense<0.000000e+00> : vector<16xf32>
    %59 = vector.multi_reduction <add>, %58, %cst_30 [1] : vector<16x16xf32> to vector<16xf32>
    %60 = vector.shape_cast %59 : vector<16xf32> to vector<16x1xf32>
    %61 = tpu.reciprocal %60 {approx = true} : vector<16x1xf32> -> vector<16x1xf32>
    %62 = vector.broadcast %61 : vector<16x1xf32> to vector<16x16xf32>
    %63 = arith.mulf %58, %62 : vector<16x16xf32>
    %64 = arith.truncf %63 : vector<16x16xf32> to vector<16x16xbf16>
    %cst_31 = arith.constant dense<0.000000e+00> : vector<16x64xf32>
    %65 = tpu.matmul %64, %49, %cst_31 {dimension_numbers = #tpu.dot_dimension_numbers<[1], [0], [0], [1], [0, 0, 1, 1], [], []>} : vector<16x16xbf16>, vector<16x64xbf16>, vector<16x64xf32> -> vector<16x64xf32>
    %66 = vector.extract_strided_slice %12 {offsets = [0, 128], sizes = [16, 64], strides = [1, 1]} : vector<16x512xf32> to vector<16x64xf32>
    %67 = arith.truncf %66 : vector<16x64xf32> to vector<16x64xbf16>
    %68 = vector.extract_strided_slice %14 {offsets = [0, 128], sizes = [16, 64], strides = [1, 1]} : vector<16x512xf32> to vector<16x64xf32>
    %69 = arith.truncf %68 : vector<16x64xf32> to vector<16x64xbf16>
    %70 = vector.extract_strided_slice %16 {offsets = [0, 128], sizes = [16, 64], strides = [1, 1]} : vector<16x512xf32> to vector<16x64xf32>
    %71 = arith.truncf %70 : vector<16x64xf32> to vector<16x64xbf16>
    %cst_32 = arith.constant dense<0.000000e+00> : vector<16x16xf32>
    %72 = tpu.matmul %67, %69, %cst_32 {dimension_numbers = #tpu.dot_dimension_numbers<[1], [1], [0], [0], [0, 0, 1, 0], [], []>} : vector<16x64xbf16>, vector<16x64xbf16>, vector<16x16xf32> -> vector<16x16xf32>
    %cst_33 = arith.constant 1.250000e-01 : f32
    %73 = vector.broadcast %cst_33 : f32 to vector<16x16xf32>
    %74 = arith.mulf %72, %73 : vector<16x16xf32>
    %75 = arith.addf %74, %21 : vector<16x16xf32>
    %cst_34 = arith.constant dense<0xFF800000> : vector<16xf32>
    %76 = vector.multi_reduction <maximumf>, %75, %cst_34 [1] : vector<16x16xf32> to vector<16xf32>
    %77 = vector.shape_cast %76 : vector<16xf32> to vector<16x1xf32>
    %78 = vector.broadcast %77 : vector<16x1xf32> to vector<16x16xf32>
    %79 = arith.subf %75, %78 : vector<16x16xf32>
    %80 = math.exp %79 : vector<16x16xf32>
    %cst_35 = arith.constant dense<0.000000e+00> : vector<16xf32>
    %81 = vector.multi_reduction <add>, %80, %cst_35 [1] : vector<16x16xf32> to vector<16xf32>
    %82 = vector.shape_cast %81 : vector<16xf32> to vector<16x1xf32>
    %83 = tpu.reciprocal %82 {approx = true} : vector<16x1xf32> -> vector<16x1xf32>
    %84 = vector.broadcast %83 : vector<16x1xf32> to vector<16x16xf32>
    %85 = arith.mulf %80, %84 : vector<16x16xf32>
    %86 = arith.truncf %85 : vector<16x16xf32> to vector<16x16xbf16>
    %cst_36 = arith.constant dense<0.000000e+00> : vector<16x64xf32>
    %87 = tpu.matmul %86, %71, %cst_36 {dimension_numbers = #tpu.dot_dimension_numbers<[1], [0], [0], [1], [0, 0, 1, 1], [], []>} : vector<16x16xbf16>, vector<16x64xbf16>, vector<16x64xf32> -> vector<16x64xf32>
    %88 = vector.extract_strided_slice %12 {offsets = [0, 192], sizes = [16, 64], strides = [1, 1]} : vector<16x512xf32> to vector<16x64xf32>
    %89 = arith.truncf %88 : vector<16x64xf32> to vector<16x64xbf16>
    %90 = vector.extract_strided_slice %14 {offsets = [0, 192], sizes = [16, 64], strides = [1, 1]} : vector<16x512xf32> to vector<16x64xf32>
    %91 = arith.truncf %90 : vector<16x64xf32> to vector<16x64xbf16>
    %92 = vector.extract_strided_slice %16 {offsets = [0, 192], sizes = [16, 64], strides = [1, 1]} : vector<16x512xf32> to vector<16x64xf32>
    %93 = arith.truncf %92 : vector<16x64xf32> to vector<16x64xbf16>
    %cst_37 = arith.constant dense<0.000000e+00> : vector<16x16xf32>
    %94 = tpu.matmul %89, %91, %cst_37 {dimension_numbers = #tpu.dot_dimension_numbers<[1], [1], [0], [0], [0, 0, 1, 0], [], []>} : vector<16x64xbf16>, vector<16x64xbf16>, vector<16x16xf32> -> vector<16x16xf32>
    %cst_38 = arith.constant 1.250000e-01 : f32
    %95 = vector.broadcast %cst_38 : f32 to vector<16x16xf32>
    %96 = arith.mulf %94, %95 : vector<16x16xf32>
    %97 = arith.addf %96, %21 : vector<16x16xf32>
    %cst_39 = arith.constant dense<0xFF800000> : vector<16xf32>
    %98 = vector.multi_reduction <maximumf>, %97, %cst_39 [1] : vector<16x16xf32> to vector<16xf32>
    %99 = vector.shape_cast %98 : vector<16xf32> to vector<16x1xf32>
    %100 = vector.broadcast %99 : vector<16x1xf32> to vector<16x16xf32>
    %101 = arith.subf %97, %100 : vector<16x16xf32>
    %102 = math.exp %101 : vector<16x16xf32>
    %cst_40 = arith.constant dense<0.000000e+00> : vector<16xf32>
    %103 = vector.multi_reduction <add>, %102, %cst_40 [1] : vector<16x16xf32> to vector<16xf32>
    %104 = vector.shape_cast %103 : vector<16xf32> to vector<16x1xf32>
    %105 = tpu.reciprocal %104 {approx = true} : vector<16x1xf32> -> vector<16x1xf32>
    %106 = vector.broadcast %105 : vector<16x1xf32> to vector<16x16xf32>
    %107 = arith.mulf %102, %106 : vector<16x16xf32>
    %108 = arith.truncf %107 : vector<16x16xf32> to vector<16x16xbf16>
    %cst_41 = arith.constant dense<0.000000e+00> : vector<16x64xf32>
    %109 = tpu.matmul %108, %93, %cst_41 {dimension_numbers = #tpu.dot_dimension_numbers<[1], [0], [0], [1], [0, 0, 1, 1], [], []>} : vector<16x16xbf16>, vector<16x64xbf16>, vector<16x64xf32> -> vector<16x64xf32>
    %110 = vector.extract_strided_slice %12 {offsets = [0, 256], sizes = [16, 64], strides = [1, 1]} : vector<16x512xf32> to vector<16x64xf32>
    %111 = arith.truncf %110 : vector<16x64xf32> to vector<16x64xbf16>
    %112 = vector.extract_strided_slice %14 {offsets = [0, 256], sizes = [16, 64], strides = [1, 1]} : vector<16x512xf32> to vector<16x64xf32>
    %113 = arith.truncf %112 : vector<16x64xf32> to vector<16x64xbf16>
    %114 = vector.extract_strided_slice %16 {offsets = [0, 256], sizes = [16, 64], strides = [1, 1]} : vector<16x512xf32> to vector<16x64xf32>
    %115 = arith.truncf %114 : vector<16x64xf32> to vector<16x64xbf16>
    %cst_42 = arith.constant dense<0.000000e+00> : vector<16x16xf32>
    %116 = tpu.matmul %111, %113, %cst_42 {dimension_numbers = #tpu.dot_dimension_numbers<[1], [1], [0], [0], [0, 0, 1, 0], [], []>} : vector<16x64xbf16>, vector<16x64xbf16>, vector<16x16xf32> -> vector<16x16xf32>
    %cst_43 = arith.constant 1.250000e-01 : f32
    %117 = vector.broadcast %cst_43 : f32 to vector<16x16xf32>
    %118 = arith.mulf %116, %117 : vector<16x16xf32>
    %119 = arith.addf %118, %21 : vector<16x16xf32>
    %cst_44 = arith.constant dense<0xFF800000> : vector<16xf32>
    %120 = vector.multi_reduction <maximumf>, %119, %cst_44 [1] : vector<16x16xf32> to vector<16xf32>
    %121 = vector.shape_cast %120 : vector<16xf32> to vector<16x1xf32>
    %122 = vector.broadcast %121 : vector<16x1xf32> to vector<16x16xf32>
    %123 = arith.subf %119, %122 : vector<16x16xf32>
    %124 = math.exp %123 : vector<16x16xf32>
    %cst_45 = arith.constant dense<0.000000e+00> : vector<16xf32>
    %125 = vector.multi_reduction <add>, %124, %cst_45 [1] : vector<16x16xf32> to vector<16xf32>
    %126 = vector.shape_cast %125 : vector<16xf32> to vector<16x1xf32>
    %127 = tpu.reciprocal %126 {approx = true} : vector<16x1xf32> -> vector<16x1xf32>
    %128 = vector.broadcast %127 : vector<16x1xf32> to vector<16x16xf32>
    %129 = arith.mulf %124, %128 : vector<16x16xf32>
    %130 = arith.truncf %129 : vector<16x16xf32> to vector<16x16xbf16>
    %cst_46 = arith.constant dense<0.000000e+00> : vector<16x64xf32>
    %131 = tpu.matmul %130, %115, %cst_46 {dimension_numbers = #tpu.dot_dimension_numbers<[1], [0], [0], [1], [0, 0, 1, 1], [], []>} : vector<16x16xbf16>, vector<16x64xbf16>, vector<16x64xf32> -> vector<16x64xf32>
    %132 = vector.extract_strided_slice %12 {offsets = [0, 320], sizes = [16, 64], strides = [1, 1]} : vector<16x512xf32> to vector<16x64xf32>
    %133 = arith.truncf %132 : vector<16x64xf32> to vector<16x64xbf16>
    %134 = vector.extract_strided_slice %14 {offsets = [0, 320], sizes = [16, 64], strides = [1, 1]} : vector<16x512xf32> to vector<16x64xf32>
    %135 = arith.truncf %134 : vector<16x64xf32> to vector<16x64xbf16>
    %136 = vector.extract_strided_slice %16 {offsets = [0, 320], sizes = [16, 64], strides = [1, 1]} : vector<16x512xf32> to vector<16x64xf32>
    %137 = arith.truncf %136 : vector<16x64xf32> to vector<16x64xbf16>
    %cst_47 = arith.constant dense<0.000000e+00> : vector<16x16xf32>
    %138 = tpu.matmul %133, %135, %cst_47 {dimension_numbers = #tpu.dot_dimension_numbers<[1], [1], [0], [0], [0, 0, 1, 0], [], []>} : vector<16x64xbf16>, vector<16x64xbf16>, vector<16x16xf32> -> vector<16x16xf32>
    %cst_48 = arith.constant 1.250000e-01 : f32
    %139 = vector.broadcast %cst_48 : f32 to vector<16x16xf32>
    %140 = arith.mulf %138, %139 : vector<16x16xf32>
    %141 = arith.addf %140, %21 : vector<16x16xf32>
    %cst_49 = arith.constant dense<0xFF800000> : vector<16xf32>
    %142 = vector.multi_reduction <maximumf>, %141, %cst_49 [1] : vector<16x16xf32> to vector<16xf32>
    %143 = vector.shape_cast %142 : vector<16xf32> to vector<16x1xf32>
    %144 = vector.broadcast %143 : vector<16x1xf32> to vector<16x16xf32>
    %145 = arith.subf %141, %144 : vector<16x16xf32>
    %146 = math.exp %145 : vector<16x16xf32>
    %cst_50 = arith.constant dense<0.000000e+00> : vector<16xf32>
    %147 = vector.multi_reduction <add>, %146, %cst_50 [1] : vector<16x16xf32> to vector<16xf32>
    %148 = vector.shape_cast %147 : vector<16xf32> to vector<16x1xf32>
    %149 = tpu.reciprocal %148 {approx = true} : vector<16x1xf32> -> vector<16x1xf32>
    %150 = vector.broadcast %149 : vector<16x1xf32> to vector<16x16xf32>
    %151 = arith.mulf %146, %150 : vector<16x16xf32>
    %152 = arith.truncf %151 : vector<16x16xf32> to vector<16x16xbf16>
    %cst_51 = arith.constant dense<0.000000e+00> : vector<16x64xf32>
    %153 = tpu.matmul %152, %137, %cst_51 {dimension_numbers = #tpu.dot_dimension_numbers<[1], [0], [0], [1], [0, 0, 1, 1], [], []>} : vector<16x16xbf16>, vector<16x64xbf16>, vector<16x64xf32> -> vector<16x64xf32>
    %154 = vector.extract_strided_slice %12 {offsets = [0, 384], sizes = [16, 64], strides = [1, 1]} : vector<16x512xf32> to vector<16x64xf32>
    %155 = arith.truncf %154 : vector<16x64xf32> to vector<16x64xbf16>
    %156 = vector.extract_strided_slice %14 {offsets = [0, 384], sizes = [16, 64], strides = [1, 1]} : vector<16x512xf32> to vector<16x64xf32>
    %157 = arith.truncf %156 : vector<16x64xf32> to vector<16x64xbf16>
    %158 = vector.extract_strided_slice %16 {offsets = [0, 384], sizes = [16, 64], strides = [1, 1]} : vector<16x512xf32> to vector<16x64xf32>
    %159 = arith.truncf %158 : vector<16x64xf32> to vector<16x64xbf16>
    %cst_52 = arith.constant dense<0.000000e+00> : vector<16x16xf32>
    %160 = tpu.matmul %155, %157, %cst_52 {dimension_numbers = #tpu.dot_dimension_numbers<[1], [1], [0], [0], [0, 0, 1, 0], [], []>} : vector<16x64xbf16>, vector<16x64xbf16>, vector<16x16xf32> -> vector<16x16xf32>
    %cst_53 = arith.constant 1.250000e-01 : f32
    %161 = vector.broadcast %cst_53 : f32 to vector<16x16xf32>
    %162 = arith.mulf %160, %161 : vector<16x16xf32>
    %163 = arith.addf %162, %21 : vector<16x16xf32>
    %cst_54 = arith.constant dense<0xFF800000> : vector<16xf32>
    %164 = vector.multi_reduction <maximumf>, %163, %cst_54 [1] : vector<16x16xf32> to vector<16xf32>
    %165 = vector.shape_cast %164 : vector<16xf32> to vector<16x1xf32>
    %166 = vector.broadcast %165 : vector<16x1xf32> to vector<16x16xf32>
    %167 = arith.subf %163, %166 : vector<16x16xf32>
    %168 = math.exp %167 : vector<16x16xf32>
    %cst_55 = arith.constant dense<0.000000e+00> : vector<16xf32>
    %169 = vector.multi_reduction <add>, %168, %cst_55 [1] : vector<16x16xf32> to vector<16xf32>
    %170 = vector.shape_cast %169 : vector<16xf32> to vector<16x1xf32>
    %171 = tpu.reciprocal %170 {approx = true} : vector<16x1xf32> -> vector<16x1xf32>
    %172 = vector.broadcast %171 : vector<16x1xf32> to vector<16x16xf32>
    %173 = arith.mulf %168, %172 : vector<16x16xf32>
    %174 = arith.truncf %173 : vector<16x16xf32> to vector<16x16xbf16>
    %cst_56 = arith.constant dense<0.000000e+00> : vector<16x64xf32>
    %175 = tpu.matmul %174, %159, %cst_56 {dimension_numbers = #tpu.dot_dimension_numbers<[1], [0], [0], [1], [0, 0, 1, 1], [], []>} : vector<16x16xbf16>, vector<16x64xbf16>, vector<16x64xf32> -> vector<16x64xf32>
    %176 = vector.extract_strided_slice %12 {offsets = [0, 448], sizes = [16, 64], strides = [1, 1]} : vector<16x512xf32> to vector<16x64xf32>
    %177 = arith.truncf %176 : vector<16x64xf32> to vector<16x64xbf16>
    %178 = vector.extract_strided_slice %14 {offsets = [0, 448], sizes = [16, 64], strides = [1, 1]} : vector<16x512xf32> to vector<16x64xf32>
    %179 = arith.truncf %178 : vector<16x64xf32> to vector<16x64xbf16>
    %180 = vector.extract_strided_slice %16 {offsets = [0, 448], sizes = [16, 64], strides = [1, 1]} : vector<16x512xf32> to vector<16x64xf32>
    %181 = arith.truncf %180 : vector<16x64xf32> to vector<16x64xbf16>
    %cst_57 = arith.constant dense<0.000000e+00> : vector<16x16xf32>
    %182 = tpu.matmul %177, %179, %cst_57 {dimension_numbers = #tpu.dot_dimension_numbers<[1], [1], [0], [0], [0, 0, 1, 0], [], []>} : vector<16x64xbf16>, vector<16x64xbf16>, vector<16x16xf32> -> vector<16x16xf32>
    %cst_58 = arith.constant 1.250000e-01 : f32
    %183 = vector.broadcast %cst_58 : f32 to vector<16x16xf32>
    %184 = arith.mulf %182, %183 : vector<16x16xf32>
    %185 = arith.addf %184, %21 : vector<16x16xf32>
    %cst_59 = arith.constant dense<0xFF800000> : vector<16xf32>
    %186 = vector.multi_reduction <maximumf>, %185, %cst_59 [1] : vector<16x16xf32> to vector<16xf32>
    %187 = vector.shape_cast %186 : vector<16xf32> to vector<16x1xf32>
    %188 = vector.broadcast %187 : vector<16x1xf32> to vector<16x16xf32>
    %189 = arith.subf %185, %188 : vector<16x16xf32>
    %190 = math.exp %189 : vector<16x16xf32>
    %cst_60 = arith.constant dense<0.000000e+00> : vector<16xf32>
    %191 = vector.multi_reduction <add>, %190, %cst_60 [1] : vector<16x16xf32> to vector<16xf32>
    %192 = vector.shape_cast %191 : vector<16xf32> to vector<16x1xf32>
    %193 = tpu.reciprocal %192 {approx = true} : vector<16x1xf32> -> vector<16x1xf32>
    %194 = vector.broadcast %193 : vector<16x1xf32> to vector<16x16xf32>
    %195 = arith.mulf %190, %194 : vector<16x16xf32>
    %196 = arith.truncf %195 : vector<16x16xf32> to vector<16x16xbf16>
    %cst_61 = arith.constant dense<0.000000e+00> : vector<16x64xf32>
    %197 = tpu.matmul %196, %181, %cst_61 {dimension_numbers = #tpu.dot_dimension_numbers<[1], [0], [0], [1], [0, 0, 1, 1], [], []>} : vector<16x16xbf16>, vector<16x64xbf16>, vector<16x64xf32> -> vector<16x64xf32>
    %198 = tpu.concatenate %41, %63, %85, %107, %129, %151, %173, %195 in 1 : vector<16x16xf32>, vector<16x16xf32>, vector<16x16xf32>, vector<16x16xf32>, vector<16x16xf32>, vector<16x16xf32>, vector<16x16xf32>, vector<16x16xf32> -> vector<16x128xf32>
    %c0_62 = arith.constant 0 : index
    %c0_63 = arith.constant 0 : index
    %c0_64 = arith.constant 0 : index
    %199 = vector.load %arg10[%c0_62, %c0_63, %c0_64] : memref<1x16x128xf32, #tpu.memory_space<vmem>>, vector<1x16x128xf32>
    %200 = vector.shape_cast %199 : vector<1x16x128xf32> to vector<16x128xf32>
    %201 = vector.shape_cast %198 : vector<16x128xf32> to vector<1x16x128xf32>
    tpu.vector_store %arg10[%c0_62, %c0_63, %c0_64], %201 {strides = array<i32>} : memref<1x16x128xf32, #tpu.memory_space<vmem>>, vector<1x16x128xf32>,
    %202 = tpu.concatenate %43, %65, %87, %109, %131, %153, %175, %197 in 1 : vector<16x64xf32>, vector<16x64xf32>, vector<16x64xf32>, vector<16x64xf32>, vector<16x64xf32>, vector<16x64xf32>, vector<16x64xf32>, vector<16x64xf32> -> vector<16x512xf32>
    %203 = arith.truncf %202 : vector<16x512xf32> to vector<16x512xbf16>
    %c0_65 = arith.constant 0 : index
    %c0_66 = arith.constant 0 : index
    %204 = vector.load %arg8[%c0_65, %c0_66] : memref<512x512xbf16, #tpu.memory_space<vmem>>, vector<512x512xbf16>
    %cst_67 = arith.constant dense<0.000000e+00> : vector<16x512xf32>
    %205 = tpu.matmul %203, %204, %cst_67 {dimension_numbers = #tpu.dot_dimension_numbers<[1], [0], [0], [1], [0, 0, 1, 1], [], []>} : vector<16x512xbf16>, vector<512x512xbf16>, vector<16x512xf32> -> vector<16x512xf32>
    %206 = arith.addf %205, %1 : vector<16x512xf32>
    %cst_68 = arith.constant dense<0.000000e+00> : vector<16xf32>
    %207 = vector.multi_reduction <add>, %206, %cst_68 [1] : vector<16x512xf32> to vector<16xf32>
    %208 = vector.shape_cast %207 : vector<16xf32> to vector<16x1xf32>
    %cst_69 = arith.constant 5.120000e+02 : f32
    %209 = vector.broadcast %cst_69 : f32 to vector<16x1xf32>
    %210 = arith.divf %208, %209 : vector<16x1xf32>
    %211 = vector.broadcast %210 : vector<16x1xf32> to vector<16x512xf32>
    %212 = arith.subf %206, %211 : vector<16x512xf32>
    %213 = arith.mulf %212, %212 : vector<16x512xf32>
    %cst_70 = arith.constant dense<0.000000e+00> : vector<16xf32>
    %214 = vector.multi_reduction <add>, %213, %cst_70 [1] : vector<16x512xf32> to vector<16xf32>
    %215 = vector.shape_cast %214 : vector<16xf32> to vector<16x1xf32>
    %cst_71 = arith.constant 5.120000e+02 : f32
    %216 = vector.broadcast %cst_71 : f32 to vector<16x1xf32>
    %217 = arith.divf %215, %216 : vector<16x1xf32>
    %218 = vector.broadcast %210 : vector<16x1xf32> to vector<16x512xf32>
    %219 = arith.subf %206, %218 : vector<16x512xf32>
    %cst_72 = arith.constant 9.99999974E-6 : f32
    %220 = vector.broadcast %cst_72 : f32 to vector<16x1xf32>
    %221 = arith.addf %217, %220 : vector<16x1xf32>
    %222 = math.rsqrt %221 : vector<16x1xf32>
    %223 = vector.broadcast %222 : vector<16x1xf32> to vector<16x512xf32>
    %224 = arith.mulf %219, %223 : vector<16x512xf32>
    %c0_73 = arith.constant 0 : index
    %c0_74 = arith.constant 0 : index
    %c0_75 = arith.constant 0 : index
    %225 = vector.load %arg9[%c0_73, %c0_74, %c0_75] : memref<1x16x512xf32, #tpu.memory_space<vmem>>, vector<1x16x512xf32>
    %226 = vector.shape_cast %225 : vector<1x16x512xf32> to vector<16x512xf32>
    %227 = vector.shape_cast %224 : vector<16x512xf32> to vector<1x16x512xf32>
    tpu.vector_store %arg9[%c0_73, %c0_74, %c0_75], %227 {strides = array<i32>} : memref<1x16x512xf32, #tpu.memory_space<vmem>>, vector<1x16x512xf32>,
    return
  }
  func.func @transform_0(%arg0: i32) -> (i32, i32, i32) {
    %c0_i32 = arith.constant 0 : i32
    %c0_i32_0 = arith.constant 0 : i32
    %c0_i32_1 = arith.constant 0 : i32
    return %arg0, %c0_i32, %c0_i32_0 : i32, i32, i32
  }
  func.func @transform_1(%arg0: i32) -> (i32, i32, i32) {
    %c0_i32 = arith.constant 0 : i32
    %c0_i32_0 = arith.constant 0 : i32
    %c0_i32_1 = arith.constant 0 : i32
    return %arg0, %c0_i32, %c0_i32_0 : i32, i32, i32
  }
  func.func @transform_2(%arg0: i32) -> (i32, i32, i32) {
    %c0_i32 = arith.constant 0 : i32
    %c0_i32_0 = arith.constant 0 : i32
    %c0_i32_1 = arith.constant 0 : i32
    return %arg0, %c0_i32, %c0_i32_0 : i32, i32, i32
  }
  func.func @transform_3(%arg0: i32) -> (i32, i32, i32) {
    %c0_i32 = arith.constant 0 : i32
    %c0_i32_0 = arith.constant 0 : i32
    %c0_i32_1 = arith.constant 0 : i32
    return %arg0, %c0_i32, %c0_i32_0 : i32, i32, i32
  }
  func.func @transform_4(%arg0: i32) -> (i32, i32) {
    %c0_i32 = arith.constant 0 : i32
    %c0_i32_0 = arith.constant 0 : i32
    %c0_i32_1 = arith.constant 0 : i32
    return %c0_i32, %c0_i32_0 : i32, i32
  }
  func.func @transform_5(%arg0: i32) -> (i32, i32) {
    %c0_i32 = arith.constant 0 : i32
    %c0_i32_0 = arith.constant 0 : i32
    %c0_i32_1 = arith.constant 0 : i32
    return %c0_i32, %c0_i32_0 : i32, i32
  }
  func.func @transform_6(%arg0: i32) -> (i32, i32) {
    %c0_i32 = arith.constant 0 : i32
    %c0_i32_0 = arith.constant 0 : i32
    %c0_i32_1 = arith.constant 0 : i32
    return %c0_i32, %c0_i32_0 : i32, i32
  }
  func.func @transform_7(%arg0: i32) -> (i32, i32) {
    %c0_i32 = arith.constant 0 : i32
    %c0_i32_0 = arith.constant 0 : i32
    %c0_i32_1 = arith.constant 0 : i32
    return %c0_i32, %c0_i32_0 : i32, i32
  }
  func.func @transform_8(%arg0: i32) -> (i32, i32, i32) {
    %c0_i32 = arith.constant 0 : i32
    %c0_i32_0 = arith.constant 0 : i32
    %c0_i32_1 = arith.constant 0 : i32
    return %arg0, %c0_i32, %c0_i32_0 : i32, i32, i32
  }
  func.func @transform_9(%arg0: i32) -> (i32, i32, i32) {
    %c0_i32 = arith.constant 0 : i32
    %c0_i32_0 = arith.constant 0 : i32
    %c0_i32_1 = arith.constant 0 : i32
    return %arg0, %c0_i32, %c0_i32_0 : i32, i32, i32
  }
}

</mosaic_0001>

<bundles_post_ra>
// kernel: tpu_custom_call.1
= control target key start
LH: loop header
LB: loop body
LE: loop exit
PB: predicated region body
PF: predicated region fallthrough
CT: control target
= control target key end

     0   :  { %s8892_s0 = inlined_call_operand.hbm [shape: f32[2,16,512], index: 0, kind: input, shape index: {}]   ;;  %s8893_s1 = inlined_call_operand.hbm [shape: f32[2,16,512], index: 1, kind: input, shape index: {}]   ;;  %s8894_s2 = inlined_call_operand.hbm [shape: f32[2,16,512], index: 2, kind: input, shape index: {}]   ;;  %s8895_s3 = inlined_call_operand.hbm [shape: f32[2,16,16], index: 3, kind: input, shape index: {}]   ;;  %s8896_s4 = inlined_call_operand.hbm [shape: bf16[512,512], index: 4, kind: input, shape index: {}]   ;;  %s8897_s5 = inlined_call_operand.hbm [shape: bf16[512,512], index: 5, kind: input, shape index: {}]   ;;  %s8898_s6 = inlined_call_operand.hbm [shape: bf16[512,512], index: 6, kind: input, shape index: {}]   ;;  %s8899_s7 = inlined_call_operand.hbm [shape: bf16[512,512], index: 7, kind: input, shape index: {}]   ;;  %s8900_s8 = inlined_call_operand.hbm [shape: f32[2,16,512], index: 8, kind: output, shape index: {0}]   ;;  %s8901_s9 = inlined_call_operand.hbm [shape: f32[2,16,128], index: 9, kind: output, shape index: {1}]  }
   0x1   :  { %8932 = sst [smem:[#allocation35_spill]] %s8893_s1 }
   0x2   :  { %8933 = sst [smem:[#allocation36_spill]] %s8896_s4 }
   0x3   :  { %8934 = sst [smem:[#allocation37_spill]] %s8897_s5 }
   0x4   :  { %8935 = sst [smem:[#allocation38_spill]] %s8900_s8 }
   0x5   :  { %8936 = sst [smem:[#allocation39_spill]] %s8901_s9 }
   0x6   :  { %15 = vsyncpa [#allocation3], 0 }
   0x7   :  { %17 = vsyncpa [#allocation3 + $0x1], 0 }
   0x8   :  { %18 = vsyncpa [#allocation6], 0 }
   0x9   :  { %20 = vsyncpa [#allocation6 + $0x1], 0 }
   0xa   :  { %21 = vsyncpa [#allocation9], 0 }
   0xb   :  { %23 = vsyncpa [#allocation9 + $0x1], 0 }
   0xc   :  { %24 = vsyncpa [#allocation12], 0 }
   0xd   :  { %25 = vsyncpa [#allocation15], 0 }
   0xe   :  { %26 = vsyncpa [#allocation4], 0 }
   0xf   :  { %28 = vsyncpa [#allocation4 + $0x1], 0 }
  0x10   :  { %29 = vsyncpa [#allocation18], 0 }
  0x11   :  { %31 = vsyncpa [#allocation18 + $0x1], 0  ;;  %s7923_s30 = smov 0   ;;  %s7925_s10 = smov 0  }
  0x12   :  { %s7927_s11 = smov 0   ;;  %s7929_s12 = smov 0  }
  0x13 LB: > { %8937 = sst [smem:[#allocation27_spill]] %s7831_s30  ;;  %s7944_s13 = sadd.s32 4294967295, %s7843_s12   ;;  %s7843_s12 = sphi %s7929_s12, %s8982_s12   ;;  %s7839_s11 = sphi %s7927_s11, %s8984_s11   ;;  %s7835_s10 = sphi %s7925_s10, %s8986_s10   ;;  %s7831_s30 = sphi %s7923_s30, %s8985_s30  }
  0x14   : > { %8938 = sst [smem:[#allocation28_spill]] %s7839_s11  ;;  %s5764_s14 = sadd.s32 4294967294, %s7843_s12  }
  0x15   : > { %8939 = sst [smem:[#allocation29_spill]] %s7944_s13  ;;  %p57_p0 = scmp.ne.s32.totalorder %s7835_s10, %s7831_s30 }
  0x16   : > { %p8902_p1 = scmp.eq.s32.totalorder %s7944_s13, 0  ;;  %p249_p3 = scmp.eq.s32.totalorder %s5764_s14, 1 }
  0x17   : > { %p5765_p5 = scmp.ge.s32.totalorder %s7843_s12, 1  ;;  %p282_p7 = scmp.lt.s32.totalorder %s7843_s12, 3 }
  0x18   : > { %p7953_p4 = por %p8902_p1, %p57_p0  ;;  %p7958_p6 = por %p249_p3, %p57_p0 }
  0x19   : > { %p7963_p8 = pnand %p5765_p5, %p282_p7  ;;  %s7845_s18 = smov [#allocation10]  }
  0x1a   : > { %s8940_s15 = scalar_select %p7953_p4, 1, 0 }
  0x1b   : > { %s8942_s16 = scalar_select %p7958_p6, 1, 0 }
  0x1c   : > { %8941 = sst [smem:[#allocation30_spill]] %s8940_s15  ;;  %s294_s19 = sshll.u32 %s7845_s18, 4  ;;  %s7967_s19 = int_to_ptr.vmem [resolvable:$true] %s294_s19 }
  0x1d   : > { %8943 = sst [smem:[#allocation31_spill]] %s8942_s16  ;;  %p6532_p9 = pneg %p7963_p8 }
  0x1e   : > { %s8944_s17 = scalar_select %p7963_p8, 1, 0 }
  0x1f   : > { %p7974_p11 = pnand %p6532_p9, %p8902_p1  ;;  %s7846_s21 = smov [#allocation11]  }
  0x20   : > { %s307_s22 = sshll.u32 %s7846_s21, 4  ;;  %s8946_s4 = sld [smem:[#allocation36_spill]]  ;;  %s7978_s22 = int_to_ptr.vmem [resolvable:$true] %s307_s22 }
  0x21   : > { %s8945_s20 = scalar_select %p7974_p11, 1, 0 }
  0x22   : > { %p7988_p13 = pneg %p7974_p11 }
  0x24   : > { %s8947_s28 = scalar_select %p7988_p13, 1, 0 }
  0x26   : > { %s7493_s25 = scalar_lea.hbm %s8946_s4, 16384 }
  0x27   : > { %p7494_p12 = scmp.ne.s32.totalorder %s8946_s4, %s7493_s25  ;;  %p7500_p5 = scmp.lt.u32.totalorder %s7493_s25, %s8946_s4 }
  0x29   : > { %p7496_p0 = pnand %p7988_p13, %p7494_p12 }
  0x2b   : > { %p7497_p3 = pneg %p7496_p0 }
  0x2d   : > { %p7502_p7 = pnand %p7500_p5, %p7497_p3 }
  0x2f   : > { %7505 = shalt.err (!%p7502_p7)
}
  0x30   : > { %s7506_s18 = scalar_lea.vmem %s7967_s19, 16384  ;;  %p7514_p2 = scmp.lt.s32.totalorder %s7967_s19, %s7967_s19 }
  0x31   : > { %p7507_p9 = scmp.ne.s32.totalorder %s7967_s19, %s7506_s18  ;;  %p7515_p6 = scmp.lt.s32.totalorder %s7506_s18, %s7506_s18 }
  0x33   : > { %p7509_p10 = pnand %p7507_p9, %p7988_p13  ;;  %p7516_p12 = por %p7515_p6, %p7514_p2 }
  0x35   : > { %p7510_p1 = pneg %p7509_p10 }
  0x37   : > { %p7517_p0 = pnand %p7516_p12, %p7510_p1 }
  0x39   : > { %7520 = shalt.err (!%p7517_p0)
}
  0x3a   : > { %s8905_s21 = smov 256   ;;  %s8907_s23 = smov 16  }
  0x3b   : > { %6535 = dma.hbm_to_vmem [thread:$0]  (!%p7974_p11), %s8946_s4, 16384, %s7967_s19, [#allocation9], %s8905_s21, %s8905_s21, %s8907_s23  }
  0x3c   : > { %s8948_s5 = sld [smem:[#allocation37_spill]] }
  0x42   : > { %s7521_s29 = scalar_lea.hbm %s8948_s5, 16384 }
  0x43   : > { %p7522_p1 = scmp.ne.s32.totalorder %s8948_s5, %s7521_s29  ;;  %p7528_p10 = scmp.lt.u32.totalorder %s7521_s29, %s8948_s5 }
  0x45   : > { %p7524_p2 = pnand %p7522_p1, %p7988_p13 }
  0x47   : > { %p7525_p6 = pneg %p7524_p2 }
  0x49   : > { %p7530_p3 = pnand %p7528_p10, %p7525_p6 }
  0x4b   : > { %7533 = shalt.err (!%p7530_p3)
}
  0x4c   : > { %s7534_s19 = scalar_lea.vmem %s7978_s22, 16384  ;;  %p7542_p12 = scmp.lt.s32.totalorder %s7978_s22, %s7978_s22 }
  0x4d   : > { %p7535_p5 = scmp.ne.s32.totalorder %s7978_s22, %s7534_s19  ;;  %p7543_p0 = scmp.lt.s32.totalorder %s7534_s19, %s7534_s19 }
  0x4f   : > { %p7537_p7 = pnand %p7535_p5, %p7988_p13  ;;  %p7544_p1 = por %p7543_p0, %p7542_p12 }
  0x51   : > { %p7538_p9 = pneg %p7537_p7 }
  0x53   : > { %p7545_p2 = pnand %p7544_p1, %p7538_p9 }
  0x55   : > { %7548 = shalt.err (!%p7545_p2)
}
  0x56   : > { %6538 = dma.hbm_to_vmem [thread:$0]  (!%p7974_p11), %s8948_s5, 16384, %s7978_s22, [#allocation12], %s8905_s21, %s8905_s21, %s8907_s23  }
  0x57   : > { %s8039_s24 = sadd.s32 1, %s7843_s12   ;;  %s44_s25 = sadd.s32 1, %s7839_s11 }
  0x58   : > { %8949 = sst [smem:[#allocation32_spill]] %s8039_s24  ;;  %s41_s26 = ssub.s32 %s7843_s12, %s8039_s24 }
  0x59   : > { %p51_p6 = scmp.ne.s32.totalorder %s7839_s11, %s7835_s10  ;;  %p42_p10 = scmp.eq.s32.totalorder %s41_s26, 0 }
  0x5a   : > { %p52_p3 = scmp.eq.s32.totalorder %s7843_s12, 0  ;;  %p8950_p5 = scmp.eq.s32.totalorder %s7944_s13, 1 }
  0x5b   : > { %p6569_p9 = scmp.lt.s32.totalorder %s7843_s12, 2  ;;  %s8058_s14 = sand.u32 1, %s7839_s11  }
  0x5c   : > { %p8049_p7 = por %p8950_p5, %p51_p6  ;;  %p53_p12 = por %p52_p3, %p51_p6 }
  0x5d   : > { %s8055_s29 = scalar_select %p42_p10, %s7839_s11, %s44_s25  }
  0x5e   : > { %s8951_s27 = scalar_select %p8049_p7, 1, 0 }
  0x5f   : > { %8953 = sst [smem:[#allocation34_spill]] %s8055_s29  ;;  %s8061_s22 = sshll.u32 %s8058_s14, 6 }
  0x60   : > { %8952 = sst [smem:[#allocation33_spill]] %s8951_s27  ;;  %s8064_s18 = sshll.u32 %s7843_s12, 10 }
  0x61   : > { %p8066_p0 = pnand %p6569_p9, %p53_p12  ;;  %s8914_s30 = sand.u32 1, %s7843_s12  }
  0x62   : > { %s8955_s1 = sld [smem:[#allocation35_spill]]  ;;  %s372_s21 = scalar_lea.vmem [#allocation5], %s8061_s22 }
  0x63   : > { %s8954_s19 = scalar_select %p8066_p0, 1, 0 }
  0x64   : > { %s379_s23 = sshll.u32 %s372_s21, 4  ;;  %s8082_s4 = scalar_lea.sflag [#allocation6], %s8914_s30  ;;  %s8078_s23 = int_to_ptr.vmem [resolvable:$true] %s379_s23 }
  0x65   : > { %p8088_p2 = pneg %p8066_p0 }
  0x67   : > { %s8956_s29 = scalar_select %p8088_p2, 1, 0 }
  0x68   : > { %s8075_s25 = scalar_lea.hbm %s8955_s1, %s8064_s18  ;;  %s7554_s21 = scalar_lea.hbm %s8955_s1, 2048 }
  0x69   : > { %s7549_s5 = scalar_lea.hbm %s8075_s25, 1024  ;;  %p7555_p3 = scmp.lt.u32.totalorder %s8075_s25, %s8955_s1 }
  0x6a   : > { %p7550_p1 = scmp.ne.s32.totalorder %s8075_s25, %s7549_s5  ;;  %p7556_p5 = scmp.lt.u32.totalorder %s7554_s21, %s7549_s5 }
  0x6b   : > { %p7558_p12 = scmp.lt.u32.totalorder %s7549_s5, %s8075_s25 }
  0x6c   : > { %p7552_p6 = pnand %p8088_p2, %p7550_p1  ;;  %p7557_p9 = por %p7556_p5, %p7555_p3 }
  0x6e   : > { %p7553_p10 = pneg %p7552_p6  ;;  %p7559_p7 = por %p7558_p12, %p7557_p9 }
  0x70   : > { %p7560_p4 = pnand %p7559_p7, %p7553_p10 }
  0x72   : > { %7563 = shalt.err (!%p7560_p4)
}
  0x73   : > { %s7564_s30 = scalar_lea.vmem %s8078_s23, 1024  ;;  %s7849_s16 = smov [#allocation5]  }
  0x74   : > { %p7565_p1 = scmp.ne.s32.totalorder %s8078_s23, %s7564_s30  ;;  %s7569_s26 = sshll.u32 %s7849_s16, 4  ;;  %s7570_s26 = int_to_ptr.vmem [resolvable:$false] %s7569_s26 }
  0x75   : > { %s7571_s11 = scalar_lea.vmem %s7570_s26, 2048  ;;  %p7572_p11 = scmp.lt.s32.totalorder %s8078_s23, %s7570_s26 }
  0x76   : > { %p7567_p6 = pnand %p7565_p1, %p8088_p2  ;;  %p7573_p13 = scmp.lt.s32.totalorder %s7571_s11, %s7564_s30 }
  0x78   : > { %p7568_p8 = pneg %p7567_p6  ;;  %p7574_p3 = por %p7573_p13, %p7572_p11 }
  0x7a   : > { %p7575_p5 = pnand %p7574_p3, %p7568_p8 }
  0x7c   : > { %7578 = shalt.err (!%p7575_p5)
}
  0x7d   : > { %s7850_s5 = smov 512   ;;  %s7851_s24 = smov 32  }
  0x7e   : > { %6551 = dma.hbm_to_vmem [thread:$0]  (!%p8066_p0), %s8075_s25, 1024, %s8078_s23, %s8082_s4, %s7850_s5, %s7850_s5, %s7851_s24  }
  0x7f   : > { %s7852_s21 = smov [#allocation13]   ;;  %s7853_s26 = smov [#allocation14]  }
  0x80   : > { %s320_s16 = sshll.u32 %s7852_s21, 4  ;;  %s333_s30 = sshll.u32 %s7853_s26, 4  ;;  %s321_s16 = int_to_ptr.vmem [resolvable:$true] %s320_s16  ;;  %s334_s30 = int_to_ptr.vmem [resolvable:$true] %s333_s30 }
  0x81   : > { %s7579_s8 = scalar_lea.hbm %s8898_s6, 16384  ;;  %p8957_p8 = scmp.ne.s32.totalorder %s8947_s28, 0 }
  0x82   : > { %p7580_p4 = scmp.ne.s32.totalorder %s8898_s6, %s7579_s8  ;;  %p7586_p7 = scmp.lt.u32.totalorder %s7579_s8, %s8898_s6 }
  0x84   : > { %p7582_p11 = pnand %p7580_p4, %p8957_p8 }
  0x86   : > { %p7583_p13 = pneg %p7582_p11 }
  0x88   : > { %p7588_p10 = pnand %p7586_p7, %p7583_p13 }
  0x8a   : > { %7591 = shalt.err (!%p7588_p10)
}
  0x8b   : > { %s7592_s23 = scalar_lea.vmem %s321_s16, 16384  ;;  %p7600_p6 = scmp.lt.s32.totalorder %s321_s16, %s321_s16 }
  0x8c   : > { %p7593_p9 = scmp.ne.s32.totalorder %s321_s16, %s7592_s23  ;;  %p7601_p3 = scmp.lt.s32.totalorder %s7592_s23, %s7592_s23 }
  0x8e   : > { %p7595_p12 = pnand %p7593_p9, %p8957_p8  ;;  %p7602_p5 = por %p7601_p3, %p7600_p6 }
  0x90   : > { %p7596_p1 = pneg %p7595_p12 }
  0x92   : > { %p7603_p0 = pnand %p7602_p5, %p7596_p1 }
  0x94   : > { %7606 = shalt.err (!%p7603_p0)
}
  0x95   : > { %p8958_p4 = scmp.ne.s32.totalorder %s8945_s20, 0  ;;  %s8959_s1 = smov 16  }
  0x96   : > { %s8960_s9 = smov 256   ;;  %s7607_s25 = scalar_lea.hbm %s8899_s7, 16384 }
  0x97   : > { %6541 = dma.hbm_to_vmem [thread:$0]  (!%p8958_p4), %s8898_s6, 16384, %s321_s16, [#allocation12], %s8960_s9, %s8960_s9, %s8959_s1  }
  0x98   : > { %p7608_p11 = scmp.ne.s32.totalorder %s8899_s7, %s7607_s25  ;;  %p7614_p7 = scmp.lt.u32.totalorder %s7607_s25, %s8899_s7 }
  0x9a   : > { %p7610_p0 = pnand %p7608_p11, %p8957_p8 }
  0x9c   : > { %p7611_p13 = pneg %p7610_p0 }
  0x9e   : > { %p7616_p10 = pnand %p7614_p7, %p7611_p13 }
  0xa0   : > { %7619 = shalt.err (!%p7616_p10)
}
  0xa1   : > { %s7620_s13 = scalar_lea.vmem %s334_s30, 16384  ;;  %p7628_p6 = scmp.lt.s32.totalorder %s334_s30, %s334_s30 }
  0xa2   : > { %p7621_p9 = scmp.ne.s32.totalorder %s334_s30, %s7620_s13  ;;  %p7629_p3 = scmp.lt.s32.totalorder %s7620_s13, %s7620_s13 }
  0xa4   : > { %p7623_p12 = pnand %p7621_p9, %p8957_p8  ;;  %p7630_p5 = por %p7629_p3, %p7628_p6 }
  0xa6   : > { %p7624_p1 = pneg %p7623_p12 }
  0xa8   : > { %p7631_p2 = pnand %p7630_p5, %p7624_p1 }
  0xaa   : > { %7634 = shalt.err (!%p7631_p2)
}
  0xab   : > { %6544 = dma.hbm_to_vmem [thread:$0]  (!%p8958_p4), %s8899_s7, 16384, %s334_s30, [#allocation15], %s8960_s9, %s8960_s9, %s8959_s1  }
  0xac   : > { %s8161_s27 = scalar_lea.hbm %s8892_s0, %s8064_s18  ;;  %s351_s20 = scalar_lea.vmem [#allocation2], %s8061_s22 }
  0xad   : > { %s358_s25 = sshll.u32 %s351_s20, 4  ;;  %s8170_s11 = scalar_lea.hbm %s8894_s2, %s8064_s18  ;;  %s8164_s25 = int_to_ptr.vmem [resolvable:$true] %s358_s25 }
  0xae   : > { %s348_s23 = scalar_lea.sflag [#allocation3], %s8058_s14  ;;  %s7635_s30 = scalar_lea.hbm %s8161_s27, 1024 }
  0xaf   : > { %p7636_p2 = scmp.ne.s32.totalorder %s8161_s27, %s7635_s30  ;;  %p8961_p8 = scmp.ne.s32.totalorder %s8956_s29, 0 }
  0xb0   : > { %s7640_s13 = scalar_lea.hbm %s8892_s0, 2048  ;;  %p7641_p0 = scmp.lt.u32.totalorder %s8161_s27, %s8892_s0 }
  0xb1   : > { %p7638_p4 = pnand %p7636_p2, %p8961_p8  ;;  %p7642_p13 = scmp.lt.u32.totalorder %s7640_s13, %s7635_s30 }
  0xb2   : > { %p7644_p10 = scmp.lt.u32.totalorder %s7635_s30, %s8161_s27 }
  0xb3   : > { %p7639_p11 = pneg %p7638_p4  ;;  %p7643_p7 = por %p7642_p13, %p7641_p0 }
  0xb5   : > { %p7645_p9 = por %p7644_p10, %p7643_p7 }
  0xb7   : > { %p7646_p12 = pnand %p7645_p9, %p7639_p11 }
  0xb9   : > { %7649 = shalt.err (!%p7646_p12)
}
  0xba   : > { %s7650_s18 = scalar_lea.vmem %s8164_s25, 1024  ;;  %s7854_s28 = smov [#allocation2]  }
  0xbb   : > { %p7651_p1 = scmp.ne.s32.totalorder %s8164_s25, %s7650_s18  ;;  %s7655_s15 = sshll.u32 %s7854_s28, 4  ;;  %s7656_s15 = int_to_ptr.vmem [resolvable:$false] %s7655_s15 }
  0xbc   : > { %s7657_s20 = scalar_lea.vmem %s7656_s15, 2048  ;;  %p7658_p5 = scmp.lt.s32.totalorder %s8164_s25, %s7656_s15 }
  0xbd   : > { %p7653_p6 = pnand %p7651_p1, %p8961_p8  ;;  %p7659_p2 = scmp.lt.s32.totalorder %s7657_s20, %s7650_s18 }
  0xbf   : > { %p7654_p3 = pneg %p7653_p6  ;;  %p7660_p4 = por %p7659_p2, %p7658_p5 }
  0xc1   : > { %p7661_p0 = pnand %p7660_p4, %p7654_p3 }
  0xc3   : > { %7664 = shalt.err (!%p7661_p0)
}
  0xc4   : > { %p8962_p11 = scmp.ne.s32.totalorder %s8954_s19, 0  ;;  %s393_s21 = scalar_lea.vmem [#allocation7], %s8061_s22 }
  0xc5   : > { %s400_s26 = sshll.u32 %s393_s21, 4  ;;  %s5780_s30 = sshll.u32 %s8058_s14, 4  ;;  %s8201_s26 = int_to_ptr.vmem [resolvable:$true] %s400_s26 }
  0xc6   : > { %6548 = dma.hbm_to_vmem [thread:$0]  (!%p8962_p11), %s8161_s27, 1024, %s8164_s25, %s348_s23, %s7850_s5, %s7850_s5, %s7851_s24  }
  0xc7   : > { %s7665_s1 = scalar_lea.hbm %s8170_s11, 1024  ;;  %s7670_s16 = scalar_lea.hbm %s8894_s2, 2048 }
  0xc8   : > { %p7666_p13 = scmp.ne.s32.totalorder %s8170_s11, %s7665_s1  ;;  %p7671_p9 = scmp.lt.u32.totalorder %s8170_s11, %s8894_s2 }
  0xc9   : > { %p7672_p12 = scmp.lt.u32.totalorder %s7670_s16, %s7665_s1  ;;  %p7674_p6 = scmp.lt.u32.totalorder %s7665_s1, %s8170_s11 }
  0xca   : > { %p7668_p7 = pnand %p7666_p13, %p8961_p8 }
  0xcb   : > { %p7673_p1 = por %p7672_p12, %p7671_p9 }
  0xcc   : > { %p7669_p10 = pneg %p7668_p7 }
  0xcd   : > { %p7675_p3 = por %p7674_p6, %p7673_p1 }
  0xcf   : > { %p7676_p5 = pnand %p7675_p3, %p7669_p10 }
  0xd1   : > { %7679 = shalt.err (!%p7676_p5)
}
  0xd2   : > { %s7680_s22 = scalar_lea.vmem %s8201_s26, 1024  ;;  %s7855_s27 = smov [#allocation7]  }
  0xd3   : > { %p7681_p2 = scmp.ne.s32.totalorder %s8201_s26, %s7680_s22  ;;  %s7685_s25 = sshll.u32 %s7855_s27, 4  ;;  %s7686_s25 = int_to_ptr.vmem [resolvable:$false] %s7685_s25 }
  0xd4   : > { %s7687_s23 = scalar_lea.vmem %s7686_s25, 2048  ;;  %p7688_p13 = scmp.lt.s32.totalorder %s8201_s26, %s7686_s25 }
  0xd5   : > { %p7683_p4 = pnand %p7681_p2, %p8961_p8  ;;  %p7689_p7 = scmp.lt.s32.totalorder %s7687_s23, %s7680_s22 }
  0xd7   : > { %p7684_p0 = pneg %p7683_p4  ;;  %p7690_p9 = por %p7689_p7, %p7688_p13 }
  0xd9   : > { %p7691_p12 = pnand %p7690_p9, %p7684_p0 }
  0xdb   : > { %7694 = shalt.err (!%p7691_p12)
}
  0xdc   : > { %6554 = dma.hbm_to_vmem [thread:$0]  (!%p8962_p11), %s8170_s11, 1024, %s8201_s26, %s8082_s4, %s7850_s5, %s7850_s5, %s7851_s24  }
  0xdd   : > { %s6333_s28 = sshll.u32 %s7843_s12, 8  ;;  %s414_s15 = scalar_lea.vmem [#allocation8], %s5780_s30 }
  0xde   : > { %s421_s20 = sshll.u32 %s414_s15, 4  ;;  %s8234_s9 = scalar_lea.hbm %s8895_s3, %s6333_s28  ;;  %s8236_s20 = int_to_ptr.vmem [resolvable:$true] %s421_s20 }
  0xdf   : > { %s8963_s13 = sand.u32 1, %s7843_s12   ;;  %s7695_s8 = scalar_lea.hbm %s8234_s9, 256 }
  0xe0   : > { %s8240_s16 = scalar_lea.sflag [#allocation9], %s8963_s13  ;;  %p7696_p10 = scmp.ne.s32.totalorder %s8234_s9, %s7695_s8 }
  0xe1   : > { %s7700_s5 = scalar_lea.hbm %s8895_s3, 512  ;;  %p7701_p3 = scmp.lt.u32.totalorder %s8234_s9, %s8895_s3 }
  0xe2   : > { %p7698_p1 = pnand %p7696_p10, %p8961_p8  ;;  %p7702_p5 = scmp.lt.u32.totalorder %s7700_s5, %s7695_s8 }
  0xe3   : > { %p7704_p4 = scmp.lt.u32.totalorder %s7695_s8, %s8234_s9 }
  0xe4   : > { %p7699_p6 = pneg %p7698_p1  ;;  %p7703_p2 = por %p7702_p5, %p7701_p3 }
  0xe6   : > { %p7705_p0 = por %p7704_p4, %p7703_p2 }
  0xe8   : > { %p7706_p13 = pnand %p7705_p0, %p7699_p6 }
  0xea   : > { %7709 = shalt.err (!%p7706_p13)
}
  0xeb   : > { %s7710_s26 = scalar_lea.vmem %s8236_s20, 256  ;;  %s7856_s30 = smov [#allocation8]  }
  0xec   : > { %p7711_p7 = scmp.ne.s32.totalorder %s8236_s20, %s7710_s26  ;;  %s7715_s18 = sshll.u32 %s7856_s30, 4  ;;  %s7716_s18 = int_to_ptr.vmem [resolvable:$false] %s7715_s18 }
  0xed   : > { %s7717_s22 = scalar_lea.vmem %s7716_s18, 512  ;;  %p7718_p10 = scmp.lt.s32.totalorder %s8236_s20, %s7716_s18 }
  0xee   : > { %p7713_p9 = pnand %p7711_p7, %p8961_p8  ;;  %p7719_p1 = scmp.lt.s32.totalorder %s7717_s22, %s7710_s26 }
  0xf0   : > { %p7714_p12 = pneg %p7713_p9  ;;  %p7720_p3 = por %p7719_p1, %p7718_p10 }
  0xf2   : > { %p7721_p5 = pnand %p7720_p3, %p7714_p12 }
  0xf4   : > { %7724 = shalt.err (!%p7721_p5)
}
  0xf5   : > { %s7857_s27 = smov 128   ;;  %s7858_s25 = smov 8  }
  0xf6   : > { %6557 = dma.hbm_to_vmem [thread:$0]  (!%p8962_p11), %s8234_s9, 256, %s8236_s20, %s8240_s16, %s7857_s27, %s7857_s27, %s7858_s25  }
  0xf7   : > { %p8964_p8 = scmp.ne.s32.totalorder %s8944_s17, 0 }
  0xf8   : > { %s8965_s29 = sld [smem:[#allocation30_spill]] (!%p8964_p8)  ;;  %s8267_s23 = sand.u32 (!%p8964_p8), 1, %s7835_s10  }
  0xf9   : > { %433 = sbr.rel (%p8964_p8) target bundleno = 2392 (0x958), region = 52  ;;  %s8270_s28 = sshll.u32 (!%p8964_p8), %s8267_s23, 6 }
  0xfa   : > { %s436_s15 = scalar_lea.sflag (!%p8964_p8), [#allocation3], %s8267_s23  ;;  %s8274_s21 = scalar_lea.vmem (!%p8964_p8), [#allocation2], %s8270_s28 }
  0xfe   : > { %p8966_p6 = scmp.ne.s32.totalorder (!%p8964_p8), %s8965_s29, 0 }
 0x100   : > { %7798 = dma.done.wait (%p8966_p6), %s436_s15, 1024  }
 0x101   : > { %7800 = vsyncadd (%p8966_p6), %s436_s15, 4294966272  ;;  %s8967_s19 = sld [smem:[#allocation29_spill]]  ;;  %s8282_s1 = scalar_lea.vmem [#allocation5], %s8270_s28 }
 0x107   : > { %s444_s17 = sand.u32 1, %s8967_s19  }
 0x108   : > { %s445_s20 = scalar_lea.sflag [#allocation6], %s444_s17 }
 0x109   : > { %7802 = dma.done.wait (%p8966_p6), %s445_s20, 2048  }
 0x10a   : > { %7804 = vsyncadd (%p8966_p6), %s445_s20, 4294965248  ;;  %s5787_s9 = sshll.u32 %s8267_s23, 4  ;;  %s8290_s13 = scalar_lea.vmem [#allocation7], %s8270_s28 }
 0x10b   : > { %s463_s16 = scalar_lea.sflag [#allocation9], %s444_s17  ;;  %s8294_s8 = scalar_lea.vmem [#allocation8], %s5787_s9 }
 0x10c   : > { %7806 = dma.done.wait (%p8966_p6), %s463_s16, 256  }
 0x10d   : > { %7808 = vsyncadd (%p8966_p6), %s463_s16, 4294967040  ;;  %p8968_p11 = scmp.eq.s32.totalorder %s8967_s19, 0 }
 0x10f   : > { %7810 = dma.done.wait (%p8968_p11), [#allocation9], 16384   ;;  %p8969_p2 = pmov %p8968_p11 }
 0x111   : > { %7812 = vsyncadd (%p8969_p2), [#allocation9], 4294950912  ;;  %p8970_p4 = pmov %p8969_p2 }
 0x112   : > { %p8971_p0 = pmov %p8969_p2 }
 0x113   : > { %7814 = dma.done.wait (%p8970_p4), [#allocation12], 32768  }
 0x114   : > { %7816 = vsyncadd (%p8971_p0), [#allocation12], 4294934528  ;;  %p8972_p13 = pmov %p8971_p0 }
 0x115   : > { %p8973_p7 = pmov %p8971_p0 }
 0x116   : > { %7818 = dma.done.wait (%p8972_p13), [#allocation15], 16384  }
 0x117   : > { %7820 = vsyncadd (%p8973_p7), [#allocation15], 4294950912  ;;  %v6649_v0 = vld [vmem:[#allocation10 + $0x4] ss:$16 sps:$4 sm:$0xff]   ;;  %v6651_v1 = vld [vmem:[#allocation10] ss:$16 sps:$4 sm:$0xff]  }
 0x118   : > { %1344 = vmatprep.subr.bf16.mxu0 %v6649_v0  ;;  %v6652_v2 = vld [vmem:[#allocation10 + $0xc] ss:$16 sps:$4 sm:$0xff]   ;;  %v6654_v3 = vld [vmem:[#allocation10 + $0x8] ss:$16 sps:$4 sm:$0xff]   ;;  %v6655_v4 = vld [vmem:[#allocation10 + $0x24] ss:$16 sps:$4 sm:$0xff]  }
 0x119   : > { %1345 = vmatpush1.bf16.msra.mxu0 %v6651_v1  ;;  %v6657_v5 = vld [vmem:[#allocation10 + $0x20] ss:$16 sps:$4 sm:$0xff]   ;;  %1430 = vmatprep.subr.bf16.mxu1 %v6652_v2  ;;  %v6658_v6 = vld [vmem:[#allocation10 + $0x2c] ss:$16 sps:$4 sm:$0xff]   ;;  %v6660_v7 = vld [vmem:[#allocation10 + $0x28] ss:$16 sps:$4 sm:$0xff]  }
 0x11a   : > { %1431 = vmatpush1.bf16.msra.mxu1 %v6654_v3  ;;  %1346 = vmatprep.subr.bf16.mxu0 %v6655_v4  ;;  %v6661_v8 = vld [vmem:[#allocation10 + $0x44] ss:$16 sps:$4 sm:$0xff]   ;;  %v6663_v9 = vld [vmem:[#allocation10 + $0x40] ss:$16 sps:$4 sm:$0xff]   ;;  %v6664_v10 = vld [vmem:[#allocation10 + $0x4c] ss:$16 sps:$4 sm:$0xff]  }
 0x11b   : > { %1432 = vmatprep.subr.bf16.mxu1 %v6658_v6  ;;  %v6667_v11 = vld [vmem:[#allocation10 + $0x64] ss:$16 sps:$4 sm:$0xff]   ;;  %v6666_v12 = vld [vmem:[#allocation10 + $0x48] ss:$16 sps:$4 sm:$0xff]   ;;  %v6670_v13 = vld [vmem:[#allocation10 + $0x6c] ss:$16 sps:$4 sm:$0xff]  }
 0x11c   : > { %v6669_v14 = vld [vmem:[#allocation10 + $0x60] ss:$16 sps:$4 sm:$0xff]   ;;  %v6673_v15 = vld [vmem:[#allocation10 + $0x84] ss:$16 sps:$4 sm:$0xff]   ;;  %v6672_v16 = vld [vmem:[#allocation10 + $0x68] ss:$16 sps:$4 sm:$0xff]  }
 0x11d   : > { %1347 = vmatpush1.bf16.msra.mxu0 %v6657_v5  ;;  %v6676_v17 = vld [vmem:[#allocation10 + $0x8c] ss:$16 sps:$4 sm:$0xff]   ;;  %v6675_v18 = vld [vmem:[#allocation10 + $0x80] ss:$16 sps:$4 sm:$0xff]   ;;  %v6679_v19 = vld [vmem:[#allocation10 + $0xa4] ss:$16 sps:$4 sm:$0xff]  }
 0x11e   : > { %1348 = vmatprep.subr.bf16.mxu0 %v6661_v8  ;;  %1433 = vmatpush1.bf16.msra.mxu1 %v6660_v7  ;;  %v6678_v20 = vld [vmem:[#allocation10 + $0x88] ss:$16 sps:$4 sm:$0xff]   ;;  %v6682_v21 = vld [vmem:[#allocation10 + $0xac] ss:$16 sps:$4 sm:$0xff]   ;;  %v6681_v22 = vld [vmem:[#allocation10 + $0xa0] ss:$16 sps:$4 sm:$0xff]  }
 0x11f   : > { %1434 = vmatprep.subr.bf16.mxu1 %v6664_v10  ;;  %v6685_v23 = vld [vmem:[#allocation10 + $0xc4] ss:$16 sps:$4 sm:$0xff]   ;;  %v6684_v24 = vld [vmem:[#allocation10 + $0xa8] ss:$16 sps:$4 sm:$0xff]   ;;  %v6688_v25 = vld [vmem:[#allocation10 + $0xcc] ss:$16 sps:$4 sm:$0xff]  }
 0x120   : > { %v6687_v26 = vld [vmem:[#allocation10 + $0xc0] ss:$16 sps:$4 sm:$0xff]   ;;  %v6691_v27 = vld [vmem:[#allocation10 + $0xe4] ss:$16 sps:$4 sm:$0xff]   ;;  %v6690_v28 = vld [vmem:[#allocation10 + $0xc8] ss:$16 sps:$4 sm:$0xff]  }
 0x121   : > { %1349 = vmatpush1.bf16.msra.mxu0 %v6663_v9  ;;  %v6694_v29 = vld [vmem:[#allocation10 + $0xec] ss:$16 sps:$4 sm:$0xff]   ;;  %v6693_v30 = vld [vmem:[#allocation10 + $0xe0] ss:$16 sps:$4 sm:$0xff]   ;;  %v6697_v31 = vld [vmem:[#allocation10 + $0x104] ss:$16 sps:$4 sm:$0xff]  }
 0x122   : > { %1350 = vmatprep.subr.bf16.mxu0 %v6667_v11  ;;  %1435 = vmatpush1.bf16.msra.mxu1 %v6666_v12  ;;  %v6696_v32 = vld [vmem:[#allocation10 + $0xe8] ss:$16 sps:$4 sm:$0xff]   ;;  %v6700_v33 = vld [vmem:[#allocation10 + $0x10c] ss:$16 sps:$4 sm:$0xff]   ;;  %v6699_v34 = vld [vmem:[#allocation10 + $0x100] ss:$16 sps:$4 sm:$0xff]  }
 0x123   : > { %1436 = vmatprep.subr.bf16.mxu1 %v6670_v13  ;;  %v6703_v35 = vld [vmem:[#allocation10 + $0x124] ss:$16 sps:$4 sm:$0xff]   ;;  %v6702_v36 = vld [vmem:[#allocation10 + $0x108] ss:$16 sps:$4 sm:$0xff]   ;;  %v6706_v37 = vld [vmem:[#allocation10 + $0x12c] ss:$16 sps:$4 sm:$0xff]  }
 0x124   : > { %v6705_v38 = vld [vmem:[#allocation10 + $0x120] ss:$16 sps:$4 sm:$0xff]   ;;  %v6709_v39 = vld [vmem:[#allocation10 + $0x144] ss:$16 sps:$4 sm:$0xff]   ;;  %v6708_v40 = vld [vmem:[#allocation10 + $0x128] ss:$16 sps:$4 sm:$0xff]  }
 0x125   : > { %1351 = vmatpush1.bf16.msra.mxu0 %v6669_v14  ;;  %v6712_v41 = vld [vmem:[#allocation10 + $0x14c] ss:$16 sps:$4 sm:$0xff]   ;;  %v6711_v42 = vld [vmem:[#allocation10 + $0x140] ss:$16 sps:$4 sm:$0xff]   ;;  %v6715_v43 = vld [vmem:[#allocation10 + $0x164] ss:$16 sps:$4 sm:$0xff]  }
 0x126   : > { %1352 = vmatprep.subr.bf16.mxu0 %v6673_v15  ;;  %1437 = vmatpush1.bf16.msra.mxu1 %v6672_v16  ;;  %v6714_v44 = vld [vmem:[#allocation10 + $0x148] ss:$16 sps:$4 sm:$0xff]   ;;  %v6717_v45 = vld [vmem:[#allocation10 + $0x160] ss:$16 sps:$4 sm:$0xff]   ;;  %v6718_v46 = vld [vmem:[#allocation10 + $0x16c] ss:$16 sps:$4 sm:$0xff]  }
 0x127   : > { %1438 = vmatprep.subr.bf16.mxu1 %v6676_v17  ;;  %v539_v47 = vld [vmem:[%s8274_s21 + $0x8] sm:$0xff]  ;;  %v6721_v49 = vld [vmem:[#allocation10 + $0x184] ss:$16 sps:$4 sm:$0xff]   ;;  %v6723_v53 = vld [vmem:[#allocation10 + $0x180] ss:$16 sps:$4 sm:$0xff]   ;;  %vm7860_vm0 = vmmov 0  }
 0x128   : > { %v543_v48 = vld [vmem:[%s8274_s21 + $0x28] sm:$0xff]  ;;  %v6727_v54 = vld [vmem:[#allocation10 + $0x1a4] ss:$16 sps:$4 sm:$0xff]   ;;  %v6729_v57 = vld [vmem:[#allocation10 + $0x1a0] ss:$16 sps:$4 sm:$0xff]   ;;  %vm3403_vm1 = vcmask 523264  }
 0x129   : > { %1353 = vmatpush1.bf16.msra.mxu0 %v6675_v18  ;;  %v547_v50 = vpack.c.bf16 %v543_v48, %v539_v47  ;;  %v6720_v51 = vld [vmem:[#allocation10 + $0x168] ss:$16 sps:$4 sm:$0xff]   ;;  %v6724_v52 = vld [vmem:[#allocation10 + $0x18c] ss:$16 sps:$4 sm:$0xff]   ;;  %v6733_v58 = vld [vmem:[#allocation10 + $0x1c4] ss:$16 sps:$4 sm:$0xff]  }
 0x12a   : > { %1354 = vmatprep.subr.bf16.mxu0 %v6679_v19  ;;  %1439 = vmatpush1.bf16.msra.mxu1 %v6678_v20  ;;  %v6726_v55 = vld [vmem:[#allocation10 + $0x188] ss:$16 sps:$4 sm:$0xff]   ;;  %v6730_v56 = vld [vmem:[#allocation10 + $0x1ac] ss:$16 sps:$4 sm:$0xff]   ;;  %v6735_v61 = vld [vmem:[#allocation10 + $0x1c0] ss:$16 sps:$4 sm:$0xff]  }
 0x12b   : > { %1440 = vmatprep.subr.bf16.mxu1 %v6682_v21  ;;  %1376 = vmatprep.mubr.bf16.mxu0 %v547_v50  ;;  %v6732_v59 = vld [vmem:[#allocation10 + $0x1a8] ss:$16 sps:$4 sm:$0xff]   ;;  %v6736_v60 = vld [vmem:[#allocation10 + $0x1cc] ss:$16 sps:$4 sm:$0xff]   ;;  %v6739_v62 = vld [vmem:[#allocation10 + $0x1e4] ss:$16 sps:$4 sm:$0xff]  }
 0x12c   : > { %1462 = vmatprep.mubr.bf16.mxu1 %v547_v50  ;;  %v6738_v63 = vld [vmem:[#allocation10 + $0x1c8] ss:$16 sps:$4 sm:$0xff]   ;;  %v6741_v0 = vld [vmem:[#allocation10 + $0x1e0] ss:$16 sps:$4 sm:$0xff]   ;;  %v6742_v1 = vld [vmem:[#allocation10 + $0x1ec] ss:$16 sps:$4 sm:$0xff]  }
 0x12d   : > { %1355 = vmatpush1.bf16.msra.mxu0 %v6681_v22  ;;  %v538_v2 = vld [vmem:[%s8274_s21] sm:$0xff]  ;;  %v6744_v5 = vld [vmem:[#allocation10 + $0x1e8] ss:$16 sps:$4 sm:$0xff]   ;;  %v6750_v7 = vld [vmem:[#allocation10 + $0x20c] ss:$16 sps:$4 sm:$0xff]   ;;  %s7861_s4 = smov 64  }
 0x12e   : > { %1356 = vmatprep.subr.bf16.mxu0 %v6685_v23  ;;  %1441 = vmatpush1.bf16.msra.mxu1 %v6684_v24  ;;  %v542_v3 = vld [vmem:[%s8274_s21 + $0x20] sm:$0xff]  ;;  %v6748_v10 = vld [vmem:[#allocation10 + $0x208] ss:$16 sps:$4 sm:$0xff]   ;;  %v6756_v11 = vld [vmem:[#allocation10 + $0x22c] ss:$16 sps:$4 sm:$0xff]   ;;  %vm3455_vm4 = vcmask 130048  }
 0x12f   : > { %1442 = vmatprep.subr.bf16.mxu1 %v6688_v25  ;;  %v6747_v4 = vld [vmem:[#allocation10 + $0x204] ss:$16 sps:$4 sm:$0xff]   ;;  %v546_v6 = vpack.c.bf16 %v542_v3, %v538_v2  ;;  %v6745_v8 = vld [vmem:[#allocation10 + $0x200] ss:$16 sps:$4 sm:$0xff]   ;;  %v6754_v14 = vld [vmem:[#allocation10 + $0x228] ss:$16 sps:$4 sm:$0xff]  }
 0x130   : > { %v6753_v9 = vld [vmem:[#allocation10 + $0x224] ss:$16 sps:$4 sm:$0xff]   ;;  %v6751_v12 = vld [vmem:[#allocation10 + $0x220] ss:$16 sps:$4 sm:$0xff]   ;;  %v6762_v15 = vld [vmem:[#allocation10 + $0x24c] ss:$16 sps:$4 sm:$0xff]  }
 0x131   : > { %1357 = vmatpush1.bf16.msra.mxu0 %v6687_v26  ;;  %v6759_v13 = vld [vmem:[#allocation10 + $0x244] ss:$16 sps:$4 sm:$0xff]   ;;  %v6757_v16 = vld [vmem:[#allocation10 + $0x240] ss:$16 sps:$4 sm:$0xff]   ;;  %v6760_v18 = vld [vmem:[#allocation10 + $0x248] ss:$16 sps:$4 sm:$0xff]  }
 0x132   : > { %1358 = vmatprep.subr.bf16.mxu0 %v6691_v27  ;;  %1443 = vmatpush1.bf16.msra.mxu1 %v6690_v28  ;;  %v6765_v17 = vld [vmem:[#allocation10 + $0x264] ss:$16 sps:$4 sm:$0xff]   ;;  %v6768_v19 = vld [vmem:[#allocation10 + $0x26c] ss:$16 sps:$4 sm:$0xff]   ;;  %v6763_v20 = vld [vmem:[#allocation10 + $0x260] ss:$16 sps:$4 sm:$0xff]  }
 0x133   : > { %1444 = vmatprep.subr.bf16.mxu1 %v6694_v29  ;;  %v6771_v21 = vld [vmem:[#allocation10 + $0x284] ss:$16 sps:$4 sm:$0xff]   ;;  %v6766_v22 = vld [vmem:[#allocation10 + $0x268] ss:$16 sps:$4 sm:$0xff]   ;;  %v6774_v23 = vld [vmem:[#allocation10 + $0x28c] ss:$16 sps:$4 sm:$0xff]  }
 0x134   : > { %v6769_v24 = vld [vmem:[#allocation10 + $0x280] ss:$16 sps:$4 sm:$0xff]   ;;  %v6777_v25 = vld [vmem:[#allocation10 + $0x2a4] ss:$16 sps:$4 sm:$0xff]   ;;  %v6772_v26 = vld [vmem:[#allocation10 + $0x288] ss:$16 sps:$4 sm:$0xff]  }
 0x135   : > { %1359 = vmatpush1.bf16.msra.mxu0 %v6693_v30  ;;  %v6780_v27 = vld [vmem:[#allocation10 + $0x2ac] ss:$16 sps:$4 sm:$0xff]   ;;  %v6775_v28 = vld [vmem:[#allocation10 + $0x2a0] ss:$16 sps:$4 sm:$0xff]   ;;  %v6783_v29 = vld [vmem:[#allocation10 + $0x2c4] ss:$16 sps:$4 sm:$0xff]  }
 0x136   : > { %1360 = vmatprep.subr.bf16.mxu0 %v6697_v31  ;;  %1445 = vmatpush1.bf16.msra.mxu1 %v6696_v32  ;;  %v6778_v30 = vld [vmem:[#allocation10 + $0x2a8] ss:$16 sps:$4 sm:$0xff]   ;;  %v6786_v31 = vld [vmem:[#allocation10 + $0x2cc] ss:$16 sps:$4 sm:$0xff]   ;;  %v6799_v47 = vld [vmem:[#allocation10 + $0x320] ss:$16 sps:$4 sm:$0xff]  }
 0x137   : > { %1446 = vmatprep.subr.bf16.mxu1 %v6700_v33  ;;  %v541_v32 = vld [vmem:[%s8274_s21 + $0x18] sm:$0xff]  ;;  %v6781_v33 = vld [vmem:[#allocation10 + $0x2c0] ss:$16 sps:$4 sm:$0xff]   ;;  %v6807_v48 = vld [vmem:[#allocation10 + $0x344] ss:$16 sps:$4 sm:$0xff]   ;;  %s7862_s14 = smov 16  }
 0x138   : > { %v6810_v50 = vld [vmem:[#allocation10 + $0x34c] ss:$16 sps:$4 sm:$0xff]   ;;  %v6829_v3 = vld [vmem:[#allocation10 + $0x3c0] ss:$16 sps:$4 sm:$0xff]   ;;  %s7863_s5 = smov 32   ;;  %s7864_s24 = smov 48  }
 0x139   : > { %1361 = vmatpush1.bf16.msra.mxu0 %v6699_v34  ;;  %v545_v34 = vld [vmem:[%s8274_s21 + $0x38] sm:$0xff]  ;;  %s7865_s11 = smov 80   ;;  %s7866_s26 = smov 96   ;;  %vm4456_vm5 = vcmask 261120   ;;  %vm4459_vm6 = vcmask 392192   ;;  %vm4464_vm7 = vcmask 654336  }
 0x13a   : > { %1362 = vmatprep.subr.bf16.mxu0 %v6703_v35  ;;  %1447 = vmatpush1.bf16.msra.mxu1 %v6702_v36  ;;  %v6789_v35 = vld [vmem:[#allocation10 + $0x2e4] ss:$16 sps:$4 sm:$0xff]   ;;  %v549_v36 = vpack.c.bf16 %v545_v34, %v541_v32  ;;  %v6834_v2 = vld [vmem:[#allocation10 + $0x3cc] ss:$16 sps:$4 sm:$0xff]   ;;  %s7867_s30 = smov 112   ;;  %vm4467_vm8 = vcmask 785408  }
 0x13b   : > { %1448 = vmatprep.subr.bf16.mxu1 %v6706_v37  ;;  %v6784_v37 = vld [vmem:[#allocation10 + $0x2c8] ss:$16 sps:$4 sm:$0xff]   ;;  %v6870_v32 = vld [vmem:[#allocation11 + $0x8c] ss:$16 sps:$4 sm:$0xff]   ;;  %v6873_v34 = vld [vmem:[#allocation11 + $0xa4] ss:$16 sps:$4 sm:$0xff]  }
 0x13c   : > { %vm4470_vm9 = vcmask 916480   ;;  %s8974_s18 = sld [smem:[#allocation33_spill]]  ;;  %s536_s22 = scalar_lea.vmem [#allocation17], %s5787_s9 }
 0x13d   : > { %1363 = vmatpush1.bf16.msra.mxu0 %v6705_v38  ;;  %v6792_v38 = vld [vmem:[#allocation10 + $0x2ec] ss:$16 sps:$4 sm:$0xff]   ;;  %s5555_s27 = sshll.u32 %s536_s22, 4  ;;  %s6335_s25 = sshll.u32 %s8967_s19, 8  ;;  %s8800_s27 = int_to_ptr.vmem [resolvable:$true] %s5555_s27 }
 0x13e   : > { %1364 = vmatprep.subr.bf16.mxu0 %v6709_v39  ;;  %1449 = vmatpush1.bf16.msra.mxu1 %v6708_v40  ;;  %v6787_v39 = vld [vmem:[#allocation10 + $0x2e0] ss:$16 sps:$4 sm:$0xff]   ;;  %v6795_v40 = vld [vmem:[#allocation10 + $0x304] ss:$16 sps:$4 sm:$0xff]   ;;  %s5526_s20 = scalar_lea.sflag [#allocation18], %s8267_s23  ;;  %s7868_s9 = smov [#allocation17]  }
 0x13f   : > { %1450 = vmatprep.subr.bf16.mxu1 %v6712_v41  ;;  %v6790_v41 = vld [vmem:[#allocation10 + $0x2e8] ss:$16 sps:$4 sm:$0xff]  }
 0x141   : > { %1365 = vmatpush1.bf16.msra.mxu0 %v6711_v42  ;;  %v6798_v42 = vld [vmem:[#allocation10 + $0x30c] ss:$16 sps:$4 sm:$0xff]  }
 0x142   : > { %1366 = vmatprep.subr.bf16.mxu0 %v6715_v43  ;;  %1451 = vmatpush1.bf16.msra.mxu1 %v6714_v44  ;;  %v6793_v43 = vld [vmem:[#allocation10 + $0x300] ss:$16 sps:$4 sm:$0xff]   ;;  %v6801_v44 = vld [vmem:[#allocation10 + $0x324] ss:$16 sps:$4 sm:$0xff]   ;;  %p8976_p12 = scmp.ne.s32.totalorder %s8974_s18, 0 }
 0x143   : > { %1452 = vmatprep.subr.bf16.mxu1 %v6718_v46  ;;  %v6804_v46 = vld [vmem:[#allocation10 + $0x32c] ss:$16 sps:$4 sm:$0xff]  }
 0x145   : > { %1367 = vmatpush1.bf16.msra.mxu0 %v6717_v45  ;;  %v6796_v45 = vld [vmem:[#allocation10 + $0x308] ss:$16 sps:$4 sm:$0xff]  }
 0x146   : > { %1368 = vmatprep.subr.bf16.mxu0 %v6721_v49  ;;  %1453 = vmatpush1.bf16.msra.mxu1 %v6720_v51  ;;  %v6802_v49 = vld [vmem:[#allocation10 + $0x328] ss:$16 sps:$4 sm:$0xff]   ;;  %v6805_v51 = vld [vmem:[#allocation10 + $0x340] ss:$16 sps:$4 sm:$0xff]  }
 0x147   : > { %1454 = vmatprep.subr.bf16.mxu1 %v6724_v52  ;;  %v6813_v52 = vld [vmem:[#allocation10 + $0x364] ss:$16 sps:$4 sm:$0xff]  }
 0x149   : > { %1369 = vmatpush1.bf16.msra.mxu0 %v6723_v53  ;;  %v6808_v53 = vld [vmem:[#allocation10 + $0x348] ss:$16 sps:$4 sm:$0xff]  }
 0x14a   : > { %1370 = vmatprep.subr.bf16.mxu0 %v6727_v54  ;;  %1455 = vmatpush1.bf16.msra.mxu1 %v6726_v55  ;;  %v6816_v54 = vld [vmem:[#allocation10 + $0x36c] ss:$16 sps:$4 sm:$0xff]   ;;  %v6811_v55 = vld [vmem:[#allocation10 + $0x360] ss:$16 sps:$4 sm:$0xff]  }
 0x14b   : > { %1456 = vmatprep.subr.bf16.mxu1 %v6730_v56  ;;  %v6819_v56 = vld [vmem:[#allocation10 + $0x384] ss:$16 sps:$4 sm:$0xff]  }
 0x14d   : > { %1371 = vmatpush1.bf16.msra.mxu0 %v6729_v57  ;;  %v6814_v57 = vld [vmem:[#allocation10 + $0x368] ss:$16 sps:$4 sm:$0xff]  }
 0x14e   : > { %1372 = vmatprep.subr.bf16.mxu0 %v6733_v58  ;;  %1457 = vmatpush1.bf16.msra.mxu1 %v6732_v59  ;;  %v6822_v58 = vld [vmem:[#allocation10 + $0x38c] ss:$16 sps:$4 sm:$0xff]   ;;  %v6817_v59 = vld [vmem:[#allocation10 + $0x380] ss:$16 sps:$4 sm:$0xff]  }
 0x14f   : > { %1458 = vmatprep.subr.bf16.mxu1 %v6736_v60  ;;  %v6825_v60 = vld [vmem:[#allocation10 + $0x3a4] ss:$16 sps:$4 sm:$0xff]  }
 0x151   : > { %1373 = vmatpush1.bf16.msra.mxu0 %v6735_v61  ;;  %v6820_v61 = vld [vmem:[#allocation10 + $0x388] ss:$16 sps:$4 sm:$0xff]  }
 0x152   : > { %1374 = vmatprep.subr.bf16.mxu0 %v6739_v62  ;;  %1459 = vmatpush1.bf16.msra.mxu1 %v6738_v63  ;;  %v6828_v62 = vld [vmem:[#allocation10 + $0x3ac] ss:$16 sps:$4 sm:$0xff]   ;;  %v6823_v63 = vld [vmem:[#allocation10 + $0x3a0] ss:$16 sps:$4 sm:$0xff]  }
 0x153   : > { %1460 = vmatprep.subr.bf16.mxu1 %v6742_v1  ;;  %v6826_v1 = vld [vmem:[#allocation10 + $0x3a8] ss:$16 sps:$4 sm:$0xff]  }
 0x155   : > { %1375 = vmatpush1.bf16.msra.mxu0 %v6741_v0  ;;  %v6831_v0 = vld [vmem:[#allocation10 + $0x3c4] ss:$16 sps:$4 sm:$0xff]  }
 0x156   : > { %1387 = vmatprep.subr.bf16.mxu0 %v6747_v4  ;;  %1461 = vmatpush1.bf16.msra.mxu1 %v6744_v5  ;;  %v6837_v4 = vld [vmem:[#allocation10 + $0x3e4] ss:$16 sps:$4 sm:$0xff]   ;;  %v6832_v5 = vld [vmem:[#allocation10 + $0x3c8] ss:$16 sps:$4 sm:$0xff]  }
 0x157   : > { %1473 = vmatprep.subr.bf16.mxu1 %v6750_v7  ;;  %v6840_v7 = vld [vmem:[#allocation10 + $0x3ec] ss:$16 sps:$4 sm:$0xff]  }
 0x158   : > { %1377 = vmatmul.mubr.bf16.vlgmr.msra.gmra.mrb[0].mxu0 %v546_v6 }
 0x159   : > { %1388 = vmatpush1.bf16.msra.mxu0 %v6745_v8  ;;  %1463 = vmatmul.mubr.bf16.vlgmr.msra.gmra.mrb[0].mxu1 %v546_v6  ;;  %v6835_v6 = vld [vmem:[#allocation10 + $0x3e0] ss:$16 sps:$4 sm:$0xff]  }
 0x15a   : > { %1389 = vmatprep.subr.bf16.mxu0 %v6753_v9  ;;  %1474 = vmatpush1.bf16.msra.mxu1 %v6748_v10  ;;  %v540_v8 = vld [vmem:[%s8274_s21 + $0x10] sm:$0xff] }
 0x15b   : > { %1475 = vmatprep.subr.bf16.mxu1 %v6756_v11  ;;  %1419 = vmatprep.mubr.bf16.mxu0 %v549_v36  ;;  %v544_v9 = vld [vmem:[%s8274_s21 + $0x30] sm:$0xff]  ;;  %v6838_v11 = vld [vmem:[#allocation10 + $0x3e8] ss:$16 sps:$4 sm:$0xff]  }
 0x15c   : > { %1505 = vmatprep.mubr.bf16.mxu1 %v549_v36  ;;  %v6843_v10 = vld [vmem:[#allocation11 + $0x4] ss:$16 sps:$4 sm:$0xff]   ;;  %v6876_v36 = vld [vmem:[#allocation11 + $0xac] ss:$16 sps:$4 sm:$0xff]  }
 0x15d   : > { %1390 = vmatpush1.bf16.msra.mxu0 %v6751_v12  ;;  %v548_v12 = vpack.c.bf16 %v544_v9, %v540_v8  ;;  %v6925_v8 = vld [vmem:[#allocation11 + $0x1c0] ss:$16 sps:$4 sm:$0xff]   ;;  %v6930_v9 = vld [vmem:[#allocation11 + $0x1cc] ss:$16 sps:$4 sm:$0xff]  }
 0x15e   : > { %1391 = vmatprep.subr.bf16.mxu0 %v6759_v13  ;;  %1476 = vmatpush1.bf16.msra.mxu1 %v6754_v14  ;;  %v6846_v13 = vld [vmem:[#allocation11 + $0xc] ss:$16 sps:$4 sm:$0xff]   ;;  %v6841_v14 = vld [vmem:[#allocation11] ss:$16 sps:$4 sm:$0xff]  }
 0x15f   : > { %1477 = vmatprep.subr.bf16.mxu1 %v6762_v15  ;;  %v6849_v15 = vld [vmem:[#allocation11 + $0x24] ss:$16 sps:$4 sm:$0xff]  }
 0x161   : > { %1392 = vmatpush1.bf16.msra.mxu0 %v6757_v16  ;;  %v6844_v16 = vld [vmem:[#allocation11 + $0x8] ss:$16 sps:$4 sm:$0xff]  }
 0x162   : > { %1393 = vmatprep.subr.bf16.mxu0 %v6765_v17  ;;  %1478 = vmatpush1.bf16.msra.mxu1 %v6760_v18  ;;  %v6847_v17 = vld [vmem:[#allocation11 + $0x20] ss:$16 sps:$4 sm:$0xff]   ;;  %v6852_v18 = vld [vmem:[#allocation11 + $0x2c] ss:$16 sps:$4 sm:$0xff]  }
 0x163   : > { %1479 = vmatprep.subr.bf16.mxu1 %v6768_v19  ;;  %v551_v19 = vld [vmem:[%s8282_s1 + $0x8] sm:$0xff] }
 0x165   : > { %1394 = vmatpush1.bf16.msra.mxu0 %v6763_v20  ;;  %v555_v20 = vld [vmem:[%s8282_s1 + $0x28] sm:$0xff] }
 0x166   : > { %1395 = vmatprep.subr.bf16.mxu0 %v6771_v21  ;;  %1480 = vmatpush1.bf16.msra.mxu1 %v6766_v22  ;;  %v6855_v21 = vld [vmem:[#allocation11 + $0x44] ss:$16 sps:$4 sm:$0xff]   ;;  %v559_v22 = vpack.c.bf16 %v555_v20, %v551_v19  ;;  %v6934_v19 = vld [vmem:[#allocation11 + $0x1e8] ss:$16 sps:$4 sm:$0xff]   ;;  %v6942_v20 = vld [vmem:[#allocation11 + $0x20c] ss:$16 sps:$4 sm:$0xff]  }
 0x167   : > { %1481 = vmatprep.subr.bf16.mxu1 %v6774_v23  ;;  %v6850_v23 = vld [vmem:[#allocation11 + $0x28] ss:$16 sps:$4 sm:$0xff]  }
 0x169   : > { %1396 = vmatpush1.bf16.msra.mxu0 %v6769_v24  ;;  %v6858_v24 = vld [vmem:[#allocation11 + $0x4c] ss:$16 sps:$4 sm:$0xff]  }
 0x16a   : > { %1397 = vmatprep.subr.bf16.mxu0 %v6777_v25  ;;  %1482 = vmatpush1.bf16.msra.mxu1 %v6772_v26  ;;  %v6853_v25 = vld [vmem:[#allocation11 + $0x40] ss:$16 sps:$4 sm:$0xff]   ;;  %v6861_v26 = vld [vmem:[#allocation11 + $0x64] ss:$16 sps:$4 sm:$0xff]  }
 0x16b   : > { %1483 = vmatprep.subr.bf16.mxu1 %v6780_v27  ;;  %v6856_v27 = vld [vmem:[#allocation11 + $0x48] ss:$16 sps:$4 sm:$0xff]  }
 0x16d   : > { %1398 = vmatpush1.bf16.msra.mxu0 %v6775_v28  ;;  %v6864_v28 = vld [vmem:[#allocation11 + $0x6c] ss:$16 sps:$4 sm:$0xff]  }
 0x16e   : > { %1399 = vmatprep.subr.bf16.mxu0 %v6783_v29  ;;  %1484 = vmatpush1.bf16.msra.mxu1 %v6778_v30  ;;  %v6859_v29 = vld [vmem:[#allocation11 + $0x60] ss:$16 sps:$4 sm:$0xff]   ;;  %v6867_v30 = vld [vmem:[#allocation11 + $0x84] ss:$16 sps:$4 sm:$0xff]  }
 0x16f   : > { %1485 = vmatprep.subr.bf16.mxu1 %v6786_v31  ;;  %v6862_v31 = vld [vmem:[#allocation11 + $0x68] ss:$16 sps:$4 sm:$0xff]  }
 0x171   : > { %1400 = vmatpush1.bf16.msra.mxu0 %v6781_v33  ;;  %v6865_v33 = vld [vmem:[#allocation11 + $0x80] ss:$16 sps:$4 sm:$0xff]  }
 0x172   : > { %1401 = vmatprep.subr.bf16.mxu0 %v6789_v35  ;;  %1486 = vmatpush1.bf16.msra.mxu1 %v6784_v37  ;;  %v6868_v35 = vld [vmem:[#allocation11 + $0x88] ss:$16 sps:$4 sm:$0xff]   ;;  %v6871_v37 = vld [vmem:[#allocation11 + $0xa0] ss:$16 sps:$4 sm:$0xff]  }
 0x173   : > { %1487 = vmatprep.subr.bf16.mxu1 %v6792_v38  ;;  %v6879_v38 = vld [vmem:[#allocation11 + $0xc4] ss:$16 sps:$4 sm:$0xff]  }
 0x175   : > { %1402 = vmatpush1.bf16.msra.mxu0 %v6787_v39  ;;  %v6874_v39 = vld [vmem:[#allocation11 + $0xa8] ss:$16 sps:$4 sm:$0xff]  }
 0x176   : > { %1403 = vmatprep.subr.bf16.mxu0 %v6795_v40  ;;  %1488 = vmatpush1.bf16.msra.mxu1 %v6790_v41  ;;  %v6882_v40 = vld [vmem:[#allocation11 + $0xcc] ss:$16 sps:$4 sm:$0xff]   ;;  %v6877_v41 = vld [vmem:[#allocation11 + $0xc0] ss:$16 sps:$4 sm:$0xff]  }
 0x177   : > { %1489 = vmatprep.subr.bf16.mxu1 %v6798_v42  ;;  %v6885_v42 = vld [vmem:[#allocation11 + $0xe4] ss:$16 sps:$4 sm:$0xff]  }
 0x179   : > { %1404 = vmatpush1.bf16.msra.mxu0 %v6793_v43  ;;  %v6880_v43 = vld [vmem:[#allocation11 + $0xc8] ss:$16 sps:$4 sm:$0xff]  }
 0x17a   : > { %1405 = vmatprep.subr.bf16.mxu0 %v6801_v44  ;;  %1490 = vmatpush1.bf16.msra.mxu1 %v6796_v45  ;;  %v6888_v44 = vld [vmem:[#allocation11 + $0xec] ss:$16 sps:$4 sm:$0xff]   ;;  %v6883_v45 = vld [vmem:[#allocation11 + $0xe0] ss:$16 sps:$4 sm:$0xff]  }
 0x17b   : > { %1491 = vmatprep.subr.bf16.mxu1 %v6804_v46  ;;  %v6891_v46 = vld [vmem:[#allocation11 + $0x104] ss:$16 sps:$4 sm:$0xff]  }
 0x17d   : > { %1406 = vmatpush1.bf16.msra.mxu0 %v6799_v47  ;;  %v6886_v47 = vld [vmem:[#allocation11 + $0xe8] ss:$16 sps:$4 sm:$0xff]  }
 0x17e   : > { %1407 = vmatprep.subr.bf16.mxu0 %v6807_v48  ;;  %1492 = vmatpush1.bf16.msra.mxu1 %v6802_v49  ;;  %v6894_v48 = vld [vmem:[#allocation11 + $0x10c] ss:$16 sps:$4 sm:$0xff]   ;;  %v6889_v49 = vld [vmem:[#allocation11 + $0x100] ss:$16 sps:$4 sm:$0xff]  }
 0x17f   : > { %1493 = vmatprep.subr.bf16.mxu1 %v6810_v50  ;;  %v6897_v50 = vld [vmem:[#allocation11 + $0x124] ss:$16 sps:$4 sm:$0xff]  }
 0x181   : > { %1408 = vmatpush1.bf16.msra.mxu0 %v6805_v51  ;;  %v6892_v51 = vld [vmem:[#allocation11 + $0x108] ss:$16 sps:$4 sm:$0xff]  }
 0x182   : > { %1409 = vmatprep.subr.bf16.mxu0 %v6813_v52  ;;  %1494 = vmatpush1.bf16.msra.mxu1 %v6808_v53  ;;  %v6900_v52 = vld [vmem:[#allocation11 + $0x12c] ss:$16 sps:$4 sm:$0xff]   ;;  %v6895_v53 = vld [vmem:[#allocation11 + $0x120] ss:$16 sps:$4 sm:$0xff]  }
 0x183   : > { %1495 = vmatprep.subr.bf16.mxu1 %v6816_v54  ;;  %v6903_v54 = vld [vmem:[#allocation11 + $0x144] ss:$16 sps:$4 sm:$0xff]  }
 0x185   : > { %1410 = vmatpush1.bf16.msra.mxu0 %v6811_v55  ;;  %v6898_v55 = vld [vmem:[#allocation11 + $0x128] ss:$16 sps:$4 sm:$0xff]  }
 0x186   : > { %1411 = vmatprep.subr.bf16.mxu0 %v6819_v56  ;;  %1496 = vmatpush1.bf16.msra.mxu1 %v6814_v57  ;;  %v6906_v56 = vld [vmem:[#allocation11 + $0x14c] ss:$16 sps:$4 sm:$0xff]   ;;  %v6901_v57 = vld [vmem:[#allocation11 + $0x140] ss:$16 sps:$4 sm:$0xff]  }
 0x187   : > { %1497 = vmatprep.subr.bf16.mxu1 %v6822_v58  ;;  %v6909_v58 = vld [vmem:[#allocation11 + $0x164] ss:$16 sps:$4 sm:$0xff]  }
 0x189   : > { %1412 = vmatpush1.bf16.msra.mxu0 %v6817_v59  ;;  %v6904_v59 = vld [vmem:[#allocation11 + $0x148] ss:$16 sps:$4 sm:$0xff]  }
 0x18a   : > { %1413 = vmatprep.subr.bf16.mxu0 %v6825_v60  ;;  %1498 = vmatpush1.bf16.msra.mxu1 %v6820_v61  ;;  %v6912_v60 = vld [vmem:[#allocation11 + $0x16c] ss:$16 sps:$4 sm:$0xff]   ;;  %v6907_v61 = vld [vmem:[#allocation11 + $0x160] ss:$16 sps:$4 sm:$0xff]  }
 0x18b   : > { %1499 = vmatprep.subr.bf16.mxu1 %v6828_v62  ;;  %v6915_v62 = vld [vmem:[#allocation11 + $0x184] ss:$16 sps:$4 sm:$0xff]  }
 0x18d   : > { %1414 = vmatpush1.bf16.msra.mxu0 %v6823_v63  ;;  %v6910_v63 = vld [vmem:[#allocation11 + $0x168] ss:$16 sps:$4 sm:$0xff]  }
 0x18e   : > { %1415 = vmatprep.subr.bf16.mxu0 %v6831_v0  ;;  %1500 = vmatpush1.bf16.msra.mxu1 %v6826_v1  ;;  %v6918_v0 = vld [vmem:[#allocation11 + $0x18c] ss:$16 sps:$4 sm:$0xff]   ;;  %v6913_v1 = vld [vmem:[#allocation11 + $0x180] ss:$16 sps:$4 sm:$0xff]  }
 0x18f   : > { %1501 = vmatprep.subr.bf16.mxu1 %v6834_v2  ;;  %v6921_v2 = vld [vmem:[#allocation11 + $0x1a4] ss:$16 sps:$4 sm:$0xff]  }
 0x191   : > { %1416 = vmatpush1.bf16.msra.mxu0 %v6829_v3  ;;  %v6916_v3 = vld [vmem:[#allocation11 + $0x188] ss:$16 sps:$4 sm:$0xff]  }
 0x192   : > { %1417 = vmatprep.subr.bf16.mxu0 %v6837_v4  ;;  %1502 = vmatpush1.bf16.msra.mxu1 %v6832_v5  ;;  %v6924_v4 = vld [vmem:[#allocation11 + $0x1ac] ss:$16 sps:$4 sm:$0xff]   ;;  %v6919_v5 = vld [vmem:[#allocation11 + $0x1a0] ss:$16 sps:$4 sm:$0xff]  }
 0x193   : > { %1503 = vmatprep.subr.bf16.mxu1 %v6840_v7  ;;  %v6922_v7 = vld [vmem:[#allocation11 + $0x1a8] ss:$16 sps:$4 sm:$0xff]  }
 0x195   : > { %1418 = vmatpush1.bf16.msra.mxu0 %v6835_v6  ;;  %v6927_v6 = vld [vmem:[#allocation11 + $0x1c4] ss:$16 sps:$4 sm:$0xff]  }
 0x196   : > { %2284 = vmatprep.subr.bf16.mxu0 %v6843_v10  ;;  %1504 = vmatpush1.bf16.msra.mxu1 %v6838_v11  ;;  %v6928_v10 = vld [vmem:[#allocation11 + $0x1c8] ss:$16 sps:$4 sm:$0xff]   ;;  %v6933_v11 = vld [vmem:[#allocation11 + $0x1e4] ss:$16 sps:$4 sm:$0xff]  }
 0x197   : > { %2370 = vmatprep.subr.bf16.mxu1 %v6846_v13  ;;  %v6931_v13 = vld [vmem:[#allocation11 + $0x1e0] ss:$16 sps:$4 sm:$0xff]  }
 0x198   : > { %1420 = vmatmul.mubr.bf16.vlgmr.msra.gmra.mrb[0].mxu0 %v548_v12 }
 0x199   : > { %2285 = vmatpush1.bf16.msra.mxu0 %v6841_v14  ;;  %1506 = vmatmul.mubr.bf16.vlgmr.msra.gmra.mrb[0].mxu1 %v548_v12  ;;  %v6936_v12 = vld [vmem:[#allocation11 + $0x1ec] ss:$16 sps:$4 sm:$0xff]   ;;  %v550_v14 = vld [vmem:[%s8282_s1] sm:$0xff] }
 0x19a   : > { %2286 = vmatprep.subr.bf16.mxu0 %v6849_v15  ;;  %2371 = vmatpush1.bf16.msra.mxu1 %v6844_v16  ;;  %v554_v15 = vld [vmem:[%s8282_s1 + $0x20] sm:$0xff] }
 0x19b   : > { %2372 = vmatprep.subr.bf16.mxu1 %v6852_v18  ;;  %2316 = vmatprep.mubr.bf16.mxu0 %v559_v22  ;;  %v6939_v16 = vld [vmem:[#allocation11 + $0x204] ss:$16 sps:$4 sm:$0xff]   ;;  %v557_v18 = vld [vmem:[%s8282_s1 + $0x38] sm:$0xff] }
 0x19c   : > { %2402 = vmatprep.mubr.bf16.mxu1 %v559_v22  ;;  %v558_v22 = vpack.c.bf16 %v554_v15, %v550_v14  ;;  %v7026_v14 = vld [vmem:[#allocation11 + $0x3cc] ss:$16 sps:$4 sm:$0xff]   ;;  %v7021_v15 = vld [vmem:[#allocation11 + $0x3c0] ss:$16 sps:$4 sm:$0xff]  }
 0x19d   : > { %2287 = vmatpush1.bf16.msra.mxu0 %v6847_v17  ;;  %v553_v17 = vld [vmem:[%s8282_s1 + $0x18] sm:$0xff] }
 0x19e   : > { %2288 = vmatprep.subr.bf16.mxu0 %v6855_v21  ;;  %2373 = vmatpush1.bf16.msra.mxu1 %v6850_v23  ;;  %v6937_v21 = vld [vmem:[#allocation11 + $0x200] ss:$16 sps:$4 sm:$0xff]   ;;  %v6945_v23 = vld [vmem:[#allocation11 + $0x224] ss:$16 sps:$4 sm:$0xff]  }
 0x19f   : > { %2374 = vmatprep.subr.bf16.mxu1 %v6858_v24  ;;  %v6940_v24 = vld [vmem:[#allocation11 + $0x208] ss:$16 sps:$4 sm:$0xff]  }
 0x1a1   : > { %2289 = vmatpush1.bf16.msra.mxu0 %v6853_v25  ;;  %v561_v25 = vpack.c.bf16 %v557_v18, %v553_v17  ;;  %v7029_v17 = vld [vmem:[#allocation11 + $0x3e4] ss:$16 sps:$4 sm:$0xff]   ;;  %v7032_v18 = vld [vmem:[#allocation11 + $0x3ec] ss:$16 sps:$4 sm:$0xff]  }
 0x1a2   : > { %2290 = vmatprep.subr.bf16.mxu0 %v6861_v26  ;;  %2375 = vmatpush1.bf16.msra.mxu1 %v6856_v27  ;;  %v6948_v26 = vld [vmem:[#allocation11 + $0x22c] ss:$16 sps:$4 sm:$0xff]   ;;  %v6943_v27 = vld [vmem:[#allocation11 + $0x220] ss:$16 sps:$4 sm:$0xff]  }
 0x1a3   : > { %2376 = vmatprep.subr.bf16.mxu1 %v6864_v28  ;;  %v6951_v28 = vld [vmem:[#allocation11 + $0x244] ss:$16 sps:$4 sm:$0xff]  }
 0x1a5   : > { %2291 = vmatpush1.bf16.msra.mxu0 %v6859_v29  ;;  %v6946_v29 = vld [vmem:[#allocation11 + $0x228] ss:$16 sps:$4 sm:$0xff]  }
 0x1a6   : > { %2292 = vmatprep.subr.bf16.mxu0 %v6867_v30  ;;  %2377 = vmatpush1.bf16.msra.mxu1 %v6862_v31  ;;  %v6954_v30 = vld [vmem:[#allocation11 + $0x24c] ss:$16 sps:$4 sm:$0xff]   ;;  %v6949_v31 = vld [vmem:[#allocation11 + $0x240] ss:$16 sps:$4 sm:$0xff]  }
 0x1a7   : > { %2378 = vmatprep.subr.bf16.mxu1 %v6870_v32  ;;  %v6957_v32 = vld [vmem:[#allocation11 + $0x264] ss:$16 sps:$4 sm:$0xff]  }
 0x1a9   : > { %2293 = vmatpush1.bf16.msra.mxu0 %v6865_v33  ;;  %v6952_v33 = vld [vmem:[#allocation11 + $0x248] ss:$16 sps:$4 sm:$0xff]  }
 0x1aa   : > { %2294 = vmatprep.subr.bf16.mxu0 %v6873_v34  ;;  %2379 = vmatpush1.bf16.msra.mxu1 %v6868_v35  ;;  %v6960_v34 = vld [vmem:[#allocation11 + $0x26c] ss:$16 sps:$4 sm:$0xff]   ;;  %v6955_v35 = vld [vmem:[#allocation11 + $0x260] ss:$16 sps:$4 sm:$0xff]  }
 0x1ab   : > { %2380 = vmatprep.subr.bf16.mxu1 %v6876_v36  ;;  %v6963_v36 = vld [vmem:[#allocation11 + $0x284] ss:$16 sps:$4 sm:$0xff]  }
 0x1ad   : > { %2295 = vmatpush1.bf16.msra.mxu0 %v6871_v37  ;;  %v6958_v37 = vld [vmem:[#allocation11 + $0x268] ss:$16 sps:$4 sm:$0xff]  }
 0x1ae   : > { %2296 = vmatprep.subr.bf16.mxu0 %v6879_v38  ;;  %2381 = vmatpush1.bf16.msra.mxu1 %v6874_v39  ;;  %v6966_v38 = vld [vmem:[#allocation11 + $0x28c] ss:$16 sps:$4 sm:$0xff]   ;;  %v6961_v39 = vld [vmem:[#allocation11 + $0x280] ss:$16 sps:$4 sm:$0xff]  }
 0x1af   : > { %2382 = vmatprep.subr.bf16.mxu1 %v6882_v40  ;;  %v6969_v40 = vld [vmem:[#allocation11 + $0x2a4] ss:$16 sps:$4 sm:$0xff]  }
 0x1b1   : > { %2297 = vmatpush1.bf16.msra.mxu0 %v6877_v41  ;;  %v6964_v41 = vld [vmem:[#allocation11 + $0x288] ss:$16 sps:$4 sm:$0xff]  }
 0x1b2   : > { %2298 = vmatprep.subr.bf16.mxu0 %v6885_v42  ;;  %2383 = vmatpush1.bf16.msra.mxu1 %v6880_v43  ;;  %v6972_v42 = vld [vmem:[#allocation11 + $0x2ac] ss:$16 sps:$4 sm:$0xff]   ;;  %v6967_v43 = vld [vmem:[#allocation11 + $0x2a0] ss:$16 sps:$4 sm:$0xff]  }
 0x1b3   : > { %2384 = vmatprep.subr.bf16.mxu1 %v6888_v44  ;;  %v6975_v44 = vld [vmem:[#allocation11 + $0x2c4] ss:$16 sps:$4 sm:$0xff]  }
 0x1b5   : > { %2299 = vmatpush1.bf16.msra.mxu0 %v6883_v45  ;;  %v6970_v45 = vld [vmem:[#allocation11 + $0x2a8] ss:$16 sps:$4 sm:$0xff]  }
 0x1b6   : > { %2300 = vmatprep.subr.bf16.mxu0 %v6891_v46  ;;  %2385 = vmatpush1.bf16.msra.mxu1 %v6886_v47  ;;  %v6978_v46 = vld [vmem:[#allocation11 + $0x2cc] ss:$16 sps:$4 sm:$0xff]   ;;  %v6973_v47 = vld [vmem:[#allocation11 + $0x2c0] ss:$16 sps:$4 sm:$0xff]  }
 0x1b7   : > { %2386 = vmatprep.subr.bf16.mxu1 %v6894_v48  ;;  %v6976_v48 = vld [vmem:[#allocation11 + $0x2c8] ss:$16 sps:$4 sm:$0xff]  }
 0x1b9   : > { %2301 = vmatpush1.bf16.msra.mxu0 %v6889_v49  ;;  %v6981_v49 = vld [vmem:[#allocation11 + $0x2e4] ss:$16 sps:$4 sm:$0xff]  }
 0x1ba   : > { %2302 = vmatprep.subr.bf16.mxu0 %v6897_v50  ;;  %2387 = vmatpush1.bf16.msra.mxu1 %v6892_v51  ;;  %v6984_v50 = vld [vmem:[#allocation11 + $0x2ec] ss:$16 sps:$4 sm:$0xff]   ;;  %v6979_v51 = vld [vmem:[#allocation11 + $0x2e0] ss:$16 sps:$4 sm:$0xff]  }
 0x1bb   : > { %2388 = vmatprep.subr.bf16.mxu1 %v6900_v52  ;;  %v6987_v52 = vld [vmem:[#allocation11 + $0x304] ss:$16 sps:$4 sm:$0xff]  }
 0x1bd   : > { %2303 = vmatpush1.bf16.msra.mxu0 %v6895_v53  ;;  %v6982_v53 = vld [vmem:[#allocation11 + $0x2e8] ss:$16 sps:$4 sm:$0xff]  }
 0x1be   : > { %2304 = vmatprep.subr.bf16.mxu0 %v6903_v54  ;;  %2389 = vmatpush1.bf16.msra.mxu1 %v6898_v55  ;;  %v6990_v54 = vld [vmem:[#allocation11 + $0x30c] ss:$16 sps:$4 sm:$0xff]   ;;  %v6985_v55 = vld [vmem:[#allocation11 + $0x300] ss:$16 sps:$4 sm:$0xff]  }
 0x1bf   : > { %2390 = vmatprep.subr.bf16.mxu1 %v6906_v56  ;;  %v6993_v56 = vld [vmem:[#allocation11 + $0x324] ss:$16 sps:$4 sm:$0xff]  }
 0x1c1   : > { %2305 = vmatpush1.bf16.msra.mxu0 %v6901_v57  ;;  %v6988_v57 = vld [vmem:[#allocation11 + $0x308] ss:$16 sps:$4 sm:$0xff]  }
 0x1c2   : > { %2306 = vmatprep.subr.bf16.mxu0 %v6909_v58  ;;  %2391 = vmatpush1.bf16.msra.mxu1 %v6904_v59  ;;  %v6996_v58 = vld [vmem:[#allocation11 + $0x32c] ss:$16 sps:$4 sm:$0xff]   ;;  %v6991_v59 = vld [vmem:[#allocation11 + $0x320] ss:$16 sps:$4 sm:$0xff]  }
 0x1c3   : > { %2392 = vmatprep.subr.bf16.mxu1 %v6912_v60  ;;  %v6999_v60 = vld [vmem:[#allocation11 + $0x344] ss:$16 sps:$4 sm:$0xff]  }
 0x1c5   : > { %2307 = vmatpush1.bf16.msra.mxu0 %v6907_v61  ;;  %v6994_v61 = vld [vmem:[#allocation11 + $0x328] ss:$16 sps:$4 sm:$0xff]  }
 0x1c6   : > { %2308 = vmatprep.subr.bf16.mxu0 %v6915_v62  ;;  %2393 = vmatpush1.bf16.msra.mxu1 %v6910_v63  ;;  %v7002_v62 = vld [vmem:[#allocation11 + $0x34c] ss:$16 sps:$4 sm:$0xff]   ;;  %v6997_v63 = vld [vmem:[#allocation11 + $0x340] ss:$16 sps:$4 sm:$0xff]  }
 0x1c7   : > { %2394 = vmatprep.subr.bf16.mxu1 %v6918_v0  ;;  %v7000_v0 = vld [vmem:[#allocation11 + $0x348] ss:$16 sps:$4 sm:$0xff]  }
 0x1c9   : > { %2309 = vmatpush1.bf16.msra.mxu0 %v6913_v1  ;;  %v7005_v1 = vld [vmem:[#allocation11 + $0x364] ss:$16 sps:$4 sm:$0xff]  }
 0x1ca   : > { %2310 = vmatprep.subr.bf16.mxu0 %v6921_v2  ;;  %2395 = vmatpush1.bf16.msra.mxu1 %v6916_v3  ;;  %v7008_v2 = vld [vmem:[#allocation11 + $0x36c] ss:$16 sps:$4 sm:$0xff]   ;;  %v7003_v3 = vld [vmem:[#allocation11 + $0x360] ss:$16 sps:$4 sm:$0xff]  }
 0x1cb   : > { %2396 = vmatprep.subr.bf16.mxu1 %v6924_v4  ;;  %v7006_v4 = vld [vmem:[#allocation11 + $0x368] ss:$16 sps:$4 sm:$0xff]  }
 0x1cd   : > { %2311 = vmatpush1.bf16.msra.mxu0 %v6919_v5  ;;  %v7011_v5 = vld [vmem:[#allocation11 + $0x384] ss:$16 sps:$4 sm:$0xff]  }
 0x1ce   : > { %2312 = vmatprep.subr.bf16.mxu0 %v6927_v6  ;;  %2397 = vmatpush1.bf16.msra.mxu1 %v6922_v7  ;;  %v7014_v6 = vld [vmem:[#allocation11 + $0x38c] ss:$16 sps:$4 sm:$0xff]   ;;  %v7009_v7 = vld [vmem:[#allocation11 + $0x380] ss:$16 sps:$4 sm:$0xff]  }
 0x1cf   : > { %2398 = vmatprep.subr.bf16.mxu1 %v6930_v9  ;;  %v7017_v9 = vld [vmem:[#allocation11 + $0x3a4] ss:$16 sps:$4 sm:$0xff]  }
 0x1d1   : > { %2313 = vmatpush1.bf16.msra.mxu0 %v6925_v8  ;;  %v7012_v8 = vld [vmem:[#allocation11 + $0x388] ss:$16 sps:$4 sm:$0xff]  }
 0x1d2   : > { %2314 = vmatprep.subr.bf16.mxu0 %v6933_v11  ;;  %2399 = vmatpush1.bf16.msra.mxu1 %v6928_v10  ;;  %v7020_v10 = vld [vmem:[#allocation11 + $0x3ac] ss:$16 sps:$4 sm:$0xff]   ;;  %v7015_v11 = vld [vmem:[#allocation11 + $0x3a0] ss:$16 sps:$4 sm:$0xff]  }
 0x1d3   : > { %2400 = vmatprep.subr.bf16.mxu1 %v6936_v12  ;;  %v7018_v12 = vld [vmem:[#allocation11 + $0x3a8] ss:$16 sps:$4 sm:$0xff]  }
 0x1d5   : > { %2315 = vmatpush1.bf16.msra.mxu0 %v6931_v13  ;;  %v7023_v13 = vld [vmem:[#allocation11 + $0x3c4] ss:$16 sps:$4 sm:$0xff]  }
 0x1d6   : > { %2327 = vmatprep.subr.bf16.mxu0 %v6939_v16  ;;  %2401 = vmatpush1.bf16.msra.mxu1 %v6934_v19  ;;  %v7024_v16 = vld [vmem:[#allocation11 + $0x3c8] ss:$16 sps:$4 sm:$0xff]   ;;  %v7027_v19 = vld [vmem:[#allocation11 + $0x3e0] ss:$16 sps:$4 sm:$0xff]  }
 0x1d7   : > { %2413 = vmatprep.subr.bf16.mxu1 %v6942_v20  ;;  %v552_v20 = vld [vmem:[%s8282_s1 + $0x10] sm:$0xff] }
 0x1d8   : > { %2317 = vmatmul.mubr.bf16.vlgmr.msra.gmra.mrb[4].mxu0 %v558_v22 }
 0x1d9   : > { %2328 = vmatpush1.bf16.msra.mxu0 %v6937_v21  ;;  %2359 = vmatprep.mubr.bf16.mxu0 %v561_v25  ;;  %v556_v21 = vld [vmem:[%s8282_s1 + $0x30] sm:$0xff]  ;;  %s7725_s1 = scalar_lea.vmem %s8800_s27, 256 }
 0x1da   : > { %2403 = vmatmul.mubr.bf16.vlgmr.msra.gmra.mrb[4].mxu1 %v558_v22  ;;  %2329 = vmatprep.subr.bf16.mxu0 %v6945_v23  ;;  %v7035_v22 = vld [vmem:[#allocation13 + $0x4] ss:$16 sps:$4 sm:$0xff]   ;;  %v7030_v23 = vld [vmem:[#allocation11 + $0x3e8] ss:$16 sps:$4 sm:$0xff]   ;;  %p7726_p9 = scmp.ne.s32.totalorder %s8800_s27, %s7725_s1 }
 0x1db   : > { %2414 = vmatpush1.bf16.msra.mxu1 %v6940_v24  ;;  %2445 = vmatprep.mubr.bf16.mxu1 %v561_v25  ;;  %v563_v24 = vld [vmem:[%s8290_s13 + $0x8] sm:$0xff] }
 0x1dc   : > { %2415 = vmatprep.subr.bf16.mxu1 %v6948_v26  ;;  %v567_v25 = vld [vmem:[%s8290_s13 + $0x28] sm:$0xff]  ;;  %v560_v26 = vpack.c.bf16 %v556_v21, %v552_v20  ;;  %p7727_p10 = pnand %p7726_p9, %p8976_p12 }
 0x1dd   : > { %2330 = vmatpush1.bf16.msra.mxu0 %v6943_v27  ;;  %v7033_v27 = vld [vmem:[#allocation13] ss:$16 sps:$4 sm:$0xff]  }
 0x1de   : > { %2331 = vmatprep.subr.bf16.mxu0 %v6951_v28  ;;  %v571_v28 = vpack.c.bf16 %v567_v25, %v563_v24  ;;  %p7728_p1 = pneg %p7727_p10 }
 0x1df   : > { %2416 = vmatpush1.bf16.msra.mxu1 %v6946_v29  ;;  %v7038_v29 = vld [vmem:[#allocation13 + $0x24] ss:$16 sps:$4 sm:$0xff]  }
 0x1e0   : > { %2417 = vmatprep.subr.bf16.mxu1 %v6954_v30  ;;  %v7036_v30 = vld [vmem:[#allocation13 + $0x20] ss:$16 sps:$4 sm:$0xff]  }
 0x1e1   : > { %2332 = vmatpush1.bf16.msra.mxu0 %v6949_v31  ;;  %v7041_v31 = vld [vmem:[#allocation13 + $0x44] ss:$16 sps:$4 sm:$0xff]  }
 0x1e2   : > { %2333 = vmatprep.subr.bf16.mxu0 %v6957_v32  ;;  %v7039_v32 = vld [vmem:[#allocation13 + $0x40] ss:$16 sps:$4 sm:$0xff]  }
 0x1e3   : > { %2418 = vmatpush1.bf16.msra.mxu1 %v6952_v33  ;;  %v7044_v33 = vld [vmem:[#allocation13 + $0x64] ss:$16 sps:$4 sm:$0xff]  }
 0x1e4   : > { %2419 = vmatprep.subr.bf16.mxu1 %v6960_v34  ;;  %v7042_v34 = vld [vmem:[#allocation13 + $0x60] ss:$16 sps:$4 sm:$0xff]  }
 0x1e5   : > { %2334 = vmatpush1.bf16.msra.mxu0 %v6955_v35  ;;  %v7047_v35 = vld [vmem:[#allocation13 + $0x84] ss:$16 sps:$4 sm:$0xff]  }
 0x1e6   : > { %2335 = vmatprep.subr.bf16.mxu0 %v6963_v36  ;;  %v7045_v36 = vld [vmem:[#allocation13 + $0x80] ss:$16 sps:$4 sm:$0xff]  }
 0x1e7   : > { %2420 = vmatpush1.bf16.msra.mxu1 %v6958_v37  ;;  %v7050_v37 = vld [vmem:[#allocation13 + $0xa4] ss:$16 sps:$4 sm:$0xff]  }
 0x1e8   : > { %2421 = vmatprep.subr.bf16.mxu1 %v6966_v38  ;;  %v7048_v38 = vld [vmem:[#allocation13 + $0xa0] ss:$16 sps:$4 sm:$0xff]  }
 0x1e9   : > { %2336 = vmatpush1.bf16.msra.mxu0 %v6961_v39  ;;  %v7053_v39 = vld [vmem:[#allocation13 + $0xc4] ss:$16 sps:$4 sm:$0xff]  }
 0x1ea   : > { %2337 = vmatprep.subr.bf16.mxu0 %v6969_v40  ;;  %v7051_v40 = vld [vmem:[#allocation13 + $0xc0] ss:$16 sps:$4 sm:$0xff]  }
 0x1eb   : > { %2422 = vmatpush1.bf16.msra.mxu1 %v6964_v41  ;;  %v7056_v41 = vld [vmem:[#allocation13 + $0xe4] ss:$16 sps:$4 sm:$0xff]  }
 0x1ec   : > { %2423 = vmatprep.subr.bf16.mxu1 %v6972_v42  ;;  %v7054_v42 = vld [vmem:[#allocation13 + $0xe0] ss:$16 sps:$4 sm:$0xff]  }
 0x1ed   : > { %2338 = vmatpush1.bf16.msra.mxu0 %v6967_v43  ;;  %v7059_v43 = vld [vmem:[#allocation13 + $0x104] ss:$16 sps:$4 sm:$0xff]  }
 0x1ee   : > { %2339 = vmatprep.subr.bf16.mxu0 %v6975_v44  ;;  %v7057_v44 = vld [vmem:[#allocation13 + $0x100] ss:$16 sps:$4 sm:$0xff]  }
 0x1ef   : > { %2424 = vmatpush1.bf16.msra.mxu1 %v6970_v45  ;;  %v7062_v45 = vld [vmem:[#allocation13 + $0x124] ss:$16 sps:$4 sm:$0xff]  }
 0x1f0   : > { %2425 = vmatprep.subr.bf16.mxu1 %v6978_v46  ;;  %v7060_v46 = vld [vmem:[#allocation13 + $0x120] ss:$16 sps:$4 sm:$0xff]  }
 0x1f1   : > { %2340 = vmatpush1.bf16.msra.mxu0 %v6973_v47  ;;  %v7065_v47 = vld [vmem:[#allocation13 + $0x144] ss:$16 sps:$4 sm:$0xff]  }
 0x1f2   : > { %2341 = vmatprep.subr.bf16.mxu0 %v6981_v49  ;;  %v7068_v49 = vld [vmem:[#allocation13 + $0x164] ss:$16 sps:$4 sm:$0xff]  }
 0x1f3   : > { %2426 = vmatpush1.bf16.msra.mxu1 %v6976_v48  ;;  %v7063_v48 = vld [vmem:[#allocation13 + $0x140] ss:$16 sps:$4 sm:$0xff]  }
 0x1f4   : > { %2427 = vmatprep.subr.bf16.mxu1 %v6984_v50  ;;  %v7066_v50 = vld [vmem:[#allocation13 + $0x160] ss:$16 sps:$4 sm:$0xff]  }
 0x1f5   : > { %2342 = vmatpush1.bf16.msra.mxu0 %v6979_v51  ;;  %v7071_v51 = vld [vmem:[#allocation13 + $0x184] ss:$16 sps:$4 sm:$0xff]  }
 0x1f6   : > { %2343 = vmatprep.subr.bf16.mxu0 %v6987_v52  ;;  %v7069_v52 = vld [vmem:[#allocation13 + $0x180] ss:$16 sps:$4 sm:$0xff]  }
 0x1f7   : > { %2428 = vmatpush1.bf16.msra.mxu1 %v6982_v53  ;;  %v7074_v53 = vld [vmem:[#allocation13 + $0x1a4] ss:$16 sps:$4 sm:$0xff]  }
 0x1f8   : > { %2429 = vmatprep.subr.bf16.mxu1 %v6990_v54  ;;  %v7072_v54 = vld [vmem:[#allocation13 + $0x1a0] ss:$16 sps:$4 sm:$0xff]  }
 0x1f9   : > { %2344 = vmatpush1.bf16.msra.mxu0 %v6985_v55  ;;  %v7077_v55 = vld [vmem:[#allocation13 + $0x1c4] ss:$16 sps:$4 sm:$0xff]  }
 0x1fa   : > { %2345 = vmatprep.subr.bf16.mxu0 %v6993_v56  ;;  %v7075_v56 = vld [vmem:[#allocation13 + $0x1c0] ss:$16 sps:$4 sm:$0xff]  }
 0x1fb   : > { %2430 = vmatpush1.bf16.msra.mxu1 %v6988_v57  ;;  %v7080_v57 = vld [vmem:[#allocation13 + $0x1e4] ss:$16 sps:$4 sm:$0xff]  }
 0x1fc   : > { %2431 = vmatprep.subr.bf16.mxu1 %v6996_v58  ;;  %v7078_v58 = vld [vmem:[#allocation13 + $0x1e0] ss:$16 sps:$4 sm:$0xff]  }
 0x1fd   : > { %2346 = vmatpush1.bf16.msra.mxu0 %v6991_v59  ;;  %v562_v59 = vld [vmem:[%s8290_s13] sm:$0xff] }
 0x1fe   : > { %2347 = vmatprep.subr.bf16.mxu0 %v6999_v60  ;;  %v566_v60 = vld [vmem:[%s8290_s13 + $0x20] sm:$0xff] }
 0x1ff   : > { %2432 = vmatpush1.bf16.msra.mxu1 %v6994_v61  ;;  %v7083_v61 = vld [vmem:[#allocation13 + $0x204] ss:$16 sps:$4 sm:$0xff]  }
 0x200   : > { %2433 = vmatprep.subr.bf16.mxu1 %v7002_v62  ;;  %v565_v62 = vld [vmem:[%s8290_s13 + $0x18] sm:$0xff] }
 0x201   : > { %2348 = vmatpush1.bf16.msra.mxu0 %v6997_v63  ;;  %v569_v63 = vld [vmem:[%s8290_s13 + $0x38] sm:$0xff] }
 0x202   : > { %2349 = vmatprep.subr.bf16.mxu0 %v7005_v1  ;;  %v7081_v1 = vld [vmem:[#allocation13 + $0x200] ss:$16 sps:$4 sm:$0xff]  }
 0x203   : > { %2434 = vmatpush1.bf16.msra.mxu1 %v7000_v0  ;;  %v8334_v0 = vpack.c.bf16 %v566_v60, %v562_v59  ;;  %v7149_v59 = vld [vmem:[#allocation13 + $0xcc] ss:$16 sps:$4 sm:$0xff]  }
 0x204   : > { %2435 = vmatprep.subr.bf16.mxu1 %v7008_v2  ;;  %v8336_v2 = vpack.c.bf16 %v569_v63, %v565_v62  ;;  %v7152_v62 = vld [vmem:[#allocation13 + $0xec] ss:$16 sps:$4 sm:$0xff]   ;;  %v7859_v63 = vmov 0.0  }
 0x205   : > { %2350 = vmatpush1.bf16.msra.mxu0 %v7003_v3  ;;  %v7086_v3 = vld [vmem:[#allocation13 + $0x224] ss:$16 sps:$4 sm:$0xff]  }
 0x206   : > { %2351 = vmatprep.subr.bf16.mxu0 %v7011_v5  ;;  %v7089_v5 = vld [vmem:[#allocation13 + $0x244] ss:$16 sps:$4 sm:$0xff]  }
 0x207   : > { %2436 = vmatpush1.bf16.msra.mxu1 %v7006_v4  ;;  %v7084_v4 = vld [vmem:[#allocation13 + $0x220] ss:$16 sps:$4 sm:$0xff]  }
 0x208   : > { %2437 = vmatprep.subr.bf16.mxu1 %v7014_v6  ;;  %v7087_v6 = vld [vmem:[#allocation13 + $0x240] ss:$16 sps:$4 sm:$0xff]  }
 0x209   : > { %2352 = vmatpush1.bf16.msra.mxu0 %v7009_v7  ;;  %v7092_v7 = vld [vmem:[#allocation13 + $0x264] ss:$16 sps:$4 sm:$0xff]  }
 0x20a   : > { %2353 = vmatprep.subr.bf16.mxu0 %v7017_v9  ;;  %v7095_v9 = vld [vmem:[#allocation13 + $0x284] ss:$16 sps:$4 sm:$0xff]  }
 0x20b   : > { %2438 = vmatpush1.bf16.msra.mxu1 %v7012_v8  ;;  %v7090_v8 = vld [vmem:[#allocation13 + $0x260] ss:$16 sps:$4 sm:$0xff]  }
 0x20c   : > { %2439 = vmatprep.subr.bf16.mxu1 %v7020_v10  ;;  %v7093_v10 = vld [vmem:[#allocation13 + $0x280] ss:$16 sps:$4 sm:$0xff]  }
 0x20d   : > { %2354 = vmatpush1.bf16.msra.mxu0 %v7015_v11  ;;  %v7098_v11 = vld [vmem:[#allocation13 + $0x2a4] ss:$16 sps:$4 sm:$0xff]  }
 0x20e   : > { %2355 = vmatprep.subr.bf16.mxu0 %v7023_v13  ;;  %v7101_v13 = vld [vmem:[#allocation13 + $0x2c4] ss:$16 sps:$4 sm:$0xff]  }
 0x20f   : > { %2440 = vmatpush1.bf16.msra.mxu1 %v7018_v12  ;;  %v7096_v12 = vld [vmem:[#allocation13 + $0x2a0] ss:$16 sps:$4 sm:$0xff]  }
 0x210   : > { %2441 = vmatprep.subr.bf16.mxu1 %v7026_v14 }
 0x211   : > { %2356 = vmatpush1.bf16.msra.mxu0 %v7021_v15 }
 0x212   : > { %2357 = vmatprep.subr.bf16.mxu0 %v7029_v17 }
 0x213   : > { %2442 = vmatpush1.bf16.msra.mxu1 %v7024_v16 }
 0x214   : > { %2443 = vmatprep.subr.bf16.mxu1 %v7032_v18  ;;  %v7099_v18 = vld [vmem:[#allocation13 + $0x2c0] ss:$16 sps:$4 sm:$0xff]  }
 0x215   : > { %2358 = vmatpush1.bf16.msra.mxu0 %v7027_v19 }
 0x216   : > { %3224 = vmatprep.subr.bf16.mxu0 %v7035_v22  ;;  %v7104_v22 = vld [vmem:[#allocation13 + $0x2e4] ss:$16 sps:$4 sm:$0xff]  }
 0x217   : > { %2444 = vmatpush1.bf16.msra.mxu1 %v7030_v23 }
 0x218   : > { %2360 = vmatmul.mubr.bf16.vlgmr.msra.gmra.mrb[4].mxu0 %v560_v26 }
 0x219   : > { %3225 = vmatpush1.bf16.msra.mxu0 %v7033_v27  ;;  %3256 = vmatprep.mubr.bf16.mxu0 %v571_v28 }
 0x21a   : > { %2446 = vmatmul.mubr.bf16.vlgmr.msra.gmra.mrb[4].mxu1 %v560_v26  ;;  %3226 = vmatprep.subr.bf16.mxu0 %v7038_v29  ;;  %v7107_v29 = vld [vmem:[#allocation13 + $0x304] ss:$16 sps:$4 sm:$0xff]  }
 0x21b   : > { %3342 = vmatprep.mubr.bf16.mxu1 %v571_v28  ;;  %v7102_v28 = vld [vmem:[#allocation13 + $0x2e0] ss:$16 sps:$4 sm:$0xff]  }
 0x21d   : > { %3227 = vmatpush1.bf16.msra.mxu0 %v7036_v30  ;;  %v7105_v30 = vld [vmem:[#allocation13 + $0x300] ss:$16 sps:$4 sm:$0xff]  }
 0x21e   : > { %3228 = vmatprep.subr.bf16.mxu0 %v7041_v31  ;;  %v7110_v31 = vld [vmem:[#allocation13 + $0x324] ss:$16 sps:$4 sm:$0xff]  }
 0x221   : > { %3229 = vmatpush1.bf16.msra.mxu0 %v7039_v32  ;;  %v7108_v32 = vld [vmem:[#allocation13 + $0x320] ss:$16 sps:$4 sm:$0xff]  }
 0x222   : > { %3230 = vmatprep.subr.bf16.mxu0 %v7044_v33  ;;  %v7113_v33 = vld [vmem:[#allocation13 + $0x344] ss:$16 sps:$4 sm:$0xff]  }
 0x225   : > { %3231 = vmatpush1.bf16.msra.mxu0 %v7042_v34  ;;  %v7111_v34 = vld [vmem:[#allocation13 + $0x340] ss:$16 sps:$4 sm:$0xff]  }
 0x226   : > { %3232 = vmatprep.subr.bf16.mxu0 %v7047_v35  ;;  %v7129_v35 = vld [vmem:[#allocation13 + $0x8] ss:$16 sps:$4 sm:$0xff]  }
 0x229   : > { %3233 = vmatpush1.bf16.msra.mxu0 %v7045_v36  ;;  %v7131_v36 = vld [vmem:[#allocation13 + $0xc] ss:$16 sps:$4 sm:$0xff]  }
 0x22a   : > { %3234 = vmatprep.subr.bf16.mxu0 %v7050_v37  ;;  %v7116_v37 = vld [vmem:[#allocation13 + $0x364] ss:$16 sps:$4 sm:$0xff]   ;;  %3310 = vmatprep.subr.bf16.mxu1 %v7131_v36  ;;  %v7186_v36 = vld [vmem:[#allocation13 + $0x268] ss:$16 sps:$4 sm:$0xff]  }
 0x22b   : > { %3311 = vmatpush1.bf16.msra.mxu1 %v7129_v35 }
 0x22d   : > { %3235 = vmatpush1.bf16.msra.mxu0 %v7048_v38  ;;  %v7134_v38 = vld [vmem:[#allocation13 + $0x2c] ss:$16 sps:$4 sm:$0xff]  }
 0x22e   : > { %3236 = vmatprep.subr.bf16.mxu0 %v7053_v39  ;;  %v7132_v39 = vld [vmem:[#allocation13 + $0x28] ss:$16 sps:$4 sm:$0xff]   ;;  %3312 = vmatprep.subr.bf16.mxu1 %v7134_v38 }
 0x22f   : > { %3313 = vmatpush1.bf16.msra.mxu1 %v7132_v39 }
 0x231   : > { %3237 = vmatpush1.bf16.msra.mxu0 %v7051_v40  ;;  %v7114_v40 = vld [vmem:[#allocation13 + $0x360] ss:$16 sps:$4 sm:$0xff]  }
 0x232   : > { %3238 = vmatprep.subr.bf16.mxu0 %v7056_v41  ;;  %v7137_v41 = vld [vmem:[#allocation13 + $0x4c] ss:$16 sps:$4 sm:$0xff]  }
 0x233   : > { %3314 = vmatprep.subr.bf16.mxu1 %v7137_v41 }
 0x235   : > { %3239 = vmatpush1.bf16.msra.mxu0 %v7054_v42  ;;  %v7119_v42 = vld [vmem:[#allocation13 + $0x384] ss:$16 sps:$4 sm:$0xff]  }
 0x236   : > { %3240 = vmatprep.subr.bf16.mxu0 %v7059_v43  ;;  %v7135_v43 = vld [vmem:[#allocation13 + $0x48] ss:$16 sps:$4 sm:$0xff]  }
 0x237   : > { %3315 = vmatpush1.bf16.msra.mxu1 %v7135_v43  ;;  %v7191_v43 = vld [vmem:[#allocation13 + $0x28c] ss:$16 sps:$4 sm:$0xff]  }
 0x239   : > { %3241 = vmatpush1.bf16.msra.mxu0 %v7057_v44  ;;  %v7117_v44 = vld [vmem:[#allocation13 + $0x380] ss:$16 sps:$4 sm:$0xff]  }
 0x23a   : > { %3242 = vmatprep.subr.bf16.mxu0 %v7062_v45  ;;  %v7140_v45 = vld [vmem:[#allocation13 + $0x6c] ss:$16 sps:$4 sm:$0xff]  }
 0x23b   : > { %3316 = vmatprep.subr.bf16.mxu1 %v7140_v45  ;;  %v7192_v45 = vld [vmem:[#allocation13 + $0x2a8] ss:$16 sps:$4 sm:$0xff]  }
 0x23d   : > { %3243 = vmatpush1.bf16.msra.mxu0 %v7060_v46  ;;  %v7122_v46 = vld [vmem:[#allocation13 + $0x3a4] ss:$16 sps:$4 sm:$0xff]  }
 0x23e   : > { %3244 = vmatprep.subr.bf16.mxu0 %v7065_v47  ;;  %v7138_v47 = vld [vmem:[#allocation13 + $0x68] ss:$16 sps:$4 sm:$0xff]  }
 0x23f   : > { %3317 = vmatpush1.bf16.msra.mxu1 %v7138_v47  ;;  %v7197_v47 = vld [vmem:[#allocation13 + $0x2cc] ss:$16 sps:$4 sm:$0xff]  }
 0x241   : > { %3245 = vmatpush1.bf16.msra.mxu0 %v7063_v48  ;;  %v7120_v48 = vld [vmem:[#allocation13 + $0x3a0] ss:$16 sps:$4 sm:$0xff]  }
 0x242   : > { %3246 = vmatprep.subr.bf16.mxu0 %v7068_v49  ;;  %v7143_v49 = vld [vmem:[#allocation13 + $0x8c] ss:$16 sps:$4 sm:$0xff]  }
 0x243   : > { %3318 = vmatprep.subr.bf16.mxu1 %v7143_v49  ;;  %v7201_v49 = vld [vmem:[#allocation13 + $0x308] ss:$16 sps:$4 sm:$0xff]  }
 0x245   : > { %3247 = vmatpush1.bf16.msra.mxu0 %v7066_v50  ;;  %v7125_v50 = vld [vmem:[#allocation13 + $0x3c4] ss:$16 sps:$4 sm:$0xff]  }
 0x246   : > { %3248 = vmatprep.subr.bf16.mxu0 %v7071_v51  ;;  %v7141_v51 = vld [vmem:[#allocation13 + $0x88] ss:$16 sps:$4 sm:$0xff]  }
 0x247   : > { %3319 = vmatpush1.bf16.msra.mxu1 %v7141_v51  ;;  %v7206_v51 = vld [vmem:[#allocation13 + $0x32c] ss:$16 sps:$4 sm:$0xff]  }
 0x249   : > { %3249 = vmatpush1.bf16.msra.mxu0 %v7069_v52  ;;  %v7123_v52 = vld [vmem:[#allocation13 + $0x3c0] ss:$16 sps:$4 sm:$0xff]  }
 0x24a   : > { %3250 = vmatprep.subr.bf16.mxu0 %v7074_v53  ;;  %v7146_v53 = vld [vmem:[#allocation13 + $0xac] ss:$16 sps:$4 sm:$0xff]  }
 0x24b   : > { %3320 = vmatprep.subr.bf16.mxu1 %v7146_v53  ;;  %v7207_v53 = vld [vmem:[#allocation13 + $0x348] ss:$16 sps:$4 sm:$0xff]  }
 0x24d   : > { %3251 = vmatpush1.bf16.msra.mxu0 %v7072_v54  ;;  %v7128_v54 = vld [vmem:[#allocation13 + $0x3e4] ss:$16 sps:$4 sm:$0xff]  }
 0x24e   : > { %3252 = vmatprep.subr.bf16.mxu0 %v7077_v55  ;;  %v7126_v55 = vld [vmem:[#allocation13 + $0x3e0] ss:$16 sps:$4 sm:$0xff]  }
 0x251   : > { %3253 = vmatpush1.bf16.msra.mxu0 %v7075_v56  ;;  %v7144_v56 = vld [vmem:[#allocation13 + $0xa8] ss:$16 sps:$4 sm:$0xff]  }
 0x252   : > { %3254 = vmatprep.subr.bf16.mxu0 %v7080_v57  ;;  %v564_v57 = vld [vmem:[%s8290_s13 + $0x10] sm:$0xff]  ;;  %3321 = vmatpush1.bf16.msra.mxu1 %v7144_v56  ;;  %v7210_v56 = vld [vmem:[#allocation13 + $0x368] ss:$16 sps:$4 sm:$0xff]  }
 0x253   : > { %3322 = vmatprep.subr.bf16.mxu1 %v7149_v59  ;;  %v7218_v59 = vld [vmem:[#allocation13 + $0x3ac] ss:$16 sps:$4 sm:$0xff]  }
 0x255   : > { %3255 = vmatpush1.bf16.msra.mxu0 %v7078_v58  ;;  %v568_v58 = vld [vmem:[%s8290_s13 + $0x30] sm:$0xff]  ;;  %s7729_s13 = sshll.u32 %s7868_s9, 4  ;;  %s7730_s13 = int_to_ptr.vmem [resolvable:$false] %s7729_s13 }
 0x256   : > { %3267 = vmatprep.subr.bf16.mxu0 %v7083_v61  ;;  %v8350_v60 = vpack.c.bf16 %v568_v58, %v564_v57  ;;  %v7147_v61 = vld [vmem:[#allocation13 + $0xc8] ss:$16 sps:$4 sm:$0xff]   ;;  %v7215_v58 = vld [vmem:[#allocation13 + $0x38c] ss:$16 sps:$4 sm:$0xff]   ;;  %s7731_s16 = scalar_lea.vmem %s7730_s13, 512  ;;  %p7732_p3 = scmp.lt.s32.totalorder %s8800_s27, %s7730_s13 }
 0x257   : > { %3323 = vmatpush1.bf16.msra.mxu1 %v7147_v61  ;;  %v7213_v57 = vld [vmem:[#allocation13 + $0x388] ss:$16 sps:$4 sm:$0xff]   ;;  %p7733_p5 = scmp.lt.s32.totalorder %s7731_s16, %s7725_s1 }
 0x258   : > { %3257 = vmatmul.mubr.bf16.vlgmr.msra.gmra.mrb[8].mxu0 %v8334_v0  ;;  %3324 = vmatprep.subr.bf16.mxu1 %v7152_v62  ;;  %v7216_v61 = vld [vmem:[#allocation13 + $0x3a8] ss:$16 sps:$4 sm:$0xff]  }
 0x259   : > { %3268 = vmatpush1.bf16.msra.mxu0 %v7081_v1  ;;  %3299 = vmatprep.mubr.bf16.mxu0 %v8336_v2  ;;  %v7150_v1 = vld [vmem:[#allocation13 + $0xe8] ss:$16 sps:$4 sm:$0xff]   ;;  %p7734_p8 = por %p7733_p5, %p7732_p3 }
 0x25a   : > { %3269 = vmatprep.subr.bf16.mxu0 %v7086_v3  ;;  %v7155_v3 = vld [vmem:[#allocation13 + $0x10c] ss:$16 sps:$4 sm:$0xff]   ;;  %v7219_v62 = vld [vmem:[#allocation13 + $0x3c8] ss:$16 sps:$4 sm:$0xff]  }
 0x25b   : > { %3325 = vmatpush1.bf16.msra.mxu1 %v7150_v1  ;;  %v7221_v1 = vld [vmem:[#allocation13 + $0x3cc] ss:$16 sps:$4 sm:$0xff]   ;;  %p7735_p6 = pnand %p7734_p8, %p7728_p1 }
 0x25c   : > { %3326 = vmatprep.subr.bf16.mxu1 %v7155_v3  ;;  %v7224_v3 = vld [vmem:[#allocation13 + $0x3ec] ss:$16 sps:$4 sm:$0xff]  }
 0x25d   : > { %3270 = vmatpush1.bf16.msra.mxu0 %v7084_v4  ;;  %v7153_v4 = vld [vmem:[#allocation13 + $0x108] ss:$16 sps:$4 sm:$0xff]  }
 0x25e   : > { %3271 = vmatprep.subr.bf16.mxu0 %v7089_v5  ;;  %v7158_v5 = vld [vmem:[#allocation13 + $0x12c] ss:$16 sps:$4 sm:$0xff]  }
 0x25f   : > { %3327 = vmatpush1.bf16.msra.mxu1 %v7153_v4  ;;  %v7222_v4 = vld [vmem:[#allocation13 + $0x3e8] ss:$16 sps:$4 sm:$0xff]  }
 0x260   : > { %3328 = vmatprep.subr.bf16.mxu1 %v7158_v5 }
 0x261   : > { %3272 = vmatpush1.bf16.msra.mxu0 %v7087_v6  ;;  %v7156_v6 = vld [vmem:[#allocation13 + $0x128] ss:$16 sps:$4 sm:$0xff]  }
 0x262   : > { %3273 = vmatprep.subr.bf16.mxu0 %v7092_v7  ;;  %v7161_v7 = vld [vmem:[#allocation13 + $0x14c] ss:$16 sps:$4 sm:$0xff]  }
 0x263   : > { %3329 = vmatpush1.bf16.msra.mxu1 %v7156_v6 }
 0x264   : > { %3330 = vmatprep.subr.bf16.mxu1 %v7161_v7 }
 0x265   : > { %3274 = vmatpush1.bf16.msra.mxu0 %v7090_v8  ;;  %v7159_v8 = vld [vmem:[#allocation13 + $0x148] ss:$16 sps:$4 sm:$0xff]  }
 0x266   : > { %3275 = vmatprep.subr.bf16.mxu0 %v7095_v9  ;;  %v7164_v9 = vld [vmem:[#allocation13 + $0x16c] ss:$16 sps:$4 sm:$0xff]  }
 0x267   : > { %3331 = vmatpush1.bf16.msra.mxu1 %v7159_v8 }
 0x268   : > { %3332 = vmatprep.subr.bf16.mxu1 %v7164_v9 }
 0x269   : > { %3276 = vmatpush1.bf16.msra.mxu0 %v7093_v10  ;;  %v7162_v10 = vld [vmem:[#allocation13 + $0x168] ss:$16 sps:$4 sm:$0xff]  }
 0x26a   : > { %3277 = vmatprep.subr.bf16.mxu0 %v7098_v11  ;;  %v7167_v11 = vld [vmem:[#allocation13 + $0x18c] ss:$16 sps:$4 sm:$0xff]  }
 0x26b   : > { %v1421_v14 = vpop.f32.mrb[0].mxu0  ;;  %3333 = vmatpush1.bf16.msra.mxu1 %v7162_v10 }
 0x26c   : > { %v1423_v15 = vpop.f32.mrb[1].mxu0  ;;  %v1507_v16 = vpop.f32.mrb[0].mxu1  ;;  %3334 = vmatprep.subr.bf16.mxu1 %v7167_v11 }
 0x26d   : > { %v1425_v17 = vpop.f32.mrb[2].mxu0  ;;  %3278 = vmatpush1.bf16.msra.mxu0 %v7096_v12  ;;  %v1509_v20 = vpop.f32.mrb[1].mxu1  ;;  %v7165_v12 = vld [vmem:[#allocation13 + $0x188] ss:$16 sps:$4 sm:$0xff]  }
 0x26e   : > { %v8340_v19 = vpack.c.bf16 %v1425_v17, %v1421_v14  ;;  %v1427_v21 = vpop.f32.mrb[3].mxu0  ;;  %3279 = vmatprep.subr.bf16.mxu0 %v7101_v13  ;;  %v1511_v24 = vpop.f32.mrb[2].mxu1  ;;  %v7170_v13 = vld [vmem:[#allocation13 + $0x1ac] ss:$16 sps:$4 sm:$0xff]   ;;  %v7168_v14 = vld [vmem:[#allocation13 + $0x1a8] ss:$16 sps:$4 sm:$0xff]  }
 0x26f   : > { %v8342_v23 = vpack.c.bf16 %v1427_v21, %v1423_v15  ;;  %v8344_v25 = vpack.c.bf16 %v1511_v24, %v1507_v16  ;;  %v1513_v26 = vpop.f32.mrb[3].mxu1  ;;  %3335 = vmatpush1.bf16.msra.mxu1 %v7165_v12  ;;  %v7173_v15 = vld [vmem:[#allocation13 + $0x1cc] ss:$16 sps:$4 sm:$0xff]   ;;  %v7171_v16 = vld [vmem:[#allocation13 + $0x1c8] ss:$16 sps:$4 sm:$0xff]  }
 0x270   : > { %v8346_v27 = vpack.c.bf16 %v1513_v26, %v1509_v20  ;;  %3336 = vmatprep.subr.bf16.mxu1 %v7170_v13  ;;  %v7176_v17 = vld [vmem:[#allocation13 + $0x1ec] ss:$16 sps:$4 sm:$0xff]   ;;  %v7177_v20 = vld [vmem:[#allocation13 + $0x208] ss:$16 sps:$4 sm:$0xff]  }
 0x271   : > { %3280 = vmatpush1.bf16.msra.mxu0 %v7099_v18  ;;  %v7174_v18 = vld [vmem:[#allocation13 + $0x1e8] ss:$16 sps:$4 sm:$0xff]   ;;  %v7179_v21 = vld [vmem:[#allocation13 + $0x20c] ss:$16 sps:$4 sm:$0xff]  }
 0x272   : > { %3281 = vmatprep.subr.bf16.mxu0 %v7104_v22  ;;  %v7180_v22 = vld [vmem:[#allocation13 + $0x228] ss:$16 sps:$4 sm:$0xff]   ;;  %v7182_v24 = vld [vmem:[#allocation13 + $0x22c] ss:$16 sps:$4 sm:$0xff]  }
 0x273   : > { %3337 = vmatpush1.bf16.msra.mxu1 %v7168_v14 }
 0x274   : > { %3338 = vmatprep.subr.bf16.mxu1 %v7173_v15 }
 0x275   : > { %3282 = vmatpush1.bf16.msra.mxu0 %v7102_v28 }
 0x276   : > { %3283 = vmatprep.subr.bf16.mxu0 %v7107_v29  ;;  %v7183_v29 = vld [vmem:[#allocation13 + $0x248] ss:$16 sps:$4 sm:$0xff]  }
 0x277   : > { %3339 = vmatpush1.bf16.msra.mxu1 %v7171_v16 }
 0x278   : > { %3340 = vmatprep.subr.bf16.mxu1 %v7176_v17 }
 0x279   : > { %3284 = vmatpush1.bf16.msra.mxu0 %v7105_v30  ;;  %v7185_v30 = vld [vmem:[#allocation13 + $0x24c] ss:$16 sps:$4 sm:$0xff]  }
 0x27a   : > { %3285 = vmatprep.subr.bf16.mxu0 %v7110_v31 }
 0x27b   : > { %3341 = vmatpush1.bf16.msra.mxu1 %v7174_v18 }
 0x27c   : > { %3353 = vmatprep.subr.bf16.mxu1 %v7179_v21 }
 0x27d   : > { %3286 = vmatpush1.bf16.msra.mxu0 %v7108_v32 }
 0x27e   : > { %3287 = vmatprep.subr.bf16.mxu0 %v7113_v33  ;;  %3343 = vmatmul.mubr.bf16.vlgmr.msra.gmra.mrb[8].mxu1 %v8334_v0 }
 0x27f   : > { %3385 = vmatprep.mubr.bf16.mxu1 %v8336_v2  ;;  %3354 = vmatpush1.bf16.msra.mxu1 %v7177_v20 }
 0x280   : > { %3355 = vmatprep.subr.bf16.mxu1 %v7182_v24 }
 0x281   : > { %3288 = vmatpush1.bf16.msra.mxu0 %v7111_v34 }
 0x282   : > { %3289 = vmatprep.subr.bf16.mxu0 %v7116_v37  ;;  %v7188_v37 = vld [vmem:[#allocation13 + $0x26c] ss:$16 sps:$4 sm:$0xff]  }
 0x283   : > { %3356 = vmatpush1.bf16.msra.mxu1 %v7180_v22 }
 0x284   : > { %3357 = vmatprep.subr.bf16.mxu1 %v7185_v30 }
 0x285   : > { %3290 = vmatpush1.bf16.msra.mxu0 %v7114_v40 }
 0x286   : > { %3291 = vmatprep.subr.bf16.mxu0 %v7119_v42  ;;  %v7189_v42 = vld [vmem:[#allocation13 + $0x288] ss:$16 sps:$4 sm:$0xff]  }
 0x287   : > { %3358 = vmatpush1.bf16.msra.mxu1 %v7183_v29 }
 0x288   : > { %3359 = vmatprep.subr.bf16.mxu1 %v7188_v37 }
 0x289   : > { %3292 = vmatpush1.bf16.msra.mxu0 %v7117_v44  ;;  %v7194_v44 = vld [vmem:[#allocation13 + $0x2ac] ss:$16 sps:$4 sm:$0xff]  }
 0x28a   : > { %3293 = vmatprep.subr.bf16.mxu0 %v7122_v46  ;;  %v7195_v46 = vld [vmem:[#allocation13 + $0x2c8] ss:$16 sps:$4 sm:$0xff]  }
 0x28b   : > { %3360 = vmatpush1.bf16.msra.mxu1 %v7186_v36 }
 0x28c   : > { %3361 = vmatprep.subr.bf16.mxu1 %v7191_v43 }
 0x28d   : > { %3294 = vmatpush1.bf16.msra.mxu0 %v7120_v48  ;;  %v7200_v48 = vld [vmem:[#allocation13 + $0x2ec] ss:$16 sps:$4 sm:$0xff]  }
 0x28e   : > { %3295 = vmatprep.subr.bf16.mxu0 %v7125_v50  ;;  %v7203_v50 = vld [vmem:[#allocation13 + $0x30c] ss:$16 sps:$4 sm:$0xff]  }
 0x28f   : > { %3362 = vmatpush1.bf16.msra.mxu1 %v7189_v42 }
 0x290   : > { %3363 = vmatprep.subr.bf16.mxu1 %v7194_v44 }
 0x291   : > { %3296 = vmatpush1.bf16.msra.mxu0 %v7123_v52  ;;  %v7204_v52 = vld [vmem:[#allocation13 + $0x328] ss:$16 sps:$4 sm:$0xff]  }
 0x292   : > { %3297 = vmatprep.subr.bf16.mxu0 %v7128_v54  ;;  %v7209_v54 = vld [vmem:[#allocation13 + $0x34c] ss:$16 sps:$4 sm:$0xff]  }
 0x293   : > { %3364 = vmatpush1.bf16.msra.mxu1 %v7192_v45 }
 0x294   : > { %3365 = vmatprep.subr.bf16.mxu1 %v7197_v47 }
 0x295   : > { %3298 = vmatpush1.bf16.msra.mxu0 %v7126_v55  ;;  %v7212_v55 = vld [vmem:[#allocation13 + $0x36c] ss:$16 sps:$4 sm:$0xff]  }
 0x296   : > { %6368 = vmatprep.subr.bf16.mxu0 %v7859_v63 }
 0x297   : > { %3366 = vmatpush1.bf16.msra.mxu1 %v7195_v46 }
 0x298   : > { %3300 = vmatmul.mubr.bf16.vlgmr.msra.gmra.mrb[8].mxu0 %v8350_v60  ;;  %3367 = vmatprep.subr.bf16.mxu1 %v7200_v48 }
 0x299   : > { %6370 = vmatprep.mubr.msk.bf16.mxu0 %vm7860_vm0, %v7859_v63 }
 0x2eb   : > { %v2361_v26 = vpop.f32.mrb[4].mxu0 }
 0x2ec   : > { %v2363_v28 = vpop.f32.mrb[5].mxu0 }
 0x2ed   : > { %v2447_v31 = vpop.f32.mrb[4].mxu1  ;;  %v2365_v32 = vpop.f32.mrb[6].mxu0 }
 0x2ee   : > { %v3401_v33 = vpack.c.bf16 %v2365_v32, %v2361_v26  ;;  %v2449_v34 = vpop.f32.mrb[5].mxu1  ;;  %v2367_v0 = vpop.f32.mrb[7].mxu0  ;;  %v574_v26 = vld [vmem:[%s8294_s8] sm:$0xff] }
 0x2ef   : > { %v8358_v2 = vpack.c.bf16 %v2367_v0, %v2363_v28  ;;  %v2451_v35 = vpop.f32.mrb[6].mxu1  ;;  %v575_v28 = vld [vmem:[%s8294_s8 + $0x8] sm:$0xff]  ;;  %vm3396_vm2 = vcmp.eq.f32.partialorder %v574_v26, 0.0 }
 0x2f0   : > { %v3408_v38 = vsel %vm3403_vm1, %v3401_v33, 0  ;;  %v8361_v39 = vpack.c.bf16 %v2451_v35, %v2447_v31  ;;  %v2453_v40 = vpop.f32.mrb[7].mxu1  ;;  %3527 = vrot.lane.b32.xlu0 %v3401_v33, %s7861_s4  ;;  %vm3397_vm3 = vcmp.eq.f32.partialorder %v575_v28, 0.0  ;;  %v8436_v30 = vsel %vm3396_vm2, -1e+09, %v7859_v63 }
 0x2f1   : > { %v8364_v41 = vpack.c.bf16 %v2453_v40, %v2449_v34  ;;  %6369 = vmatpush3.bf16.xpose.msra.mxu0 %v3408_v38  ;;  %3776 = vrot.lane.b32.xlu1 %v8358_v2, %s7861_s4  ;;  %v3658_v8 = vsel %vm3403_vm1, %v8358_v2, 0 }
 0x2f2   : > { %6380 = vmatprep.subr.bf16.mxu0 %v7859_v63  ;;  %v3907_v17 = vsel %vm3403_vm1, %v8361_v39, 0 }
 0x2f3   : > { %v4156_v21 = vsel %vm3403_vm1, %v8364_v41, 0 }
 0x2f4   : > { %3524 = vrot.lane.b32.xlu0 %v8340_v19, %s7861_s4 }
 0x2f5   : > { %3773 = vrot.lane.b32.xlu1 %v8342_v23, %s7861_s4 }
 0x2f8   : > { %4025 = vrot.lane.b32.xlu0 %v8361_v39, %s7861_s4  ;;  %6371 = vmatmul.mubr.msk.bf16.vlgmr.msra.gmra.mrb[12].mxu0 %vm3403_vm1, %v8340_v19  ;;  %v7198_v19 = vld [vmem:[#allocation13 + $0x2e8] ss:$16 sps:$4 sm:$0xff]  }
 0x2f9   : > { %4022 = vrot.lane.b32.xlu1 %v8344_v25, %s7861_s4  ;;  %6382 = vmatprep.mubr.msk.bf16.mxu0 %vm7860_vm0, %v7859_v63 }
 0x2fa   : > { %3368 = vmatpush1.bf16.msra.mxu1 %v7198_v19 }
 0x2fb   : > { %3369 = vmatprep.subr.bf16.mxu1 %v7203_v50 }
 0x2fc   : > { %4274 = vrot.lane.b32.xlu0 %v8364_v41, %s7861_s4 }
 0x2fd   : > { %4271 = vrot.lane.b32.xlu1 %v8346_v27, %s7861_s4 }
 0x2fe   : > { %3370 = vmatpush1.bf16.msra.mxu1 %v7201_v49 }
 0x2ff   : > { %3371 = vmatprep.subr.bf16.mxu1 %v7206_v51 }
 0x302   : > { %3372 = vmatpush1.bf16.msra.mxu1 %v7204_v52 }
 0x303   : > { %3373 = vmatprep.subr.bf16.mxu1 %v7209_v54 }
 0x306   : > { %3374 = vmatpush1.bf16.msra.mxu1 %v7207_v53 }
 0x307   : > { %3375 = vmatprep.subr.bf16.mxu1 %v7212_v55 }
 0x30a   : > { %3376 = vmatpush1.bf16.msra.mxu1 %v7210_v56 }
 0x30b   : > { %3377 = vmatprep.subr.bf16.mxu1 %v7215_v58 }
 0x30e   : > { %3378 = vmatpush1.bf16.msra.mxu1 %v7213_v57 }
 0x30f   : > { %3379 = vmatprep.subr.bf16.mxu1 %v7218_v59 }
 0x312   : > { %3380 = vmatpush1.bf16.msra.mxu1 %v7216_v61 }
 0x313   : > { %3381 = vmatprep.subr.bf16.mxu1 %v7221_v1 }
 0x316   : > { %3382 = vmatpush1.bf16.msra.mxu1 %v7219_v62 }
 0x317   : > { %3383 = vmatprep.subr.bf16.mxu1 %v7224_v3 }
 0x31a   : > { %3384 = vmatpush1.bf16.msra.mxu1 %v7222_v4 }
 0x31b   : > { %6374 = vmatprep.subr.bf16.mxu1 %v7859_v63 }
 0x31d   : > { %3386 = vmatmul.mubr.bf16.vlgmr.msra.gmra.mrb[8].mxu1 %v8350_v60 }
 0x31e   : > { %6376 = vmatprep.mubr.msk.bf16.mxu1 %vm7860_vm0, %v7859_v63 }
 0x362   : > { %v3528_v5 = vpop.permute.xlu0 %3527 }
 0x363   : > { %v3533_v6 = vsel %vm3403_vm1, %v3528_v5, 0  ;;  %v3777_v14 = vpop.permute.xlu1 %3776 }
 0x364   : > { %6381 = vmatpush3.bf16.xpose.msra.mxu0 %v3533_v6  ;;  %v3782_v15 = vsel %vm3403_vm1, %v3777_v14, 0 }
 0x365   : > { %6392 = vmatprep.subr.bf16.mxu0 %v7859_v63 }
 0x366   : > { %v3525_v7 = vpop.permute.xlu0 %3524 }
 0x367   : > { %v3774_v16 = vpop.permute.xlu1 %3773 }
 0x36a   : > { %v4026_v18 = vpop.permute.xlu0 %4025 }
 0x36b   : > { %6383 = vmatmul.mubr.msk.bf16.vlgmr.msra.gmra.mrb[16].mxu0 %vm3403_vm1, %v3525_v7  ;;  %v3301_v9 = vpop.f32.mrb[8].mxu0  ;;  %v4023_v20 = vpop.permute.xlu1 %4022 }
 0x36c   : > { %6393 = vmatpush3.bf16.xpose.msra.mxu0 %v3658_v8  ;;  %6394 = vmatprep.mubr.msk.bf16.mxu0 %vm7860_vm0, %v7859_v63  ;;  %v3303_v60 = vpop.f32.mrb[9].mxu0 }
 0x36d   : > { %6404 = vmatprep.subr.bf16.mxu0 %v7859_v63  ;;  %v3305_v10 = vpop.f32.mrb[10].mxu0 }
 0x36e   : > { %v8397_v11 = vpack.c.bf16 %v3305_v10, %v3301_v9  ;;  %v3307_v12 = vpop.f32.mrb[11].mxu0 }
 0x36f   : > { %v8399_v13 = vpack.c.bf16 %v3307_v12, %v3303_v60  ;;  %v4272_v24 = vpop.permute.xlu1 %4271 }
 0x370   : > { %6375 = vmatpush3.bf16.msra.mxu1 %v8397_v11 }
 0x371   : > { %6386 = vmatprep.subr.bf16.mxu1 %v7859_v63 }
 0x373   : > { %6395 = vmatmul.mubr.msk.bf16.vlgmr.msra.gmra.mrb[20].mxu0 %vm3403_vm1, %v8342_v23  ;;  %v4031_v23 = vsel %vm3403_vm1, %v4026_v18, 0 }
 0x374   : > { %6405 = vmatpush3.bf16.xpose.msra.mxu0 %v3782_v15  ;;  %6406 = vmatprep.mubr.msk.bf16.mxu0 %vm7860_vm0, %v7859_v63 }
 0x375   : > { %6416 = vmatprep.subr.bf16.mxu0 %v7859_v63 }
 0x37b   : > { %6407 = vmatmul.mubr.msk.bf16.vlgmr.msra.gmra.mrb[24].mxu0 %vm3403_vm1, %v3774_v16 }
 0x37c   : > { %6417 = vmatpush3.bf16.xpose.msra.mxu0 %v3907_v17  ;;  %6418 = vmatprep.mubr.msk.bf16.mxu0 %vm7860_vm0, %v7859_v63 }
 0x37d   : > { %6428 = vmatprep.subr.bf16.mxu0 %v7859_v63 }
 0x383   : > { %6419 = vmatmul.mubr.msk.bf16.vlgmr.msra.gmra.mrb[28].mxu0 %vm3403_vm1, %v8344_v25  ;;  %v4275_v25 = vpop.permute.xlu0 %4274 }
 0x384   : > { %6429 = vmatpush3.bf16.xpose.msra.mxu0 %v4031_v23  ;;  %6430 = vmatprep.mubr.msk.bf16.mxu0 %vm7860_vm0, %v7859_v63  ;;  %v4280_v22 = vsel %vm3403_vm1, %v4275_v25, 0 }
 0x385   : > { %6440 = vmatprep.subr.bf16.mxu0 %v7859_v63 }
 0x38b   : > { %6431 = vmatmul.mubr.msk.bf16.vlgmr.msra.gmra.mrb[32].mxu0 %vm3403_vm1, %v4023_v20 }
 0x38c   : > { %6441 = vmatpush3.bf16.xpose.msra.mxu0 %v4156_v21  ;;  %6442 = vmatprep.mubr.msk.bf16.mxu0 %vm7860_vm0, %v7859_v63 }
 0x38d   : > { %6452 = vmatprep.subr.bf16.mxu0 %v7859_v63 }
 0x393   : > { %6443 = vmatmul.mubr.msk.bf16.vlgmr.msra.gmra.mrb[36].mxu0 %vm3403_vm1, %v8346_v27  ;;  %v8439_v27 = vsel %vm3397_vm3, -1e+09, %v7859_v63 }
 0x394   : > { %6453 = vmatpush3.bf16.xpose.msra.mxu0 %v4280_v22  ;;  %6454 = vmatprep.mubr.msk.bf16.mxu0 %vm7860_vm0, %v7859_v63 }
 0x39b   : > { %6455 = vmatmul.mubr.msk.bf16.vlgmr.msra.gmra.mrb[40].mxu0 %vm3403_vm1, %v4272_v24 }
 0x3cb   : > { %v3444_v29 = vpop.f32.mrb[12].mxu0 }
 0x3cc   : > { %v3451_v31 = vmul.f32 0.125, %v3444_v29  ;;  %v6372_v32 = vpop.f32.mrb[13].mxu0 }
 0x3cd   : > { %v3447_v33 = vpop.f32.mrb[14].mxu0 }
 0x3ce   : > { %v3452_v34 = vmul.f32 0.125, %v3447_v33  ;;  %v6373_v0 = vpop.f32.mrb[15].mxu0  ;;  %v3453_v2 = vadd.f32 %v3451_v31, %v8436_v30 }
 0x3d0   : > { %v3456_v35 = vsel %vm3455_vm4, %v3453_v2, -inf  ;;  %v8444_v36 = vadd.f32 %v3452_v34, %v8439_v27 }
 0x3d1   : > { %3457 = vmax.xlane.f32.xlu0 %v3456_v35 }
 0x3d2   : > { %v3459_v37 = vsel %vm3455_vm4, %v8444_v36, -inf }
 0x3d3   : > { %3460 = vmax.xlane.f32.xlu1 %v3459_v37 }
 0x43e   : > { %v3569_v38 = vpop.f32.mrb[16].mxu0 }
 0x43f   : > { %v3576_v39 = vmul.f32 0.125, %v3569_v38  ;;  %v6384_v40 = vpop.f32.mrb[17].mxu0 }
 0x440   : > { %v3572_v41 = vpop.f32.mrb[18].mxu0 }
 0x441   : > { %v3577_v42 = vmul.f32 0.125, %v3572_v41  ;;  %v6385_v43 = vpop.f32.mrb[19].mxu0  ;;  %v8449_v44 = vadd.f32 %v3576_v39, %v8436_v30 }
 0x443   : > { %v3580_v45 = vsel %vm3455_vm4, %v8449_v44, -inf  ;;  %v8454_v46 = vadd.f32 %v3577_v42, %v8439_v27 }
 0x444   : > { %3581 = vmax.xlane.f32.xlu0 %v3580_v45 }
 0x445   : > { %v3583_v49 = vsel %vm3455_vm4, %v8454_v46, -inf }
 0x446   : > { %v3694_v47 = vpop.f32.mrb[20].mxu0 }
 0x447   : > { %v3701_v48 = vmul.f32 0.125, %v3694_v47  ;;  %v6396_v19 = vpop.f32.mrb[21].mxu0 }
 0x448   : > { %3584 = vmax.xlane.f32.xlu0 %v3583_v49  ;;  %v3697_v50 = vpop.f32.mrb[22].mxu0 }
 0x449   : > { %v3702_v51 = vmul.f32 0.125, %v3697_v50  ;;  %v6397_v52 = vpop.f32.mrb[23].mxu0  ;;  %v8459_v53 = vadd.f32 %v3701_v48, %v8436_v30 }
 0x44b   : > { %v3705_v54 = vsel %vm3455_vm4, %v8459_v53, -inf  ;;  %v8464_v55 = vadd.f32 %v3702_v51, %v8439_v27 }
 0x44c   : > { %3706 = vmax.xlane.f32.xlu1 %v3705_v54 }
 0x44d   : > { %v3708_v56 = vsel %vm3455_vm4, %v8464_v55, -inf }
 0x44e   : > { %3709 = vmax.xlane.f32.xlu0 %v3708_v56  ;;  %v3818_v57 = vpop.f32.mrb[24].mxu0 }
 0x44f   : > { %v3825_v58 = vmul.f32 0.125, %v3818_v57  ;;  %v6408_v59 = vpop.f32.mrb[25].mxu0 }
 0x450   : > { %v3821_v61 = vpop.f32.mrb[26].mxu0 }
 0x451   : > { %v3826_v62 = vmul.f32 0.125, %v3821_v61  ;;  %v6409_v1 = vpop.f32.mrb[27].mxu0  ;;  %v8469_v3 = vadd.f32 %v3825_v58, %v8436_v30 }
 0x452   : > { %v3387_v1 = vpop.f32.mrb[8].mxu1 }
 0x453   : > { %v3829_v4 = vsel %vm3455_vm4, %v8469_v3, -inf  ;;  %v8474_v5 = vadd.f32 %v3826_v62, %v8439_v27 }
 0x454   : > { %3830 = vmax.xlane.f32.xlu1 %v3829_v4  ;;  %v3389_v4 = vpop.f32.mrb[9].mxu1 }
 0x455   : > { %v3832_v6 = vsel %vm3455_vm4, %v8474_v5, -inf }
 0x456   : > { %3833 = vmax.xlane.f32.xlu0 %v3832_v6  ;;  %v3943_v7 = vpop.f32.mrb[28].mxu0  ;;  %v3391_v6 = vpop.f32.mrb[10].mxu1 }
 0x457   : > { %v3950_v8 = vmul.f32 0.125, %v3943_v7  ;;  %v6420_v9 = vpop.f32.mrb[29].mxu0  ;;  %v8527_v7 = vpack.c.bf16 %v3391_v6, %v3387_v1 }
 0x458   : > { %v3946_v60 = vpop.f32.mrb[30].mxu0 }
 0x459   : > { %v3951_v10 = vmul.f32 0.125, %v3946_v60  ;;  %v6421_v12 = vpop.f32.mrb[31].mxu0  ;;  %v8479_v14 = vadd.f32 %v3950_v8, %v8436_v30  ;;  %v3393_v8 = vpop.f32.mrb[11].mxu1 }
 0x45b   : > { %v3954_v15 = vsel %vm3455_vm4, %v8479_v14, -inf  ;;  %v8484_v16 = vadd.f32 %v3951_v10, %v8439_v27 }
 0x45c   : > { %3955 = vmax.xlane.f32.xlu1 %v3954_v15 }
 0x45d   : > { %v3957_v17 = vsel %vm3455_vm4, %v8484_v16, -inf }
 0x45e   : > { %v3458_v18 = vpop.xlane.xlu0 %3457  ;;  %3958 = vmax.xlane.f32.xlu0 %v3957_v17  ;;  %v4067_v23 = vpop.f32.mrb[32].mxu0 }
 0x45f   : > { %v3462_v20 = vsub.f32 %v3453_v2, %v3458_v18  ;;  %v4074_v21 = vmul.f32 0.125, %v4067_v23  ;;  %v6432_v25 = vpop.f32.mrb[33].mxu0 }
 0x460   : > { %v3461_v22 = vpop.xlane.xlu1 %3460  ;;  %v4070_v24 = vpop.f32.mrb[34].mxu0 }
 0x461   : > { %v3464_v26 = vmul.f32 1.442695, %v3462_v20  ;;  %v3463_v28 = vsub.f32 %v8444_v36, %v3461_v22  ;;  %v4075_v29 = vmul.f32 0.125, %v4070_v24  ;;  %v6433_v31 = vpop.f32.mrb[35].mxu0  ;;  %v8490_v32 = vadd.f32 %v4074_v21, %v8436_v30 }
 0x463   : > { %7417 = vpow2.f32 %v3464_v26  ;;  %v3466_v33 = vmul.f32 1.442695, %v3463_v28  ;;  %v4078_v34 = vsel %vm3455_vm4, %v8490_v32, -inf  ;;  %v8495_v0 = vadd.f32 %v4075_v29, %v8439_v27 }
 0x464   : > { %4079 = vmax.xlane.f32.xlu1 %v4078_v34 }
 0x465   : > { %7419 = vpow2.f32 %v3466_v33  ;;  %v4081_v2 = vsel %vm3455_vm4, %v8495_v0, -inf }
 0x466   : > { %4082 = vmax.xlane.f32.xlu0 %v4081_v2  ;;  %v4192_v35 = vpop.f32.mrb[36].mxu0 }
 0x467   : > { %v4199_v36 = vmul.f32 0.125, %v4192_v35  ;;  %v6444_v37 = vpop.f32.mrb[37].mxu0 }
 0x468   : > { %v4195_v38 = vpop.f32.mrb[38].mxu0 }
 0x469   : > { %v4200_v39 = vmul.f32 0.125, %v4195_v38  ;;  %v6445_v40 = vpop.f32.mrb[39].mxu0  ;;  %v8500_v41 = vadd.f32 %v4199_v36, %v8436_v30 }
 0x46b   : > { %v4203_v42 = vsel %vm3455_vm4, %v8500_v41, -inf  ;;  %v8505_v43 = vadd.f32 %v4200_v39, %v8439_v27 }
 0x46c   : > { %4204 = vmax.xlane.f32.xlu1 %v4203_v42 }
 0x46d   : > { %v8507_v45 = vpop.eup %7417  ;;  %v4206_v47 = vsel %vm3455_vm4, %v8505_v43, -inf }
 0x46e   : > { %4207 = vmax.xlane.f32.xlu0 %v4206_v47  ;;  %v4316_v48 = vpop.f32.mrb[40].mxu0  ;;  %v3468_v19 = vsel %vm3455_vm4, %v8507_v45, 0.0 }
 0x46f   : > { %v8513_v49 = vpop.eup %7419  ;;  %v4323_v50 = vmul.f32 0.125, %v4316_v48  ;;  %v6456_v51 = vpop.f32.mrb[41].mxu0 }
 0x470   : > { %3469 = vadd.xlane.f32.xlu1 %v3468_v19  ;;  %v4319_v52 = vpop.f32.mrb[42].mxu0  ;;  %v3471_v54 = vsel %vm3455_vm4, %v8513_v49, 0.0 }
 0x471   : > { %v4324_v56 = vmul.f32 0.125, %v4319_v52  ;;  %v6457_v57 = vpop.f32.mrb[43].mxu0  ;;  %v8518_v58 = vadd.f32 %v4323_v50, %v8436_v30  ;;  %v8529_v30 = vpack.c.bf16 %v3393_v8, %v3389_v4 }
 0x472   : > { %3472 = vadd.xlane.f32.xlu0 %v3471_v54 }
 0x473   : > { %v4327_v59 = vsel %vm3455_vm4, %v8518_v58, -inf  ;;  %v8523_v61 = vadd.f32 %v4324_v56, %v8439_v27 }
 0x474   : > { %4328 = vmax.xlane.f32.xlu1 %v4327_v59 }
 0x475   : > { %v4330_v62 = vsel %vm3455_vm4, %v8523_v61, -inf }
 0x476   : > { %4331 = vmax.xlane.f32.xlu0 %v4330_v62 }
 0x4d1   : > { %v3582_v9 = vpop.xlane.xlu0 %3581 }
 0x4d2   : > { %v3586_v60 = vsub.f32 %v8449_v44, %v3582_v9 }
 0x4d4   : > { %v3588_v10 = vmul.f32 1.442695, %v3586_v60 }
 0x4d5   : > { %v3585_v12 = vpop.xlane.xlu0 %3584 }
 0x4d6   : > { %7421 = vpow2.f32 %v3588_v10  ;;  %v3587_v27 = vsub.f32 %v8454_v46, %v3585_v12 }
 0x4d8   : > { %v3590_v15 = vmul.f32 1.442695, %v3587_v27 }
 0x4d9   : > { %v3707_v17 = vpop.xlane.xlu1 %3706 }
 0x4da   : > { %7423 = vpow2.f32 %v3590_v15  ;;  %v3711_v18 = vsub.f32 %v8459_v53, %v3707_v17 }
 0x4db   : > { %v3710_v23 = vpop.xlane.xlu0 %3709 }
 0x4dc   : > { %v3713_v20 = vmul.f32 1.442695, %v3711_v18  ;;  %v3712_v21 = vsub.f32 %v8464_v55, %v3710_v23 }
 0x4de   : > { %7425 = vpow2.f32 %v3713_v20  ;;  %v3715_v25 = vmul.f32 1.442695, %v3712_v21 }
 0x4e0   : > { %v8535_v22 = vpop.eup %7421  ;;  %7427 = vpow2.f32 %v3715_v25 }
 0x4e1   : > { %v3831_v44 = vpop.xlane.xlu1 %3830  ;;  %v3592_v24 = vsel %vm3455_vm4, %v8535_v22, 0.0 }
 0x4e2   : > { %v3835_v46 = vsub.f32 %v8469_v3, %v3831_v44  ;;  %3593 = vadd.xlane.f32.xlu1 %v3592_v24 }
 0x4e3   : > { %v3834_v26 = vpop.xlane.xlu0 %3833 }
 0x4e4   : > { %v8540_v28 = vpop.eup %7423  ;;  %v3837_v53 = vmul.f32 1.442695, %v3835_v46  ;;  %v3836_v29 = vsub.f32 %v8474_v5, %v3834_v26 }
 0x4e5   : > { %v3595_v55 = vsel %vm3455_vm4, %v8540_v28, 0.0 }
 0x4e6   : > { %7429 = vpow2.f32 %v3837_v53  ;;  %v3839_v31 = vmul.f32 1.442695, %v3836_v29  ;;  %3596 = vadd.xlane.f32.xlu0 %v3595_v55 }
 0x4e8   : > { %v8545_v33 = vpop.eup %7425  ;;  %7431 = vpow2.f32 %v3839_v31 }
 0x4e9   : > { %v3717_v34 = vsel %vm3455_vm4, %v8545_v33, 0.0  ;;  %v3956_v35 = vpop.xlane.xlu1 %3955 }
 0x4ea   : > { %v8549_v3 = vpop.eup %7427  ;;  %3718 = vadd.xlane.f32.xlu1 %v3717_v34  ;;  %v3960_v59 = vsub.f32 %v8479_v14, %v3956_v35 }
 0x4eb   : > { %v3720_v2 = vsel %vm3455_vm4, %v8549_v3, 0.0  ;;  %v3959_v38 = vpop.xlane.xlu0 %3958 }
 0x4ec   : > { %3721 = vadd.xlane.f32.xlu0 %v3720_v2  ;;  %v3962_v62 = vmul.f32 1.442695, %v3960_v59 }
 0x4f0   : > { %v8553_v5 = vpop.eup %7429 }
 0x4f1   : > { %v3841_v36 = vsel %vm3455_vm4, %v8553_v5, 0.0  ;;  %v4080_v40 = vpop.xlane.xlu1 %4079 }
 0x4f2   : > { %v8557_v37 = vpop.eup %7431  ;;  %3842 = vadd.xlane.f32.xlu1 %v3841_v36  ;;  %v4084_v1 = vsub.f32 %v8490_v32, %v4080_v40 }
 0x4f3   : > { %v3844_v39 = vsel %vm3455_vm4, %v8557_v37, 0.0  ;;  %v4083_v42 = vpop.xlane.xlu0 %4082 }
 0x4f4   : > { %3845 = vadd.xlane.f32.xlu0 %v3844_v39  ;;  %v4085_v4 = vsub.f32 %v8495_v0, %v4083_v42 }
 0x4f6   : > { %v4088_v9 = vmul.f32 1.442695, %v4085_v4 }
 0x4f9   : > { %v4205_v47 = vpop.xlane.xlu1 %4204 }
 0x4fa   : > { %v4209_v6 = vsub.f32 %v8500_v41, %v4205_v47 }
 0x4fb   : > { %v4208_v48 = vpop.xlane.xlu0 %4207 }
 0x4fc   : > { %v4210_v14 = vsub.f32 %v8505_v43, %v4208_v48  ;;  %v4211_v10 = vmul.f32 1.442695, %v4209_v6 }
 0x4fd   : > { %v3470_v19 = vpop.xlane.xlu1 %3469 }
 0x4fe   : > { %7433 = vrcp.f32 %v3470_v19  ;;  %v4213_v12 = vmul.f32 1.442695, %v4210_v14 }
 0x4ff   : > { %v3473_v50 = vpop.xlane.xlu0 %3472 }
 0x500   : > { %7435 = vrcp.f32 %v3473_v50 }
 0x501   : > { %7437 = vpow2.f32 %v3962_v62  ;;  %v4329_v8 = vpop.xlane.xlu1 %4328 }
 0x503   : > { %3604 = vrot.lane.b32.xlu1 %v8397_v11, %s7861_s4  ;;  %v3961_v11 = vsub.f32 %v8484_v16, %v3959_v38  ;;  %v4332_v60 = vpop.xlane.xlu0 %4331  ;;  %v4333_v16 = vsub.f32 %v8518_v58, %v4329_v8 }
 0x504   : > { %v4334_v32 = vsub.f32 %v8523_v61, %v4332_v60 }
 0x505   : > { %v4335_v0 = vmul.f32 1.442695, %v4333_v16 }
 0x506   : > { %v4337_v41 = vmul.f32 1.442695, %v4334_v32 }
 0x508   : > { %v7434_v51 = vpop.eup %7433 }
 0x509   : > { %v8566_v54 = vmul.f32 %v7434_v51, %v8507_v45  ;;  %v3964_v45 = vmul.f32 1.442695, %v3961_v11 }
 0x50a   : > { %3853 = vrot.lane.b32.xlu0 %v8399_v13, %s7861_s4  ;;  %v7436_v52 = vpop.eup %7435 }
 0x50b   : > { %v8569_v56 = vmul.f32 %v7436_v52, %v8513_v49  ;;  %v4086_v49 = vmul.f32 1.442695, %v4084_v1  ;;  %7439 = vpow2.f32 %v3964_v45  ;;  %v8584_v27 = vpop.eup %7437 }
 0x50c   : > { %v3966_v43 = vsel %vm3455_vm4, %v8584_v27, 0.0 }
 0x50d   : > { %v3478_v57 = vpack.c.bf16 %v8569_v56, %v8566_v54  ;;  %7441 = vpow2.f32 %v4086_v49 }
 0x50e   : > { %7443 = vpow2.f32 %v4088_v9 }
 0x50f   : > { %6377 = vmatmul.mubr.msk.bf16.vlgmr.msra.gmra.mrb[12].mxu1 %vm3455_vm4, %v3478_v57  ;;  %7445 = vpow2.f32 %v4211_v10 }
 0x510   : > { %6388 = vmatprep.mubr.msk.bf16.mxu1 %vm7860_vm0, %v7859_v63  ;;  %7447 = vpow2.f32 %v4213_v12 }
 0x511   : > { %7449 = vpow2.f32 %v4335_v0 }
 0x512   : > { %7451 = vpow2.f32 %v4337_v41 }
 0x515   : > { %v8586_v15 = vpop.eup %7439 }
 0x516   : > { %v3969_v58 = vsel %vm3455_vm4, %v8586_v15, 0.0 }
 0x517   : > { %v8590_v17 = vpop.eup %7441 }
 0x518   : > { %v8594_v61 = vpop.eup %7443  ;;  %v4090_v18 = vsel %vm3455_vm4, %v8590_v17, 0.0 }
 0x519   : > { %v8598_v23 = vpop.eup %7445  ;;  %v4093_v20 = vsel %vm3455_vm4, %v8594_v61, 0.0 }
 0x51a   : > { %v8602_v21 = vpop.eup %7447  ;;  %v4215_v25 = vsel %vm3455_vm4, %v8598_v23, 0.0 }
 0x51b   : > { %v8606_v44 = vpop.eup %7449  ;;  %v4218_v24 = vsel %vm3455_vm4, %v8602_v21, 0.0 }
 0x51c   : > { %v8610_v46 = vpop.eup %7451  ;;  %v4339_v26 = vsel %vm3455_vm4, %v8606_v44, 0.0 }
 0x51d   : > { %v4342_v53 = vsel %vm3455_vm4, %v8610_v46, 0.0 }
 0x527   : > { %3967 = vadd.xlane.f32.xlu1 %v3966_v43 }
 0x529   : > { %3970 = vadd.xlane.f32.xlu0 %v3969_v58 }
 0x52b   : > { %4091 = vadd.xlane.f32.xlu1 %v4090_v18 }
 0x52d   : > { %4094 = vadd.xlane.f32.xlu0 %v4093_v20 }
 0x52f   : > { %4216 = vadd.xlane.f32.xlu1 %v4215_v25 }
 0x531   : > { %4219 = vadd.xlane.f32.xlu0 %v4218_v24 }
 0x533   : > { %4340 = vadd.xlane.f32.xlu1 %v4339_v26  ;;  %v7227_v26 = vld [vmem:[#allocation14 + $0x4] ss:$16 sps:$4 sm:$0xff]  }
 0x534   : > { %5287 = vmatprep.subr.bf16.mxu0 %v7227_v26  ;;  %v7291_v26 = vld [vmem:[#allocation14 + $0x160] ss:$16 sps:$4 sm:$0xff]  }
 0x535   : > { %4343 = vadd.xlane.f32.xlu0 %v4342_v53  ;;  %v7230_v53 = vld [vmem:[#allocation14 + $0xc] ss:$16 sps:$4 sm:$0xff]  }
 0x544   : > { %4102 = vrot.lane.b32.xlu1 %v8527_v7, %s7861_s4 }
 0x54b   : > { %4351 = vrot.lane.b32.xlu0 %v8529_v30, %s7861_s4 }
 0x56f   : > { %v3594_v29 = vpop.xlane.xlu1 %3593 }
 0x573   : > { %v3597_v55 = vpop.xlane.xlu0 %3596 }
 0x574   : > { %7453 = vrcp.f32 %v3597_v55  ;;  %v7234_v55 = vld [vmem:[#allocation14 + $0x28] ss:$16 sps:$4 sm:$0xff]  }
 0x575   : > { %7455 = vrcp.f32 %v3594_v29  ;;  %v7228_v29 = vld [vmem:[#allocation14 + $0x8] ss:$16 sps:$4 sm:$0xff]  }
 0x577   : > { %v3719_v34 = vpop.xlane.xlu1 %3718 }
 0x579   : > { %v3722_v31 = vpop.xlane.xlu0 %3721 }
 0x57a   : > { %7457 = vrcp.f32 %v3722_v31  ;;  %v7236_v31 = vld [vmem:[#allocation14 + $0x2c] ss:$16 sps:$4 sm:$0xff]  }
 0x57b   : > { %7459 = vrcp.f32 %v3719_v34  ;;  %v7239_v34 = vld [vmem:[#allocation14 + $0x44] ss:$16 sps:$4 sm:$0xff]  }
 0x57e   : > { %v7454_v2 = vpop.eup %7453 }
 0x57f   : > { %v3843_v35 = vpop.xlane.xlu1 %3842  ;;  %v7456_v36 = vpop.eup %7455  ;;  %v8621_v38 = vmul.f32 %v7454_v2, %v8540_v28  ;;  %v7242_v2 = vld [vmem:[#allocation14 + $0x4c] ss:$16 sps:$4 sm:$0xff]  }
 0x580   : > { %v8624_v40 = vmul.f32 %v7456_v36, %v8535_v22  ;;  %v7240_v36 = vld [vmem:[#allocation14 + $0x48] ss:$16 sps:$4 sm:$0xff]  }
 0x581   : > { %v3846_v39 = vpop.xlane.xlu0 %3845 }
 0x582   : > { %7461 = vrcp.f32 %v3846_v39  ;;  %v3602_v47 = vpack.c.bf16 %v8621_v38, %v8624_v40  ;;  %v7243_v39 = vld [vmem:[#allocation14 + $0x60] ss:$16 sps:$4 sm:$0xff]  }
 0x583   : > { %v3605_v42 = vpop.permute.xlu1 %3604  ;;  %7463 = vrcp.f32 %v3843_v35  ;;  %v7237_v35 = vld [vmem:[#allocation14 + $0x40] ss:$16 sps:$4 sm:$0xff]  }
 0x584   : > { %6387 = vmatpush3.bf16.msra.mxu1 %v3605_v42  ;;  %v7458_v48 = vpop.eup %7457  ;;  %v7245_v42 = vld [vmem:[#allocation14 + $0x64] ss:$16 sps:$4 sm:$0xff]  }
 0x585   : > { %6398 = vmatprep.subr.bf16.mxu1 %v7859_v63  ;;  %v7460_v19 = vpop.eup %7459  ;;  %v8634_v22 = vmul.f32 %v7458_v48, %v8549_v3  ;;  %v3854_v52 = vpop.permute.xlu0 %3853  ;;  %v7248_v48 = vld [vmem:[#allocation14 + $0x6c] ss:$16 sps:$4 sm:$0xff]  }
 0x586   : > { %v8638_v28 = vmul.f32 %v7460_v19, %v8545_v33  ;;  %v7251_v19 = vld [vmem:[#allocation14 + $0x84] ss:$16 sps:$4 sm:$0xff]  }
 0x587   : > { %6389 = vmatmul.mubr.msk.bf16.vlgmr.msra.gmra.mrb[16].mxu1 %vm3455_vm4, %v3602_v47  ;;  %v7246_v47 = vld [vmem:[#allocation14 + $0x68] ss:$16 sps:$4 sm:$0xff]  }
 0x588   : > { %6399 = vmatpush3.bf16.msra.mxu1 %v8399_v13  ;;  %6400 = vmatprep.mubr.msk.bf16.mxu1 %vm7860_vm0, %v7859_v63  ;;  %v3727_v50 = vpack.c.bf16 %v8634_v22, %v8638_v28 }
 0x589   : > { %6410 = vmatprep.subr.bf16.mxu1 %v7859_v63 }
 0x58c   : > { %v7462_v51 = vpop.eup %7461 }
 0x58d   : > { %v7464_v57 = vpop.eup %7463  ;;  %v8646_v13 = vmul.f32 %v7462_v51, %v8557_v37  ;;  %v7249_v51 = vld [vmem:[#allocation14 + $0x80] ss:$16 sps:$4 sm:$0xff]  }
 0x58e   : > { %v8650_v33 = vmul.f32 %v7464_v57, %v8553_v5  ;;  %v7257_v57 = vld [vmem:[#allocation14 + $0xa4] ss:$16 sps:$4 sm:$0xff]  }
 0x58f   : > { %6401 = vmatmul.mubr.msk.bf16.vlgmr.msra.gmra.mrb[20].mxu1 %vm3455_vm4, %v3727_v50  ;;  %v7254_v50 = vld [vmem:[#allocation14 + $0x8c] ss:$16 sps:$4 sm:$0xff]  }
 0x590   : > { %6411 = vmatpush3.bf16.msra.mxu1 %v3854_v52  ;;  %6412 = vmatprep.mubr.msk.bf16.mxu1 %vm7860_vm0, %v7859_v63  ;;  %v3851_v3 = vpack.c.bf16 %v8646_v13, %v8650_v33  ;;  %v7252_v52 = vld [vmem:[#allocation14 + $0x88] ss:$16 sps:$4 sm:$0xff]  }
 0x591   : > { %6422 = vmatprep.subr.bf16.mxu1 %v7859_v63 }
 0x597   : > { %6413 = vmatmul.mubr.msk.bf16.vlgmr.msra.gmra.mrb[24].mxu1 %vm3455_vm4, %v3851_v3  ;;  %v7260_v3 = vld [vmem:[#allocation14 + $0xac] ss:$16 sps:$4 sm:$0xff]  }
 0x598   : > { %6423 = vmatpush3.bf16.msra.mxu1 %v8527_v7  ;;  %6424 = vmatprep.mubr.msk.bf16.mxu1 %vm7860_vm0, %v7859_v63 }
 0x599   : > { %6434 = vmatprep.subr.bf16.mxu1 %v7859_v63 }
 0x5b4   : > { %v3968_v59 = vpop.xlane.xlu1 %3967 }
 0x5b5   : > { %7465 = vrcp.f32 %v3968_v59  ;;  %v7255_v59 = vld [vmem:[#allocation14 + $0xa0] ss:$16 sps:$4 sm:$0xff]  }
 0x5b6   : > { %v3971_v37 = vpop.xlane.xlu0 %3970 }
 0x5b7   : > { %7467 = vrcp.f32 %v3971_v37  ;;  %v7258_v37 = vld [vmem:[#allocation14 + $0xa8] ss:$16 sps:$4 sm:$0xff]  }
 0x5b8   : > { %v4092_v11 = vpop.xlane.xlu1 %4091 }
 0x5ba   : > { %v4095_v62 = vpop.xlane.xlu0 %4094 }
 0x5bb   : > { %7469 = vrcp.f32 %v4095_v62  ;;  %v7266_v62 = vld [vmem:[#allocation14 + $0xcc] ss:$16 sps:$4 sm:$0xff]  }
 0x5bc   : > { %v4217_v5 = vpop.xlane.xlu1 %4216  ;;  %7471 = vrcp.f32 %v4092_v11  ;;  %v7263_v11 = vld [vmem:[#allocation14 + $0xc4] ss:$16 sps:$4 sm:$0xff]  }
 0x5be   : > { %v4220_v45 = vpop.xlane.xlu0 %4219 }
 0x5bf   : > { %v7466_v1 = vpop.eup %7465  ;;  %7473 = vrcp.f32 %v4220_v45  ;;  %v7269_v45 = vld [vmem:[#allocation14 + $0xe4] ss:$16 sps:$4 sm:$0xff]  }
 0x5c0   : > { %v4341_v4 = vpop.xlane.xlu1 %4340  ;;  %v8660_v7 = vmul.f32 %v7466_v1, %v8584_v27  ;;  %7475 = vrcp.f32 %v4217_v5  ;;  %v7261_v5 = vld [vmem:[#allocation14 + $0xc0] ss:$16 sps:$4 sm:$0xff]   ;;  %v7264_v1 = vld [vmem:[#allocation14 + $0xc8] ss:$16 sps:$4 sm:$0xff]  }
 0x5c1   : > { %v7468_v49 = vpop.eup %7467 }
 0x5c2   : > { %v8663_v6 = vmul.f32 %v7468_v49, %v8586_v15  ;;  %v4344_v16 = vpop.xlane.xlu0 %4343  ;;  %v7267_v49 = vld [vmem:[#allocation14 + $0xe0] ss:$16 sps:$4 sm:$0xff]  }
 0x5c3   : > { %7477 = vrcp.f32 %v4344_v16  ;;  %v7276_v16 = vld [vmem:[#allocation14 + $0x108] ss:$16 sps:$4 sm:$0xff]  }
 0x5c4   : > { %v4103_v8 = vpop.permute.xlu1 %4102  ;;  %v3976_v9 = vpack.c.bf16 %v8663_v6, %v8660_v7  ;;  %7479 = vrcp.f32 %v4341_v4  ;;  %v7272_v4 = vld [vmem:[#allocation14 + $0xec] ss:$16 sps:$4 sm:$0xff]  }
 0x5c5   : > { %v7470_v14 = vpop.eup %7469 }
 0x5c6   : > { %6425 = vmatmul.mubr.msk.bf16.vlgmr.msra.gmra.mrb[28].mxu1 %vm3455_vm4, %v3976_v9  ;;  %v7472_v60 = vpop.eup %7471  ;;  %v8671_v10 = vmul.f32 %v7470_v14, %v8594_v61  ;;  %v4352_v58 = vpop.permute.xlu0 %4351  ;;  %v7275_v9 = vld [vmem:[#allocation14 + $0x104] ss:$16 sps:$4 sm:$0xff]   ;;  %v7278_v14 = vld [vmem:[#allocation14 + $0x10c] ss:$16 sps:$4 sm:$0xff]  }
 0x5c7   : > { %6435 = vmatpush3.bf16.msra.mxu1 %v4103_v8  ;;  %6436 = vmatprep.mubr.msk.bf16.mxu1 %vm7860_vm0, %v7859_v63  ;;  %v8675_v12 = vmul.f32 %v7472_v60, %v8590_v17  ;;  %v7270_v8 = vld [vmem:[#allocation14 + $0xe8] ss:$16 sps:$4 sm:$0xff]   ;;  %v7273_v60 = vld [vmem:[#allocation14 + $0x100] ss:$16 sps:$4 sm:$0xff]  }
 0x5c8   : > { %6446 = vmatprep.subr.bf16.mxu1 %v7859_v63 }
 0x5c9   : > { %v4100_v32 = vpack.c.bf16 %v8671_v10, %v8675_v12  ;;  %v7474_v0 = vpop.eup %7473 }
 0x5ca   : > { %v7476_v27 = vpop.eup %7475  ;;  %v8684_v41 = vmul.f32 %v7474_v0, %v8602_v21  ;;  %v7284_v0 = vld [vmem:[#allocation14 + $0x12c] ss:$16 sps:$4 sm:$0xff]  }
 0x5cb   : > { %v8688_v15 = vmul.f32 %v7476_v27, %v8598_v23  ;;  %v7279_v27 = vld [vmem:[#allocation14 + $0x120] ss:$16 sps:$4 sm:$0xff]  }
 0x5cd   : > { %v4225_v43 = vpack.c.bf16 %v8684_v41, %v8688_v15  ;;  %v7478_v17 = vpop.eup %7477 }
 0x5ce   : > { %6437 = vmatmul.mubr.msk.bf16.vlgmr.msra.gmra.mrb[32].mxu1 %vm3455_vm4, %v4100_v32  ;;  %v7480_v61 = vpop.eup %7479  ;;  %v7281_v32 = vld [vmem:[#allocation14 + $0x124] ss:$16 sps:$4 sm:$0xff]  }
 0x5cf   : > { %6447 = vmatpush3.bf16.msra.mxu1 %v8529_v30  ;;  %6448 = vmatprep.mubr.msk.bf16.mxu1 %vm7860_vm0, %v7859_v63  ;;  %v8696_v30 = vmul.f32 %v7478_v17, %v8610_v46  ;;  %v8699_v18 = vmul.f32 %v7480_v61, %v8606_v44  ;;  %v7233_v46 = vld [vmem:[#allocation14 + $0x24] ss:$16 sps:$4 sm:$0xff]   ;;  %v7231_v44 = vld [vmem:[#allocation14 + $0x20] ss:$16 sps:$4 sm:$0xff]  }
 0x5d0   : > { %6458 = vmatprep.subr.bf16.mxu1 %v7859_v63  ;;  %v7287_v17 = vld [vmem:[#allocation14 + $0x144] ss:$16 sps:$4 sm:$0xff]   ;;  %v7285_v61 = vld [vmem:[#allocation14 + $0x140] ss:$16 sps:$4 sm:$0xff]  }
 0x5d1   : > { %v4349_v23 = vpack.c.bf16 %v8696_v30, %v8699_v18 }
 0x5d6   : > { %6449 = vmatmul.mubr.msk.bf16.vlgmr.msra.gmra.mrb[36].mxu1 %vm3455_vm4, %v4225_v43  ;;  %v7282_v43 = vld [vmem:[#allocation14 + $0x128] ss:$16 sps:$4 sm:$0xff]  }
 0x5d7   : > { %6459 = vmatpush3.bf16.msra.mxu1 %v4352_v58  ;;  %6460 = vmatprep.mubr.msk.bf16.mxu1 %vm7860_vm0, %v7859_v63  ;;  %v7225_v63 = vld [vmem:[#allocation14] ss:$16 sps:$4 sm:$0xff]   ;;  %v7290_v58 = vld [vmem:[#allocation14 + $0x14c] ss:$16 sps:$4 sm:$0xff]  }
 0x5d8   : > { %5373 = vmatprep.subr.bf16.mxu1 %v7230_v53  ;;  %5288 = vmatpush1.bf16.msra.mxu0 %v7225_v63  ;;  %v7294_v53 = vld [vmem:[#allocation14 + $0x168] ss:$16 sps:$4 sm:$0xff]   ;;  %v7299_v63 = vld [vmem:[#allocation14 + $0x184] ss:$16 sps:$4 sm:$0xff]  }
 0x5d9   : > { %5289 = vmatprep.subr.bf16.mxu0 %v7233_v46  ;;  %v7297_v46 = vld [vmem:[#allocation14 + $0x180] ss:$16 sps:$4 sm:$0xff]  }
 0x5dc   : > { %5290 = vmatpush1.bf16.msra.mxu0 %v7231_v44 }
 0x5dd   : > { %5291 = vmatprep.subr.bf16.mxu0 %v7239_v34 }
 0x5de   : > { %6461 = vmatmul.mubr.msk.bf16.vlgmr.msra.gmra.mrb[40].mxu1 %vm3455_vm4, %v4349_v23  ;;  %v7288_v23 = vld [vmem:[#allocation14 + $0x148] ss:$16 sps:$4 sm:$0xff]  }
 0x5df   : > { %5374 = vmatpush1.bf16.msra.mxu1 %v7228_v29  ;;  %v7302_v29 = vld [vmem:[#allocation14 + $0x18c] ss:$16 sps:$4 sm:$0xff]  }
 0x5e0   : > { %5375 = vmatprep.subr.bf16.mxu1 %v7236_v31  ;;  %5292 = vmatpush1.bf16.msra.mxu0 %v7237_v35  ;;  %v7305_v31 = vld [vmem:[#allocation14 + $0x1a4] ss:$16 sps:$4 sm:$0xff]  }
 0x5e1   : > { %5293 = vmatprep.subr.bf16.mxu0 %v7245_v42  ;;  %v7303_v42 = vld [vmem:[#allocation14 + $0x1a0] ss:$16 sps:$4 sm:$0xff]  }
 0x5e2   : > { %v8704_v20 = vpop.f32.mrb[12].mxu1 }
 0x5e3   : > { %v6378_v21 = vpop.f32.mrb[13].mxu1  ;;  %5376 = vmatpush1.bf16.msra.mxu1 %v7234_v55  ;;  %v7300_v55 = vld [vmem:[#allocation14 + $0x188] ss:$16 sps:$4 sm:$0xff]  }
 0x5e4   : > { %v8706_v25 = vpop.f32.mrb[14].mxu1  ;;  %5377 = vmatprep.subr.bf16.mxu1 %v7242_v2  ;;  %5294 = vmatpush1.bf16.msra.mxu0 %v7243_v39  ;;  %v7293_v21 = vld [vmem:[#allocation14 + $0x164] ss:$16 sps:$4 sm:$0xff]   ;;  %v7308_v2 = vld [vmem:[#allocation14 + $0x1ac] ss:$16 sps:$4 sm:$0xff]  }
 0x5e5   : > { %v6379_v24 = vpop.f32.mrb[15].mxu1  ;;  %5295 = vmatprep.subr.bf16.mxu0 %v7251_v19  ;;  %v7309_v19 = vld [vmem:[#allocation14 + $0x1c0] ss:$16 sps:$4 sm:$0xff]  }
 0x5e6   : > { %v7296_v24 = vld [vmem:[#allocation14 + $0x16c] ss:$16 sps:$4 sm:$0xff]  }
 0x5e7   : > { %5378 = vmatpush1.bf16.msra.mxu1 %v7240_v36 }
 0x5e8   : > { %5379 = vmatprep.subr.bf16.mxu1 %v7248_v48  ;;  %5296 = vmatpush1.bf16.msra.mxu0 %v7249_v51 }
 0x5e9   : > { %5297 = vmatprep.subr.bf16.mxu0 %v7257_v57  ;;  %v7314_v57 = vld [vmem:[#allocation14 + $0x1cc] ss:$16 sps:$4 sm:$0xff]  }
 0x5eb   : > { %5380 = vmatpush1.bf16.msra.mxu1 %v7246_v47  ;;  %v7306_v47 = vld [vmem:[#allocation14 + $0x1a8] ss:$16 sps:$4 sm:$0xff]  }
 0x5ec   : > { %5381 = vmatprep.subr.bf16.mxu1 %v7254_v50  ;;  %5298 = vmatpush1.bf16.msra.mxu0 %v7255_v59  ;;  %v7311_v50 = vld [vmem:[#allocation14 + $0x1c4] ss:$16 sps:$4 sm:$0xff]  }
 0x5ed   : > { %5299 = vmatprep.subr.bf16.mxu0 %v7263_v11  ;;  %v7320_v11 = vld [vmem:[#allocation14 + $0x1ec] ss:$16 sps:$4 sm:$0xff]  }
 0x5ef   : > { %5382 = vmatpush1.bf16.msra.mxu1 %v7252_v52  ;;  %v7312_v52 = vld [vmem:[#allocation14 + $0x1c8] ss:$16 sps:$4 sm:$0xff]  }
 0x5f0   : > { %5383 = vmatprep.subr.bf16.mxu1 %v7260_v3  ;;  %5300 = vmatpush1.bf16.msra.mxu0 %v7261_v5  ;;  %v7318_v5 = vld [vmem:[#allocation14 + $0x1e8] ss:$16 sps:$4 sm:$0xff]  }
 0x5f1   : > { %5301 = vmatprep.subr.bf16.mxu0 %v7269_v45 }
 0x5f3   : > { %5384 = vmatpush1.bf16.msra.mxu1 %v7258_v37  ;;  %v7317_v37 = vld [vmem:[#allocation14 + $0x1e4] ss:$16 sps:$4 sm:$0xff]  }
 0x5f4   : > { %5385 = vmatprep.subr.bf16.mxu1 %v7266_v62  ;;  %5302 = vmatpush1.bf16.msra.mxu0 %v7267_v49  ;;  %v7315_v62 = vld [vmem:[#allocation14 + $0x1e0] ss:$16 sps:$4 sm:$0xff]  }
 0x5f5   : > { %5303 = vmatprep.subr.bf16.mxu0 %v7275_v9 }
 0x5f7   : > { %5386 = vmatpush1.bf16.msra.mxu1 %v7264_v1 }
 0x5f8   : > { %5387 = vmatprep.subr.bf16.mxu1 %v7272_v4  ;;  %5304 = vmatpush1.bf16.msra.mxu0 %v7273_v60  ;;  %v7323_v4 = vld [vmem:[#allocation14 + $0x204] ss:$16 sps:$4 sm:$0xff]  }
 0x5f9   : > { %5305 = vmatprep.subr.bf16.mxu0 %v7281_v32 }
 0x5fb   : > { %5388 = vmatpush1.bf16.msra.mxu1 %v7270_v8  ;;  %v7326_v8 = vld [vmem:[#allocation14 + $0x20c] ss:$16 sps:$4 sm:$0xff]  }
 0x5fc   : > { %5389 = vmatprep.subr.bf16.mxu1 %v7278_v14  ;;  %5306 = vmatpush1.bf16.msra.mxu0 %v7279_v27 }
 0x5fd   : > { %5307 = vmatprep.subr.bf16.mxu0 %v7287_v17 }
 0x5ff   : > { %5390 = vmatpush1.bf16.msra.mxu1 %v7276_v16 }
 0x600   : > { %5391 = vmatprep.subr.bf16.mxu1 %v7284_v0  ;;  %5308 = vmatpush1.bf16.msra.mxu0 %v7285_v61 }
 0x601   : > { %5309 = vmatprep.subr.bf16.mxu0 %v7293_v21 }
 0x603   : > { %5392 = vmatpush1.bf16.msra.mxu1 %v7282_v43 }
 0x604   : > { %5393 = vmatprep.subr.bf16.mxu1 %v7290_v58  ;;  %5310 = vmatpush1.bf16.msra.mxu0 %v7291_v26 }
 0x605   : > { %5311 = vmatprep.subr.bf16.mxu0 %v7299_v63 }
 0x607   : > { %5394 = vmatpush1.bf16.msra.mxu1 %v7288_v23 }
 0x608   : > { %5395 = vmatprep.subr.bf16.mxu1 %v7296_v24  ;;  %5312 = vmatpush1.bf16.msra.mxu0 %v7297_v46 }
 0x609   : > { %5313 = vmatprep.subr.bf16.mxu0 %v7305_v31 }
 0x60b   : > { %5396 = vmatpush1.bf16.msra.mxu1 %v7294_v53 }
 0x60c   : > { %5397 = vmatprep.subr.bf16.mxu1 %v7302_v29  ;;  %5314 = vmatpush1.bf16.msra.mxu0 %v7303_v42 }
 0x60d   : > { %5315 = vmatprep.subr.bf16.mxu0 %v7311_v50 }
 0x60f   : > { %5398 = vmatpush1.bf16.msra.mxu1 %v7300_v55 }
 0x610   : > { %5399 = vmatprep.subr.bf16.mxu1 %v7308_v2  ;;  %5316 = vmatpush1.bf16.msra.mxu0 %v7309_v19 }
 0x611   : > { %5317 = vmatprep.subr.bf16.mxu0 %v7317_v37  ;;  %v7332_v37 = vld [vmem:[#allocation14 + $0x22c] ss:$16 sps:$4 sm:$0xff]  }
 0x613   : > { %5400 = vmatpush1.bf16.msra.mxu1 %v7306_v47 }
 0x614   : > { %5401 = vmatprep.subr.bf16.mxu1 %v7314_v57  ;;  %5318 = vmatpush1.bf16.msra.mxu0 %v7315_v62  ;;  %v7338_v62 = vld [vmem:[#allocation14 + $0x24c] ss:$16 sps:$4 sm:$0xff]  }
 0x615   : > { %5330 = vmatprep.subr.bf16.mxu0 %v7323_v4  ;;  %v7342_v4 = vld [vmem:[#allocation14 + $0x268] ss:$16 sps:$4 sm:$0xff]  }
 0x617   : > { %5402 = vmatpush1.bf16.msra.mxu1 %v7312_v52  ;;  %v7324_v52 = vld [vmem:[#allocation14 + $0x208] ss:$16 sps:$4 sm:$0xff]  }
 0x618   : > { %5403 = vmatprep.subr.bf16.mxu1 %v7320_v11  ;;  %v7335_v11 = vld [vmem:[#allocation14 + $0x244] ss:$16 sps:$4 sm:$0xff]  }
 0x61b   : > { %5404 = vmatpush1.bf16.msra.mxu1 %v7318_v5  ;;  %v7336_v5 = vld [vmem:[#allocation14 + $0x248] ss:$16 sps:$4 sm:$0xff]  }
 0x61c   : > { %5416 = vmatprep.subr.bf16.mxu1 %v7326_v8  ;;  %v7350_v8 = vld [vmem:[#allocation14 + $0x28c] ss:$16 sps:$4 sm:$0xff]  }
 0x65a   : > { %v3644_v44 = vpop.f32.mrb[16].mxu1 }
 0x65b   : > { %v6390_v34 = vpop.f32.mrb[17].mxu1 }
 0x65c   : > { %v3647_v35 = vpop.f32.mrb[18].mxu1 }
 0x65d   : > { %v6634_v36 = vpack.i.bf16 %v3647_v35, %v3644_v44  ;;  %v6391_v39 = vpop.f32.mrb[19].mxu1 }
 0x662   : > { %v3765_v48 = vpop.f32.mrb[20].mxu1 }
 0x663   : > { %v6402_v51 = vpop.f32.mrb[21].mxu1 }
 0x664   : > { %v3768_v3 = vpop.f32.mrb[22].mxu1  ;;  %v7321_v51 = vld [vmem:[#allocation14 + $0x200] ss:$16 sps:$4 sm:$0xff]  }
 0x665   : > { %v6403_v59 = vpop.f32.mrb[23].mxu1 }
 0x666   : > { %v7329_v59 = vld [vmem:[#allocation14 + $0x224] ss:$16 sps:$4 sm:$0xff]  }
 0x66a   : > { %v3893_v1 = vpop.f32.mrb[24].mxu1 }
 0x66b   : > { %v6414_v45 = vpop.f32.mrb[25].mxu1 }
 0x66c   : > { %v3896_v49 = vpop.f32.mrb[26].mxu1  ;;  %v7339_v45 = vld [vmem:[#allocation14 + $0x260] ss:$16 sps:$4 sm:$0xff]  }
 0x66d   : > { %v6629_v9 = vpack.i.bf16 %v3896_v49, %v3893_v1  ;;  %v6415_v14 = vpop.f32.mrb[27].mxu1  ;;  %v7344_v1 = vld [vmem:[#allocation14 + $0x26c] ss:$16 sps:$4 sm:$0xff]   ;;  %v7347_v49 = vld [vmem:[#allocation14 + $0x284] ss:$16 sps:$4 sm:$0xff]  }
 0x66e   : > { %v7348_v14 = vld [vmem:[#allocation14 + $0x288] ss:$16 sps:$4 sm:$0xff]  }
 0x66f   : > { %6630 = vrot.lane.b32.xlu1 %v6629_v9, %s7861_s4  ;;  %v7345_v9 = vld [vmem:[#allocation14 + $0x280] ss:$16 sps:$4 sm:$0xff]  }
 0x673   : > { %6635 = vrot.lane.b32.xlu1 %v6634_v36, %s7861_s4 }
 0x699   : > { %v8710_v60 = vpop.f32.mrb[28].mxu1 }
 0x69a   : > { %v6426_v16 = vpop.f32.mrb[29].mxu1 }
 0x69b   : > { %v8712_v32 = vpop.f32.mrb[30].mxu1  ;;  %v7353_v16 = vld [vmem:[#allocation14 + $0x2a4] ss:$16 sps:$4 sm:$0xff]  }
 0x69c   : > { %v6427_v0 = vpop.f32.mrb[31].mxu1 }
 0x69d   : > { %v7356_v0 = vld [vmem:[#allocation14 + $0x2ac] ss:$16 sps:$4 sm:$0xff]  }
 0x6a1   : > { %v4142_v27 = vpop.f32.mrb[32].mxu1 }
 0x6a2   : > { %v6438_v43 = vpop.f32.mrb[33].mxu1 }
 0x6a3   : > { %v4145_v17 = vpop.f32.mrb[34].mxu1  ;;  %v7354_v43 = vld [vmem:[#allocation14 + $0x2a8] ss:$16 sps:$4 sm:$0xff]  }
 0x6a4   : > { %v6644_v58 = vpack.i.bf16 %v4145_v17, %v4142_v27  ;;  %v6439_v61 = vpop.f32.mrb[35].mxu1  ;;  %v7351_v27 = vld [vmem:[#allocation14 + $0x2a0] ss:$16 sps:$4 sm:$0xff]   ;;  %v7359_v17 = vld [vmem:[#allocation14 + $0x2c4] ss:$16 sps:$4 sm:$0xff]  }
 0x6a5   : > { %v7357_v61 = vld [vmem:[#allocation14 + $0x2c0] ss:$16 sps:$4 sm:$0xff]  }
 0x6a6   : > { %6645 = vrot.lane.b32.xlu1 %v6644_v58, %s7861_s4  ;;  %v7362_v58 = vld [vmem:[#allocation14 + $0x2cc] ss:$16 sps:$4 sm:$0xff]  }
 0x6a9   : > { %v8715_v23 = vpop.f32.mrb[36].mxu1 }
 0x6aa   : > { %v6450_v21 = vpop.f32.mrb[37].mxu1 }
 0x6ab   : > { %v8717_v24 = vpop.f32.mrb[38].mxu1  ;;  %v7360_v21 = vld [vmem:[#allocation14 + $0x2c8] ss:$16 sps:$4 sm:$0xff]  }
 0x6ac   : > { %v6451_v26 = vpop.f32.mrb[39].mxu1 }
 0x6ad   : > { %v7365_v26 = vld [vmem:[#allocation14 + $0x2e4] ss:$16 sps:$4 sm:$0xff]  }
 0x6b1   : > { %v4391_v53 = vpop.f32.mrb[40].mxu1 }
 0x6b2   : > { %v6462_v63 = vpop.f32.mrb[41].mxu1 }
 0x6b3   : > { %v4394_v29 = vpop.f32.mrb[42].mxu1  ;;  %v7363_v63 = vld [vmem:[#allocation14 + $0x2e0] ss:$16 sps:$4 sm:$0xff]  }
 0x6b4   : > { %v6639_v46 = vpack.i.bf16 %v4394_v29, %v4391_v53  ;;  %v6463_v44 = vpop.f32.mrb[43].mxu1  ;;  %v7368_v53 = vld [vmem:[#allocation14 + $0x2ec] ss:$16 sps:$4 sm:$0xff]   ;;  %v7366_v29 = vld [vmem:[#allocation14 + $0x2e8] ss:$16 sps:$4 sm:$0xff]  }
 0x6b5   : > { %v7374_v44 = vld [vmem:[#allocation14 + $0x30c] ss:$16 sps:$4 sm:$0xff]  }
 0x6b6   : > { %6640 = vrot.lane.b32.xlu0 %v6639_v46, %s7861_s4  ;;  %v7371_v46 = vld [vmem:[#allocation14 + $0x304] ss:$16 sps:$4 sm:$0xff]  }
 0x6e1   : > { %v6631_v55 = vpop.permute.xlu1 %6630 }
 0x6e2   : > { %v6633_v31 = vunpack.i.h.bf16 %v6631_v55  ;;  %v6632_v34 = vunpack.i.l.bf16 %v6631_v55  ;;  %v7369_v55 = vld [vmem:[#allocation14 + $0x300] ss:$16 sps:$4 sm:$0xff]  }
 0x6e4   : > { %v4509_v2 = vsel %vm3403_vm1, %v3765_v48, %v6632_v34  ;;  %v4510_v35 = vsel %vm3403_vm1, %v3768_v3, %v6633_v31  ;;  %v7327_v48 = vld [vmem:[#allocation14 + $0x220] ss:$16 sps:$4 sm:$0xff]   ;;  %v7330_v3 = vld [vmem:[#allocation14 + $0x228] ss:$16 sps:$4 sm:$0xff]   ;;  %v7377_v34 = vld [vmem:[#allocation14 + $0x324] ss:$16 sps:$4 sm:$0xff]  }
 0x6e5   : > { %v6636_v36 = vpop.permute.xlu1 %6635  ;;  %v4516_v39 = vpack.c.bf16 %v4510_v35, %v4509_v2  ;;  %v7372_v31 = vld [vmem:[#allocation14 + $0x308] ss:$16 sps:$4 sm:$0xff]   ;;  %v7380_v2 = vld [vmem:[#allocation14 + $0x32c] ss:$16 sps:$4 sm:$0xff]   ;;  %v7375_v35 = vld [vmem:[#allocation14 + $0x320] ss:$16 sps:$4 sm:$0xff]  }
 0x6e6   : > { %v6638_v42 = vunpack.i.h.bf16 %v6636_v36  ;;  %v6637_v47 = vunpack.i.l.bf16 %v6636_v36  ;;  %v7378_v36 = vld [vmem:[#allocation14 + $0x328] ss:$16 sps:$4 sm:$0xff]  }
 0x6e7   : > { %5319 = vmatprep.mubr.bf16.mxu0 %v4516_v39  ;;  %5405 = vmatprep.mubr.bf16.mxu1 %v4516_v39  ;;  %v7383_v39 = vld [vmem:[#allocation14 + $0x344] ss:$16 sps:$4 sm:$0xff]  }
 0x6e8   : > { %v4508_v19 = vsel %vm3403_vm1, %v8706_v25, %v6638_v42  ;;  %v4507_v50 = vsel %vm3403_vm1, %v8704_v20, %v6637_v47  ;;  %v7333_v25 = vld [vmem:[#allocation14 + $0x240] ss:$16 sps:$4 sm:$0xff]   ;;  %v7341_v20 = vld [vmem:[#allocation14 + $0x264] ss:$16 sps:$4 sm:$0xff]   ;;  %v7386_v42 = vld [vmem:[#allocation14 + $0x34c] ss:$16 sps:$4 sm:$0xff]  }
 0x6e9   : > { %v4515_v57 = vpack.c.bf16 %v4508_v19, %v4507_v50  ;;  %v7381_v47 = vld [vmem:[#allocation14 + $0x340] ss:$16 sps:$4 sm:$0xff]   ;;  %v7384_v19 = vld [vmem:[#allocation14 + $0x348] ss:$16 sps:$4 sm:$0xff]   ;;  %v7389_v50 = vld [vmem:[#allocation14 + $0x364] ss:$16 sps:$4 sm:$0xff]  }
 0x6eb   : > { %5320 = vmatmul.mubr.bf16.vlgmr.msra.gmra.mrb[44].mxu0 %v4515_v57  ;;  %5406 = vmatmul.mubr.bf16.vlgmr.msra.gmra.mrb[44].mxu1 %v4515_v57  ;;  %v7390_v57 = vld [vmem:[#allocation14 + $0x368] ss:$16 sps:$4 sm:$0xff]  }
 0x6ec   : > { %5331 = vmatpush1.bf16.msra.mxu0 %v7321_v51  ;;  %5417 = vmatpush1.bf16.msra.mxu1 %v7324_v52  ;;  %v7392_v51 = vld [vmem:[#allocation14 + $0x36c] ss:$16 sps:$4 sm:$0xff]   ;;  %v7387_v52 = vld [vmem:[#allocation14 + $0x360] ss:$16 sps:$4 sm:$0xff]  }
 0x6ed   : > { %5332 = vmatprep.subr.bf16.mxu0 %v7329_v59  ;;  %5418 = vmatprep.subr.bf16.mxu1 %v7332_v37  ;;  %v7395_v59 = vld [vmem:[#allocation14 + $0x384] ss:$16 sps:$4 sm:$0xff]   ;;  %v7398_v37 = vld [vmem:[#allocation14 + $0x38c] ss:$16 sps:$4 sm:$0xff]  }
 0x6f0   : > { %5333 = vmatpush1.bf16.msra.mxu0 %v7327_v48  ;;  %5419 = vmatpush1.bf16.msra.mxu1 %v7330_v3  ;;  %v7393_v3 = vld [vmem:[#allocation14 + $0x380] ss:$16 sps:$4 sm:$0xff]  }
 0x6f1   : > { %5334 = vmatprep.subr.bf16.mxu0 %v7335_v11  ;;  %5420 = vmatprep.subr.bf16.mxu1 %v7338_v62  ;;  %v7396_v11 = vld [vmem:[#allocation14 + $0x388] ss:$16 sps:$4 sm:$0xff]  }
 0x6f4   : > { %5335 = vmatpush1.bf16.msra.mxu0 %v7333_v25  ;;  %5421 = vmatpush1.bf16.msra.mxu1 %v7336_v5  ;;  %v7401_v5 = vld [vmem:[#allocation14 + $0x3a4] ss:$16 sps:$4 sm:$0xff]  }
 0x6f5   : > { %5336 = vmatprep.subr.bf16.mxu0 %v7341_v20  ;;  %5422 = vmatprep.subr.bf16.mxu1 %v7344_v1  ;;  %v7404_v20 = vld [vmem:[#allocation14 + $0x3ac] ss:$16 sps:$4 sm:$0xff]  }
 0x6f8   : > { %5337 = vmatpush1.bf16.msra.mxu0 %v7339_v45  ;;  %5423 = vmatpush1.bf16.msra.mxu1 %v7342_v4 }
 0x6f9   : > { %5338 = vmatprep.subr.bf16.mxu0 %v7347_v49  ;;  %5424 = vmatprep.subr.bf16.mxu1 %v7350_v8  ;;  %v7399_v49 = vld [vmem:[#allocation14 + $0x3a0] ss:$16 sps:$4 sm:$0xff]   ;;  %v7402_v8 = vld [vmem:[#allocation14 + $0x3a8] ss:$16 sps:$4 sm:$0xff]  }
 0x6fc   : > { %5339 = vmatpush1.bf16.msra.mxu0 %v7345_v9  ;;  %5425 = vmatpush1.bf16.msra.mxu1 %v7348_v14  ;;  %v7407_v9 = vld [vmem:[#allocation14 + $0x3c4] ss:$16 sps:$4 sm:$0xff]   ;;  %v7410_v14 = vld [vmem:[#allocation14 + $0x3cc] ss:$16 sps:$4 sm:$0xff]  }
 0x6fd   : > { %5340 = vmatprep.subr.bf16.mxu0 %v7353_v16  ;;  %5426 = vmatprep.subr.bf16.mxu1 %v7356_v0  ;;  %v7405_v16 = vld [vmem:[#allocation14 + $0x3c0] ss:$16 sps:$4 sm:$0xff]   ;;  %v7408_v0 = vld [vmem:[#allocation14 + $0x3c8] ss:$16 sps:$4 sm:$0xff]  }
 0x700   : > { %5341 = vmatpush1.bf16.msra.mxu0 %v7351_v27  ;;  %5427 = vmatpush1.bf16.msra.mxu1 %v7354_v43  ;;  %v7413_v27 = vld [vmem:[#allocation14 + $0x3e4] ss:$16 sps:$4 sm:$0xff]   ;;  %v7414_v43 = vld [vmem:[#allocation14 + $0x3e8] ss:$16 sps:$4 sm:$0xff]  }
 0x701   : > { %5342 = vmatprep.subr.bf16.mxu0 %v7359_v17  ;;  %5428 = vmatprep.subr.bf16.mxu1 %v7362_v58 }
 0x704   : > { %5343 = vmatpush1.bf16.msra.mxu0 %v7357_v61  ;;  %5429 = vmatpush1.bf16.msra.mxu1 %v7360_v21 }
 0x705   : > { %5344 = vmatprep.subr.bf16.mxu0 %v7365_v26  ;;  %5430 = vmatprep.subr.bf16.mxu1 %v7368_v53 }
 0x708   : > { %5345 = vmatpush1.bf16.msra.mxu0 %v7363_v63  ;;  %5431 = vmatpush1.bf16.msra.mxu1 %v7366_v29 }
 0x709   : > { %5346 = vmatprep.subr.bf16.mxu0 %v7371_v46  ;;  %5432 = vmatprep.subr.bf16.mxu1 %v7374_v44  ;;  %v7485_v46 = vld [vmem:[%s8274_s21] sm:$0xff] }
 0x70c   : > { %5347 = vmatpush1.bf16.msra.mxu0 %v7369_v55  ;;  %5433 = vmatpush1.bf16.msra.mxu1 %v7372_v31 }
 0x70d   : > { %5348 = vmatprep.subr.bf16.mxu0 %v7377_v34  ;;  %5434 = vmatprep.subr.bf16.mxu1 %v7380_v2 }
 0x710   : > { %5349 = vmatpush1.bf16.msra.mxu0 %v7375_v35  ;;  %5435 = vmatpush1.bf16.msra.mxu1 %v7378_v36  ;;  %v7487_v35 = vld [vmem:[%s8274_s21 + $0x20] sm:$0xff] }
 0x711   : > { %5350 = vmatprep.subr.bf16.mxu0 %v7383_v39  ;;  %5436 = vmatprep.subr.bf16.mxu1 %v7386_v42 }
 0x714   : > { %5351 = vmatpush1.bf16.msra.mxu0 %v7381_v47  ;;  %5437 = vmatpush1.bf16.msra.mxu1 %v7384_v19  ;;  %v7488_v47 = vld [vmem:[%s8274_s21 + $0x10] sm:$0xff] }
 0x715   : > { %5352 = vmatprep.subr.bf16.mxu0 %v7389_v50  ;;  %5438 = vmatprep.subr.bf16.mxu1 %v7392_v51  ;;  %v7489_v51 = vld [vmem:[%s8274_s21 + $0x28] sm:$0xff] }
 0x718   : > { %v6646_v48 = vpop.permute.xlu1 %6645  ;;  %5353 = vmatpush1.bf16.msra.mxu0 %v7387_v52  ;;  %5439 = vmatpush1.bf16.msra.mxu1 %v7390_v57  ;;  %v7490_v57 = vld [vmem:[%s8274_s21 + $0x18] sm:$0xff] }
 0x719   : > { %v6648_v62 = vunpack.i.h.bf16 %v6646_v48  ;;  %v6647_v25 = vunpack.i.l.bf16 %v6646_v48  ;;  %5354 = vmatprep.subr.bf16.mxu0 %v7395_v59  ;;  %5440 = vmatprep.subr.bf16.mxu1 %v7398_v37  ;;  %v7491_v37 = vld [vmem:[%s8274_s21 + $0x30] sm:$0xff] }
 0x71b   : > { %v4512_v1 = vsel %vm3403_vm1, %v8712_v32, %v6648_v62  ;;  %v4511_v45 = vsel %vm3403_vm1, %v8710_v60, %v6647_v25  ;;  %v7416_v32 = vld [vmem:[#allocation14 + $0x3ec] ss:$16 sps:$4 sm:$0xff]   ;;  %v7411_v60 = vld [vmem:[#allocation14 + $0x3e0] ss:$16 sps:$4 sm:$0xff]  }
 0x71c   : > { %v4517_v4 = vpack.c.bf16 %v4512_v1, %v4511_v45  ;;  %5355 = vmatpush1.bf16.msra.mxu0 %v7393_v3  ;;  %5441 = vmatpush1.bf16.msra.mxu1 %v7396_v11  ;;  %v7492_v62 = vld [vmem:[%s8274_s21 + $0x38] sm:$0xff] }
 0x71d   : > { %5356 = vmatprep.subr.bf16.mxu0 %v7401_v5  ;;  %5442 = vmatprep.subr.bf16.mxu1 %v7404_v20 }
 0x720   : > { %5357 = vmatpush1.bf16.msra.mxu0 %v7399_v49  ;;  %5443 = vmatpush1.bf16.msra.mxu1 %v7402_v8 }
 0x721   : > { %5358 = vmatprep.subr.bf16.mxu0 %v7407_v9  ;;  %5444 = vmatprep.subr.bf16.mxu1 %v7410_v14 }
 0x724   : > { %5359 = vmatpush1.bf16.msra.mxu0 %v7405_v16  ;;  %5445 = vmatpush1.bf16.msra.mxu1 %v7408_v0 }
 0x725   : > { %5360 = vmatprep.subr.bf16.mxu0 %v7413_v27  ;;  %5446 = vmatprep.subr.bf16.mxu1 %v7416_v32 }
 0x728   : > { %v6641_v17 = vpop.permute.xlu0 %6640  ;;  %5361 = vmatpush1.bf16.msra.mxu0 %v7411_v60  ;;  %5447 = vmatpush1.bf16.msra.mxu1 %v7414_v43 }
 0x729   : > { %v6643_v58 = vunpack.i.h.bf16 %v6641_v17  ;;  %v6642_v61 = vunpack.i.l.bf16 %v6641_v17 }
 0x72b   : > { %v4513_v21 = vsel %vm3403_vm1, %v8715_v23, %v6642_v61  ;;  %v4514_v26 = vsel %vm3403_vm1, %v8717_v24, %v6643_v58  ;;  %v7486_v23 = vld [vmem:[%s8274_s21 + $0x8] sm:$0xff]  ;;  %s8975_s21 = sld [smem:[#allocation39_spill]] }
 0x72c   : > { %v4518_v53 = vpack.c.bf16 %v4514_v26, %v4513_v21 }
 0x72e   : > { %5362 = vmatprep.mubr.bf16.mxu0 %v4518_v53  ;;  %5448 = vmatprep.mubr.bf16.mxu1 %v4518_v53 }
 0x72f   : > { %5363 = vmatmul.mubr.bf16.vlgmr.msra.gmra.mrb[44].mxu0 %v4517_v4  ;;  %5449 = vmatmul.mubr.bf16.vlgmr.msra.gmra.mrb[44].mxu1 %v4517_v4 }
 0x731   : > { %s8806_s17 = scalar_lea.hbm %s8975_s21, %s6335_s25 }
 0x802   : > { %v5364_v63 = vpop.f32.mrb[44].mxu0  ;;  %v5450_v29 = vpop.f32.mrb[44].mxu1 }
 0x803   : > { %v6464_v44 = vadd.f32 %v7485_v46, %v5364_v63  ;;  %v5366_v55 = vpop.f32.mrb[45].mxu0  ;;  %v5452_v31 = vpop.f32.mrb[45].mxu1  ;;  %v6468_v19 = vadd.f32 %v7488_v47, %v5450_v29 }
 0x804   : > { %v6465_v34 = vadd.f32 %v7486_v23, %v5366_v55  ;;  %v5368_v2 = vpop.f32.mrb[46].mxu0  ;;  %v5454_v24 = vpop.f32.mrb[46].mxu1  ;;  %v6469_v59 = vadd.f32 %v7490_v57, %v5452_v31 }
 0x805   : > { %v6466_v36 = vadd.f32 %v7487_v35, %v5368_v2  ;;  %v5370_v39 = vpop.f32.mrb[47].mxu0  ;;  %v5456_v42 = vpop.f32.mrb[47].mxu1  ;;  %v6470_v48 = vadd.f32 %v7491_v37, %v5454_v24 }
 0x806   : > { %v5459_v50 = vadd.f32 %v6465_v34, %v6464_v44  ;;  %v6467_v52 = vadd.f32 %v7489_v51, %v5370_v39  ;;  %v6471_v25 = vadd.f32 %v7492_v62, %v5456_v42 }
 0x808   : > { %v5464_v3 = vadd.f32 %v6467_v52, %v6466_v36  ;;  %v5460_v11 = vadd.f32 %v6468_v19, %v5459_v50 }
 0x80a   : > { %v5461_v5 = vadd.f32 %v6469_v59, %v5460_v11  ;;  %v5465_v20 = vadd.f32 %v6470_v48, %v5464_v3 }
 0x80c   : > { %5462 = vadd.xlane.f32.xlu0 %v5461_v5  ;;  %v5466_v1 = vadd.f32 %v6471_v25, %v5465_v20 }
 0x80e   : > { %5467 = vadd.xlane.f32.xlu1 %v5466_v1 }
 0x81f   : > { %4402 = vrot.lane.b32.xlu1 %v8621_v38, %s7862_s14 }
 0x822   : > { %4400 = vrot.lane.b32.xlu0 %v8624_v40, %s7862_s14 }
 0x823   : > { %4410 = vrot.lane.b32.xlu1 %v8634_v22, %s7863_s5 }
 0x826   : > { %4408 = vrot.lane.b32.xlu0 %v8638_v28, %s7863_s5 }
 0x827   : > { %4418 = vrot.lane.b32.xlu1 %v8646_v13, %s7864_s24 }
 0x82a   : > { %4416 = vrot.lane.b32.xlu0 %v8650_v33, %s7864_s24 }
 0x82b   : > { %4426 = vrot.lane.b32.xlu1 %v8663_v6, %s7861_s4 }
 0x82e   : > { %4424 = vrot.lane.b32.xlu0 %v8660_v7, %s7861_s4 }
 0x82f   : > { %4434 = vrot.lane.b32.xlu1 %v8671_v10, %s7865_s11 }
 0x832   : > { %4432 = vrot.lane.b32.xlu0 %v8675_v12, %s7865_s11 }
 0x833   : > { %4442 = vrot.lane.b32.xlu1 %v8684_v41, %s7866_s26 }
 0x836   : > { %4440 = vrot.lane.b32.xlu0 %v8688_v15, %s7866_s26 }
 0x837   : > { %4450 = vrot.lane.b32.xlu1 %v8696_v30, %s7867_s30 }
 0x83a   : > { %4448 = vrot.lane.b32.xlu0 %v8699_v18, %s7867_s30 }
 0x899   : > { %v5463_v38 = vpop.xlane.xlu0 %5462 }
 0x89a   : > { %v5470_v40 = vmul.f32 0.001953125, %v5463_v38 }
 0x89b   : > { %v5468_v22 = vpop.xlane.xlu1 %5467 }
 0x89c   : > { %v8760_v28 = vsub.f32 %v6464_v44, %v5470_v40  ;;  %v8762_v13 = vsub.f32 %v6465_v34, %v5470_v40  ;;  %v5471_v33 = vmul.f32 0.001953125, %v5468_v22  ;;  %v8764_v6 = vsub.f32 %v6468_v19, %v5470_v40 }
 0x89d   : > { %v4401_v7 = vpop.permute.xlu0 %4400  ;;  %v8772_v30 = vsub.f32 %v6469_v59, %v5470_v40 }
 0x89e   : > { %v8766_v10 = vsub.f32 %v6466_v36, %v5471_v33  ;;  %v8768_v12 = vsub.f32 %v6467_v52, %v5471_v33  ;;  %v5480_v41 = vmul.f32 %v8760_v28, %v8760_v28  ;;  %v5481_v18 = vmul.f32 %v8762_v13, %v8762_v13 }
 0x89f   : > { %v4403_v15 = vpop.permute.xlu1 %4402  ;;  %v8776_v45 = vsub.f32 %v6470_v48, %v5471_v33  ;;  %v8778_v4 = vsub.f32 %v6471_v25, %v5471_v33  ;;  %v5482_v14 = vmul.f32 %v8764_v6, %v8764_v6  ;;  %v5483_v60 = vmul.f32 %v8772_v30, %v8772_v30 }
 0x8a0   : > { %v5484_v49 = vmul.f32 %v8766_v10, %v8766_v10  ;;  %v5485_v8 = vmul.f32 %v8768_v12, %v8768_v12  ;;  %v5488_v16 = vadd.f32 %v5481_v18, %v5480_v41  ;;  %v4454_v55 = vsel %vm3455_vm4, %v8566_v54, %v4401_v7 }
 0x8a1   : > { %v4409_v9 = vpop.permute.xlu0 %4408  ;;  %v5486_v0 = vmul.f32 %v8776_v45, %v8776_v45  ;;  %v5487_v17 = vmul.f32 %v8778_v4, %v8778_v4  ;;  %v4455_v34 = vsel %vm3455_vm4, %v8569_v56, %v4403_v15 }
 0x8a2   : > { %v5493_v27 = vadd.f32 %v5485_v8, %v5484_v49  ;;  %v5489_v43 = vadd.f32 %v5488_v16, %v5482_v14  ;;  %v4457_v31 = vsel %vm4456_vm5, %v4454_v55, %v4409_v9 }
 0x8a3   : > { %v4411_v32 = vpop.permute.xlu1 %4410 }
 0x8a4   : > { %v5494_v58 = vadd.f32 %v5493_v27, %v5486_v0  ;;  %v5490_v21 = vadd.f32 %v5489_v43, %v5483_v60  ;;  %v4458_v24 = vsel %vm4456_vm5, %v4455_v34, %v4411_v32 }
 0x8a5   : > { %v4417_v61 = vpop.permute.xlu0 %4416 }
 0x8a6   : > { %v5495_v26 = vadd.f32 %v5494_v58, %v5487_v17  ;;  %5491 = vadd.xlane.f32.xlu0 %v5490_v21  ;;  %v4460_v2 = vsel %vm4459_vm6, %v4457_v31, %v4417_v61 }
 0x8a7   : > { %v4419_v53 = vpop.permute.xlu1 %4418 }
 0x8a8   : > { %5496 = vadd.xlane.f32.xlu1 %v5495_v26  ;;  %v4461_v39 = vsel %vm4459_vm6, %v4458_v24, %v4419_v53 }
 0x8a9   : > { %v4425_v63 = vpop.permute.xlu0 %4424 }
 0x8aa   : > { %v4462_v35 = vsel %vm3403_vm1, %v4460_v2, %v4425_v63 }
 0x8ab   : > { %v4427_v29 = vpop.permute.xlu1 %4426 }
 0x8ac   : > { %v4463_v54 = vsel %vm3403_vm1, %v4461_v39, %v4427_v29 }
 0x8ad   : > { %v4433_v46 = vpop.permute.xlu0 %4432 }
 0x8ae   : > { %v4465_v42 = vsel %vm4464_vm7, %v4462_v35, %v4433_v46 }
 0x8af   : > { %v4435_v44 = vpop.permute.xlu1 %4434 }
 0x8b0   : > { %v4466_v50 = vsel %vm4464_vm7, %v4463_v54, %v4435_v44 }
 0x8b1   : > { %v4441_v23 = vpop.permute.xlu0 %4440 }
 0x8b2   : > { %v4468_v47 = vsel %vm4467_vm8, %v4465_v42, %v4441_v23 }
 0x8b3   : > { %v4443_v36 = vpop.permute.xlu1 %4442 }
 0x8b4   : > { %v4469_v52 = vsel %vm4467_vm8, %v4466_v50, %v4443_v36 }
 0x8b5   : > { %v4449_v19 = vpop.permute.xlu0 %4448 }
 0x8b6   : > { %v4471_v51 = vsel %vm4470_vm9, %v4468_v47, %v4449_v19 }
 0x8b7   : > { %4473 = vst [vmem:[%s536_s22] sm:$0xff] %v4471_v51  ;;  %v4451_v56 = vpop.permute.xlu1 %4450 }
 0x8b8   : > { %v4472_v57 = vsel %vm4470_vm9, %v4469_v52, %v4451_v56 }
 0x8b9   : > { %4474 = vst [vmem:[%s536_s22 + $0x8] sm:$0xff] %v4472_v57 }
 0x8ba   : > { %7738 = shalt.err (!%p7735_p6)
}
 0x8bb   : > { %s7739_s8 = scalar_lea.hbm %s8806_s17, 256  ;;  %s7743_s24 = scalar_lea.hbm %s8975_s21, 512 }
 0x8bc   : > { %p7740_p11 = scmp.ne.s32.totalorder %s8806_s17, %s7739_s8  ;;  %p7744_p0 = scmp.lt.u32.totalorder %s8806_s17, %s8975_s21 }
 0x8bd   : > { %p7745_p13 = scmp.lt.u32.totalorder %s7743_s24, %s7739_s8  ;;  %p7747_p9 = scmp.lt.u32.totalorder %s7739_s8, %s8806_s17 }
 0x8be   : > { %p7741_p2 = pnand %p7740_p11, %p8976_p12 }
 0x8bf   : > { %p7746_p7 = por %p7745_p13, %p7744_p0 }
 0x8c0   : > { %p7742_p4 = pneg %p7741_p2 }
 0x8c1   : > { %p7748_p10 = por %p7747_p9, %p7746_p7 }
 0x8c3   : > { %p7749_p1 = pnand %p7748_p10, %p7742_p4 }
 0x8c5   : > { %7752 = shalt.err (!%p7749_p1)
}
 0x8c6   : > { %s7869_s30 = smov 128   ;;  %s7870_s22 = smov 8  }
 0x8c7   : > { %6529 = dma.vmem_to_hbm [thread:$0]  (%p8976_p12), %s8800_s27, 256, %s8806_s17, %s5526_s20, %s7869_s30, %s7869_s30, %s7870_s22  }
 0x8c8   : > { %s6334_s25 = sshll.u32 %s8967_s19, 10  ;;  %s529_s29 = scalar_lea.vmem [#allocation16], %s8270_s28 }
 0x8c9   : > { %s5539_s15 = sshll.u32 %s529_s29, 4  ;;  %s8977_s20 = sld [smem:[#allocation38_spill]]  ;;  %s8847_s15 = int_to_ptr.vmem [resolvable:$true] %s5539_s15 }
 0x8ca   : > { %s5521_s28 = scalar_lea.sflag [#allocation4], %s8267_s23  ;;  %s7753_s19 = scalar_lea.vmem %s8847_s15, 1024 }
 0x8cb   : > { %p7754_p3 = scmp.ne.s32.totalorder %s8847_s15, %s7753_s19  ;;  %s7871_s9 = smov [#allocation16]  }
 0x8cc   : > { %s7757_s13 = sshll.u32 %s7871_s9, 4  ;;  %s7758_s13 = int_to_ptr.vmem [resolvable:$false] %s7757_s13 }
 0x8cd   : > { %p7755_p5 = pnand %p7754_p3, %p8976_p12  ;;  %s7759_s16 = scalar_lea.vmem %s7758_s13, 2048 }
 0x8ce   : > { %p7760_p6 = scmp.lt.s32.totalorder %s8847_s15, %s7758_s13  ;;  %p7761_p11 = scmp.lt.s32.totalorder %s7759_s16, %s7753_s19 }
 0x8cf   : > { %s8841_s1 = scalar_lea.hbm %s8977_s20, %s6334_s25  ;;  %p7756_p8 = pneg %p7755_p5 }
 0x8d0   : > { %p7762_p2 = por %p7761_p11, %p7760_p6 }
 0x8d2   : > { %p7763_p4 = pnand %p7762_p2, %p7756_p8 }
 0x933   : > { %v5492_v59 = vpop.xlane.xlu0 %5491 }
 0x934   : > { %v5498_v37 = vmul.f32 0.001953125, %v5492_v59 }
 0x935   : > { %v5497_v48 = vpop.xlane.xlu1 %5496 }
 0x936   : > { %v5499_v3 = vmul.f32 0.001953125, %v5497_v48  ;;  %v5500_v11 = vadd.f32 1e-05, %v5498_v37 }
 0x938   : > { %v5501_v62 = vadd.f32 1e-05, %v5499_v3  ;;  %7481 = vrsqrt.f32 %v5500_v11 }
 0x93a   : > { %7483 = vrsqrt.f32 %v5501_v62 }
 0x942   : > { %v7482_v25 = vpop.eup %7481 }
 0x943   : > { %v5504_v20 = vmul.f32 %v7482_v25, %v8760_v28  ;;  %v5505_v1 = vmul.f32 %v7482_v25, %v8762_v13  ;;  %v5506_v38 = vmul.f32 %v7482_v25, %v8764_v6  ;;  %v5507_v40 = vmul.f32 %v7482_v25, %v8772_v30 }
 0x944   : > { %v7484_v5 = vpop.eup %7483 }
 0x945   : > { %v5508_v22 = vmul.f32 %v7484_v5, %v8766_v10  ;;  %v5509_v33 = vmul.f32 %v7484_v5, %v8768_v12  ;;  %v5510_v7 = vmul.f32 %v7484_v5, %v8776_v45  ;;  %v5511_v28 = vmul.f32 %v7484_v5, %v8778_v4  ;;  %5512 = vst [vmem:[%s529_s29] sm:$0xff] %v5504_v20 }
 0x946   : > { %5513 = vst [vmem:[%s529_s29 + $0x8] sm:$0xff] %v5505_v1  ;;  %5514 = vst [vmem:[%s529_s29 + $0x10] sm:$0xff] %v5506_v38 }
 0x947   : > { %5515 = vst [vmem:[%s529_s29 + $0x18] sm:$0xff] %v5507_v40  ;;  %5516 = vst [vmem:[%s529_s29 + $0x20] sm:$0xff] %v5508_v22 }
 0x948   : > { %5517 = vst [vmem:[%s529_s29 + $0x28] sm:$0xff] %v5509_v33  ;;  %5518 = vst [vmem:[%s529_s29 + $0x30] sm:$0xff] %v5510_v7 }
 0x949   : > { %5519 = vst [vmem:[%s529_s29 + $0x38] sm:$0xff] %v5511_v28 }
 0x94a   : > { %7766 = shalt.err (!%p7763_p4)
}
 0x94b   : > { %s7767_s8 = scalar_lea.hbm %s8841_s1, 1024  ;;  %s7771_s24 = scalar_lea.hbm %s8977_s20, 2048 }
 0x94c   : > { %p7768_p0 = scmp.ne.s32.totalorder %s8841_s1, %s7767_s8  ;;  %p7772_p9 = scmp.lt.u32.totalorder %s8841_s1, %s8977_s20 }
 0x94d   : > { %p7773_p10 = scmp.lt.u32.totalorder %s7771_s24, %s7767_s8  ;;  %p7775_p3 = scmp.lt.u32.totalorder %s7767_s8, %s8841_s1 }
 0x94e   : > { %p7769_p13 = pnand %p7768_p0, %p8976_p12 }
 0x94f   : > { %p7774_p1 = por %p7773_p10, %p7772_p9 }
 0x950   : > { %p7770_p7 = pneg %p7769_p13 }
 0x951   : > { %p7776_p5 = por %p7775_p3, %p7774_p1 }
 0x953   : > { %p7777_p8 = pnand %p7776_p5, %p7770_p7 }
 0x955   : > { %7780 = shalt.err (!%p7777_p8)
}
 0x956   : > { %s7872_s30 = smov 512  }
 0x957   : > { %6528 = dma.vmem_to_hbm [thread:$0]  (%p8976_p12), %s8847_s15, 1024, %s8841_s1, %s5521_s28, %s7872_s30, %s7872_s30, %s7863_s5  }
 0x958 PF: > { %s8978_s22 = sld [smem:[#allocation27_spill]]  ;;  %s8979_s25 = sld [smem:[#allocation31_spill]] }
 0x959   : > { %p8981_p11 = scmp.ge.s32.totalorder %s7843_s12, 2 }
 0x95e   : > { %s5570_s29 = sand.u32 1, %s8978_s22   ;;  %p8980_p6 = scmp.ne.s32.totalorder %s8979_s25, 0 }
 0x95f   : > { %s5571_s27 = scalar_lea.sflag [#allocation4], %s5570_s29 }
 0x960   : > { %p6559_p2 = pnand %p8981_p11, %p8980_p6 }
 0x962   : > { %7822 = dma.done.wait (!%p6559_p2), %s5571_s27, 1024  }
 0x963   : > { %7824 = vsyncadd (!%p6559_p2), %s5571_s27, 4294966272  ;;  %s5580_s17 = scalar_lea.sflag [#allocation18], %s5570_s29 }
 0x964   : > { %7826 = dma.done.wait (!%p6559_p2), %s5580_s17, 256  }
 0x965   : > { %7828 = vsyncadd (!%p6559_p2), %s5580_s17, 4294967040  ;;  %s8982_s12 = sld [smem:[#allocation32_spill]]  ;;  %s8983_s23 = sld [smem:[#allocation28_spill]] }
 0x966   : > { %s8984_s11 = sld [smem:[#allocation34_spill]]  ;;  %s8985_s30 = smov %s7835_s10 }
 0x96b   : > { %p34_p12 = scmp.ge.s32.totalorder %s8982_s12, 4   ;;  %s8986_s10 = smov %s8983_s23 }
 0x96d   :  { %36 = sbr.rel (!%p34_p12) target bundleno = 19 (0x13), region = 167 }
 0x974   :  { %5585 = vsyncpa [#allocation3], 1 }
 0x975   :  { %5587 = vsyncpa [#allocation3 + $0x1], 1 }
 0x976   :  { %5588 = vsyncpa [#allocation6], 1 }
 0x977   :  { %5590 = vsyncpa [#allocation6 + $0x1], 1 }
 0x978   :  { %5591 = vsyncpa [#allocation9], 1 }
 0x979   :  { %5593 = vsyncpa [#allocation9 + $0x1], 1 }
 0x97a   :  { %5594 = vsyncpa [#allocation12], 1 }
 0x97b   :  { %5595 = vsyncpa [#allocation15], 1 }
 0x97c   :  { %5596 = vsyncpa [#allocation4], 1 }
 0x97d   :  { %5598 = vsyncpa [#allocation4 + $0x1], 1 }
 0x97e   :  { %5599 = vsyncpa [#allocation18], 1 }
 0x97f   :  { %5601 = vsyncpa [#allocation18 + $0x1], 1 }

</bundles_post_ra>
